<compile_context>
chip_gen: v7x
topology: tpu7x:2x2x1
jax: 0.10.0
libtpu: 0.0.40
codegen_flags: <defaults>
</compile_context>

<pallas_src>
import functools
import numpy as np
import jax
import jax.numpy as jnp
from jax.experimental import pallas as pl
from jax.experimental.pallas import tpu as pltpu

# Small hyperparameters consistent with the module's forward.
N_INPUTS = 4      # nInputs
D_MODEL  = 32     # dModel
N_HEAD   = 4      # nHead
N_LAYERS = 2      # nLayers
DIM_FF   = 64     # dimFeedForward
N_OUTPUT = 3      # nOutput
BATCH    = 2
SEQ      = 8
LN_EPS   = 1e-5   # PyTorch LayerNorm default
OUT_PAD  = 128    # lane-dense output width (>= 128)


def _layernorm(x, gamma, beta):
    mean = jnp.mean(x, axis=-1, keepdims=True)
    var = jnp.mean((x - mean) ** 2, axis=-1, keepdims=True)
    inv = jax.lax.rsqrt(var + LN_EPS)
    return (x - mean) * inv * gamma + beta


# ----------------------------- fused Pallas kernel -----------------------------

def fused_transformer_kernel(x_ref, posb_ref, w_in_ref, w_ref, w1_ref, b_ref,
                             wfc_ref, bfc_ref, o_ref,
                             *, batch, seq, n_head, n_layers, d_model, dim_ff):
    D, F = d_model, dim_ff
    hd = D // n_head
    BS = batch * seq
    scale = 1.0 / np.sqrt(hd)
    bf16 = jnp.bfloat16

    # ---- input projection + (bias + positional encoding), flat (B*S, D) ----
    h = jnp.dot(x_ref[...].astype(bf16), w_in_ref[...],
                preferred_element_type=jnp.float32) + posb_ref[...]

    # ---- unrolled post-LN TransformerEncoderLayers ----
    for l in range(n_layers):
        # Static sublane slices of the packed bf16 weight slab (row offsets are
        # multiples of the tile height -> no lane slicing at all).
        wq = w_ref[l, 0 * D:1 * D, :]
        wk = w_ref[l, 1 * D:2 * D, :]
        wv = w_ref[l, 2 * D:3 * D, :]
        wo = w_ref[l, 3 * D:4 * D, :]
        w2 = w_ref[l, 4 * D:4 * D + F, :]
        w1 = w1_ref[l]                                   # (D, F) bf16
        # f32 biases / LayerNorm params from the packed bias slab.
        bq  = b_ref[l, 0:1, :D]
        bk  = b_ref[l, 1:2, :D]
        bv  = b_ref[l, 2:3, :D]
        bo  = b_ref[l, 3:4, :D]
        b2  = b_ref[l, 4:5, :D]
        g1  = b_ref[l, 5:6, :D]
        be1 = b_ref[l, 6:7, :D]
        g2  = b_ref[l, 7:8, :D]
        be2 = b_ref[l, 8:9, :D]
        b1  = b_ref[l, 9:10, :]

        # --- self-attention: separate Q/K/V projections (no output slicing) ---
        hb = h.astype(bf16)
        q = jnp.dot(hb, wq, preferred_element_type=jnp.float32) + bq
        k = jnp.dot(hb, wk, preferred_element_type=jnp.float32) + bk
        v = jnp.dot(hb, wv, preferred_element_type=jnp.float32) + bv

        # (B*S, D) -> (B*n_head, S, hd): both attention contractions become a
        # single batched dot_general each (one batch dim, NT form).
        def to_heads(t):
            return (t.reshape(batch, seq, n_head, hd)
                     .transpose(0, 2, 1, 3)
                     .reshape(batch * n_head, seq, hd))

        qh = to_heads(q * scale).astype(bf16)
        kh = to_heads(k).astype(bf16)
        vh = to_heads(v).astype(bf16)

        s = jnp.einsum('bqd,bkd->bqk', qh, kh,
                       preferred_element_type=jnp.float32)        # (B*H, S, S)
        s = s - jnp.max(s, axis=-1, keepdims=True)
        p = jnp.exp(s)
        # exact reciprocal: EUP is idle at this size, restores tight agreement
        p = p * pl.reciprocal(jnp.sum(p, axis=-1, keepdims=True), approx=False)
        ctx = jnp.einsum('bqk,bkd->bqd', p.astype(bf16), vh,
                         preferred_element_type=jnp.float32)      # (B*H, S, hd)
        ctx2 = (ctx.reshape(batch, n_head, seq, hd)
                   .transpose(0, 2, 1, 3)
                   .reshape(BS, D))
        attn = jnp.dot(ctx2.astype(bf16), wo,
                       preferred_element_type=jnp.float32) + bo   # one WO matmul

        # --- Add & Norm -> FFN (ReLU) -> Add & Norm (post-LN ordering) ---
        y = _layernorm(h + attn, g1, be1)
        ff = jnp.maximum(
            jnp.dot(y.astype(bf16), w1, preferred_element_type=jnp.float32) + b1,
            0.0)
        ff = jnp.dot(ff.astype(bf16), w2,
                     preferred_element_type=jnp.float32) + b2
        h = _layernorm(y + ff, g2, be2)

    # ---- last-timestep FC head (== x.permute(1,0,2)[-1,:,:] in PyTorch) ----
    # Lane-dense store: (B, 128) padded output slab, real outputs sliced outside.
    h_last = h.reshape(batch, seq, D)[:, seq - 1, :]               # (B, D)
    o_ref[...] = (jnp.dot(h_last.astype(bf16), wfc_ref[...],
                          preferred_element_type=jnp.float32) + bfc_ref[...])


# ------------------------------- wrapper ----------------------------------

def pos_encoding(d_model, max_length=500):
    position = np.arange(max_length, dtype=np.float32)[:, None]
    div_term = np.exp(np.arange(0, d_model, 2, dtype=np.float32)
                      * -(np.log(10000.0) / d_model))
    sin = np.sin(position * div_term)
    cos = np.cos(position * div_term)
    pe = np.stack([sin, cos], axis=-1).reshape(max_length, d_model)
    return jnp.asarray(pe, jnp.float32)


def init_params(key):
    def lin(k, fan_in, fan_out):
        k1, k2 = jax.random.split(k)
        lim = 1.0 / np.sqrt(fan_in)
        w = jax.random.uniform(k1, (fan_in, fan_out), jnp.float32, -lim, lim)
        b = jax.random.uniform(k2, (fan_out,), jnp.float32, -lim, lim)
        return w, b

    keys = jax.random.split(key, 2 + 6 * N_LAYERS)
    params = {}
    params['w_in'], params['b_in'] = lin(keys[0], N_INPUTS, D_MODEL)
    params['w_fc'], params['b_fc'] = lin(keys[1], D_MODEL, N_OUTPUT)

    acc = {k: [] for k in ('wq', 'bq', 'wk', 'bk', 'wv', 'bv', 'wo', 'bo',
                           'ln1g', 'ln1b', 'w1', 'b1', 'w2', 'b2',
                           'ln2g', 'ln2b')}
    for l in range(N_LAYERS):
        kq, kk, kv, ko, k1, k2 = keys[2 + 6 * l: 2 + 6 * l + 6]
        wq, bq = lin(kq, D_MODEL, D_MODEL)
        wk, bk = lin(kk, D_MODEL, D_MODEL)
        wv, bv = lin(kv, D_MODEL, D_MODEL)
        wo, bo = lin(ko, D_MODEL, D_MODEL)
        w1, b1 = lin(k1, D_MODEL, DIM_FF)
        w2, b2 = lin(k2, DIM_FF, D_MODEL)
        vals = dict(wq=wq, bq=bq, wk=wk, bk=bk, wv=wv, bv=bv, wo=wo, bo=bo,
                    ln1g=jnp.ones((D_MODEL,), jnp.float32),
                    ln1b=jnp.zeros((D_MODEL,), jnp.float32),
                    w1=w1, b1=b1, w2=w2, b2=b2,
                    ln2g=jnp.ones((D_MODEL,), jnp.float32),
                    ln2b=jnp.zeros((D_MODEL,), jnp.float32))
        for k_, v_ in vals.items():
            acc[k_].append(v_)
    for k_, v_ in acc.items():
        params[k_] = jnp.stack(v_, axis=0)
    return params


def pack_params(params):
    """Pack 18 parameter tensors into a few contiguous slabs (fewer DMAs)."""
    L, D, F = N_LAYERS, D_MODEL, DIM_FF
    bf16 = jnp.bfloat16
    # Slab 1: per-layer matmul weights stacked along rows (bf16):
    #   rows [Wq; Wk; Wv; Wo; W2]  -> (L, 4D + F, D)
    w_slab = jnp.concatenate([params['wq'], params['wk'], params['wv'],
                              params['wo'], params['w2']], axis=1).astype(bf16)
    # Slab 2: FFN-1 weights (L, D, F) bf16.
    w1_slab = params['w1'].astype(bf16)

    # Slab 3: per-layer biases / LN params (f32), rows padded to lane width F.
    def row(a):                      # (L, n) -> (L, 1, F)
        n = a.shape[-1]
        return jnp.pad(a, ((0, 0), (0, F - n)))[:, None, :]
    b_slab = jnp.concatenate(
        [row(params[k]) for k in
         ('bq', 'bk', 'bv', 'bo', 'b2', 'ln1g', 'ln1b', 'ln2g', 'ln2b', 'b1')],
        axis=1)                                                   # (L, 10, F)

    # FC head padded to 128 output lanes (lane-dense store).
    wfc = jnp.zeros((D, OUT_PAD), jnp.float32).at[:, :N_OUTPUT].set(
        params['w_fc']).astype(bf16)
    bfc = jnp.zeros((1, OUT_PAD), jnp.float32).at[:, :N_OUTPUT].set(
        params['b_fc'][None, :])

    return dict(w_in=params['w_in'].astype(bf16), b_in=params['b_in'],
                w_slab=w_slab, w1_slab=w1_slab, b_slab=b_slab,
                wfc=wfc, bfc=bfc)


@jax.jit
def forward(x, packed, pos):
    B, S, Din = x.shape
    x_flat = x.reshape(B * S, Din)
    # bias + positional encoding tiled over batch in the wrapper: the kernel
    # keeps a single flat (B*S, D) activation (no reshape round trip).
    posb = jnp.tile(packed['b_in'][None, :] + pos[:S], (B, 1))    # (B*S, D)

    args = (x_flat, posb, packed['w_in'], packed['w_slab'], packed['w1_slab'],
            packed['b_slab'], packed['wfc'], packed['bfc'])

    # Advisory cost hint for XLA scheduling around the single fused call.
    flops = (2 * B * S * N_INPUTS * D_MODEL
             + N_LAYERS * (3 * 2 * B * S * D_MODEL * D_MODEL        # Q, K, V
                           + 4 * B * N_HEAD * S * S * (D_MODEL // N_HEAD)
                           + 2 * B * S * D_MODEL * D_MODEL          # out proj
                           + 4 * B * S * D_MODEL * DIM_FF)          # FFN
             + 2 * B * D_MODEL * OUT_PAD)
    transcendentals = N_LAYERS * B * N_HEAD * S * S + 4 * N_LAYERS * B * S
    bytes_accessed = (sum(int(np.prod(a.shape)) * a.dtype.itemsize for a in args)
                      + B * OUT_PAD * 4)

    kernel = functools.partial(fused_transformer_kernel,
                               batch=B, seq=S, n_head=N_HEAD, n_layers=N_LAYERS,
                               d_model=D_MODEL, dim_ff=DIM_FF)
    out = pl.pallas_call(
        kernel,
        out_shape=jax.ShapeDtypeStruct((B, OUT_PAD), jnp.float32),
        in_specs=[pl.BlockSpec(memory_space=pltpu.MemorySpace.VMEM)] * len(args),
        out_specs=pl.BlockSpec(memory_space=pltpu.MemorySpace.VMEM),
        cost_estimate=pl.CostEstimate(flops=flops,
                                      transcendentals=transcendentals,
                                      bytes_accessed=bytes_accessed),
    )(*args)
    return out[:, :N_OUTPUT]


def ref_forward(x, params, pos):
    # Pure-JAX f32 reference with identical math (eval-mode PyTorch semantics).
    B, S, _ = x.shape
    D, hd = D_MODEL, D_MODEL // N_HEAD
    h = x @ params['w_in'] + params['b_in'] + pos[:S]
    for l in range(N_LAYERS):
        q = h @ params['wq'][l] + params['bq'][l]
        k = h @ params['wk'][l] + params['bk'][l]
        v = h @ params['wv'][l] + params['bv'][l]
        qh = q.reshape(B, S, N_HEAD, hd)
        kh = k.reshape(B, S, N_HEAD, hd)
        vh = v.reshape(B, S, N_HEAD, hd)
        s = jnp.einsum('bqhd,bkhd->bhqk', qh, kh) / np.sqrt(hd)
        p = jax.nn.softmax(s, axis=-1)
        ctx = jnp.einsum('bhqk,bkhd->bqhd', p, vh).reshape(B, S, D)
        attn = ctx @ params['wo'][l] + params['bo'][l]
        y = _layernorm(h + attn, params['ln1g'][l], params['ln1b'][l])
        ff = (jax.nn.relu(y @ params['w1'][l] + params['b1'][l])
              @ params['w2'][l] + params['b2'][l])
        h = _layernorm(y + ff, params['ln2g'][l], params['ln2b'][l])
    return h[:, -1, :] @ params['w_fc'] + params['b_fc']


if __name__ == "__main__":
    key = jax.random.PRNGKey(0)
    kx, kp = jax.random.split(key)
    x = jax.random.normal(kx, (BATCH, SEQ, N_INPUTS), jnp.float32)
    params = init_params(kp)
    packed = pack_params(params)
    pos = pos_encoding(D_MODEL)

    out = forward(x, packed, pos)
    out = jax.block_until_ready(out)
    assert out.shape == (BATCH, N_OUTPUT)

    ref = ref_forward(x, params, pos)
    err = float(np.max(np.abs(np.asarray(out) - np.asarray(ref))))
    # bf16 MXU operands inside the kernel vs. the f32 reference -> loose tol.
    assert np.allclose(np.asarray(out), np.asarray(ref),
                       atol=5e-2, rtol=5e-2), err

    print("KERNEL_OK")
</pallas_src>

<mosaic_0001>
module attributes {stable_mosaic.version = 11 : i64} {
  func.func @fused_transformer_kernel(%arg0: memref<16x4xf32, #tpu.memory_space<vmem>>, %arg1: memref<16x32xf32, #tpu.memory_space<vmem>>, %arg2: memref<4x32xbf16, #tpu.memory_space<vmem>>, %arg3: memref<2x192x32xbf16, #tpu.memory_space<vmem>>, %arg4: memref<2x32x64xbf16, #tpu.memory_space<vmem>>, %arg5: memref<2x10x64xf32, #tpu.memory_space<vmem>>, %arg6: memref<32x128xbf16, #tpu.memory_space<vmem>>, %arg7: memref<1x128xf32, #tpu.memory_space<vmem>>, %arg8: memref<2x128xf32, #tpu.memory_space<vmem>>) attributes {dimension_semantics = [], scalar_prefetch = 0 : i64, scratch_operands = 0 : i64, tpu.core_type = #tpu.core_type<tc>} {
    %c0 = arith.constant 0 : index
    %c0_0 = arith.constant 0 : index
    %0 = vector.load %arg0[%c0, %c0_0] : memref<16x4xf32, #tpu.memory_space<vmem>>, vector<16x4xf32>
    %1 = arith.truncf %0 : vector<16x4xf32> to vector<16x4xbf16>
    %c0_1 = arith.constant 0 : index
    %c0_2 = arith.constant 0 : index
    %2 = vector.load %arg2[%c0_1, %c0_2] : memref<4x32xbf16, #tpu.memory_space<vmem>>, vector<4x32xbf16>
    %cst = arith.constant dense<0.000000e+00> : vector<16x32xf32>
    %3 = tpu.matmul %1, %2, %cst {dimension_numbers = #tpu.dot_dimension_numbers<[1], [0], [0], [1], [0, 0, 1, 1], [], []>} : vector<16x4xbf16>, vector<4x32xbf16>, vector<16x32xf32> -> vector<16x32xf32>
    %c0_3 = arith.constant 0 : index
    %c0_4 = arith.constant 0 : index
    %4 = vector.load %arg1[%c0_3, %c0_4] : memref<16x32xf32, #tpu.memory_space<vmem>>, vector<16x32xf32>
    %5 = arith.addf %3, %4 : vector<16x32xf32>
    %c0_5 = arith.constant 0 : index
    %c0_6 = arith.constant 0 : index
    %c0_7 = arith.constant 0 : index
    %6 = vector.load %arg3[%c0_5, %c0_6, %c0_7] : memref<2x192x32xbf16, #tpu.memory_space<vmem>>, vector<1x32x32xbf16>
    %7 = vector.shape_cast %6 : vector<1x32x32xbf16> to vector<32x32xbf16>
    %c0_8 = arith.constant 0 : index
    %c32 = arith.constant 32 : index
    %c0_9 = arith.constant 0 : index
    %8 = vector.load %arg3[%c0_8, %c32, %c0_9] : memref<2x192x32xbf16, #tpu.memory_space<vmem>>, vector<1x32x32xbf16>
    %9 = vector.shape_cast %8 : vector<1x32x32xbf16> to vector<32x32xbf16>
    %c0_10 = arith.constant 0 : index
    %c64 = arith.constant 64 : index
    %c0_11 = arith.constant 0 : index
    %10 = vector.load %arg3[%c0_10, %c64, %c0_11] : memref<2x192x32xbf16, #tpu.memory_space<vmem>>, vector<1x32x32xbf16>
    %11 = vector.shape_cast %10 : vector<1x32x32xbf16> to vector<32x32xbf16>
    %c0_12 = arith.constant 0 : index
    %c96 = arith.constant 96 : index
    %c0_13 = arith.constant 0 : index
    %12 = vector.load %arg3[%c0_12, %c96, %c0_13] : memref<2x192x32xbf16, #tpu.memory_space<vmem>>, vector<1x32x32xbf16>
    %13 = vector.shape_cast %12 : vector<1x32x32xbf16> to vector<32x32xbf16>
    %c0_14 = arith.constant 0 : index
    %c128 = arith.constant 128 : index
    %c0_15 = arith.constant 0 : index
    %14 = vector.load %arg3[%c0_14, %c128, %c0_15] : memref<2x192x32xbf16, #tpu.memory_space<vmem>>, vector<1x64x32xbf16>
    %15 = vector.shape_cast %14 : vector<1x64x32xbf16> to vector<64x32xbf16>
    %c0_16 = arith.constant 0 : index
    %c0_17 = arith.constant 0 : index
    %c0_18 = arith.constant 0 : index
    %16 = vector.load %arg4[%c0_16, %c0_17, %c0_18] : memref<2x32x64xbf16, #tpu.memory_space<vmem>>, vector<1x32x64xbf16>
    %17 = vector.shape_cast %16 : vector<1x32x64xbf16> to vector<32x64xbf16>
    %c0_19 = arith.constant 0 : index
    %c0_20 = arith.constant 0 : index
    %c0_21 = arith.constant 0 : index
    %18 = vector.load %arg5[%c0_19, %c0_20, %c0_21] : memref<2x10x64xf32, #tpu.memory_space<vmem>>, vector<1x1x32xf32>
    %19 = vector.shape_cast %18 : vector<1x1x32xf32> to vector<1x32xf32>
    %c0_22 = arith.constant 0 : index
    %c1 = arith.constant 1 : index
    %c0_23 = arith.constant 0 : index
    %20 = vector.load %arg5[%c0_22, %c1, %c0_23] : memref<2x10x64xf32, #tpu.memory_space<vmem>>, vector<1x1x32xf32>
    %21 = vector.shape_cast %20 : vector<1x1x32xf32> to vector<1x32xf32>
    %c0_24 = arith.constant 0 : index
    %c2 = arith.constant 2 : index
    %c0_25 = arith.constant 0 : index
    %22 = vector.load %arg5[%c0_24, %c2, %c0_25] : memref<2x10x64xf32, #tpu.memory_space<vmem>>, vector<1x1x32xf32>
    %23 = vector.shape_cast %22 : vector<1x1x32xf32> to vector<1x32xf32>
    %c0_26 = arith.constant 0 : index
    %c3 = arith.constant 3 : index
    %c0_27 = arith.constant 0 : index
    %24 = vector.load %arg5[%c0_26, %c3, %c0_27] : memref<2x10x64xf32, #tpu.memory_space<vmem>>, vector<1x1x32xf32>
    %25 = vector.shape_cast %24 : vector<1x1x32xf32> to vector<1x32xf32>
    %c0_28 = arith.constant 0 : index
    %c4 = arith.constant 4 : index
    %c0_29 = arith.constant 0 : index
    %26 = vector.load %arg5[%c0_28, %c4, %c0_29] : memref<2x10x64xf32, #tpu.memory_space<vmem>>, vector<1x1x32xf32>
    %27 = vector.shape_cast %26 : vector<1x1x32xf32> to vector<1x32xf32>
    %c0_30 = arith.constant 0 : index
    %c5 = arith.constant 5 : index
    %c0_31 = arith.constant 0 : index
    %28 = vector.load %arg5[%c0_30, %c5, %c0_31] : memref<2x10x64xf32, #tpu.memory_space<vmem>>, vector<1x1x32xf32>
    %29 = vector.shape_cast %28 : vector<1x1x32xf32> to vector<1x32xf32>
    %c0_32 = arith.constant 0 : index
    %c6 = arith.constant 6 : index
    %c0_33 = arith.constant 0 : index
    %30 = vector.load %arg5[%c0_32, %c6, %c0_33] : memref<2x10x64xf32, #tpu.memory_space<vmem>>, vector<1x1x32xf32>
    %31 = vector.shape_cast %30 : vector<1x1x32xf32> to vector<1x32xf32>
    %c0_34 = arith.constant 0 : index
    %c7 = arith.constant 7 : index
    %c0_35 = arith.constant 0 : index
    %32 = vector.load %arg5[%c0_34, %c7, %c0_35] : memref<2x10x64xf32, #tpu.memory_space<vmem>>, vector<1x1x32xf32>
    %33 = vector.shape_cast %32 : vector<1x1x32xf32> to vector<1x32xf32>
    %c0_36 = arith.constant 0 : index
    %c8 = arith.constant 8 : index
    %c0_37 = arith.constant 0 : index
    %34 = vector.load %arg5[%c0_36, %c8, %c0_37] : memref<2x10x64xf32, #tpu.memory_space<vmem>>, vector<1x1x32xf32>
    %35 = vector.shape_cast %34 : vector<1x1x32xf32> to vector<1x32xf32>
    %c0_38 = arith.constant 0 : index
    %c9 = arith.constant 9 : index
    %c0_39 = arith.constant 0 : index
    %36 = vector.load %arg5[%c0_38, %c9, %c0_39] : memref<2x10x64xf32, #tpu.memory_space<vmem>>, vector<1x1x64xf32>
    %37 = vector.shape_cast %36 : vector<1x1x64xf32> to vector<1x64xf32>
    %38 = arith.truncf %5 : vector<16x32xf32> to vector<16x32xbf16>
    %cst_40 = arith.constant dense<0.000000e+00> : vector<16x32xf32>
    %39 = tpu.matmul %38, %7, %cst_40 {dimension_numbers = #tpu.dot_dimension_numbers<[1], [0], [0], [1], [0, 0, 1, 1], [], []>} : vector<16x32xbf16>, vector<32x32xbf16>, vector<16x32xf32> -> vector<16x32xf32>
    %40 = vector.broadcast %19 : vector<1x32xf32> to vector<16x32xf32>
    %41 = arith.addf %39, %40 : vector<16x32xf32>
    %cst_41 = arith.constant dense<0.000000e+00> : vector<16x32xf32>
    %42 = tpu.matmul %38, %9, %cst_41 {dimension_numbers = #tpu.dot_dimension_numbers<[1], [0], [0], [1], [0, 0, 1, 1], [], []>} : vector<16x32xbf16>, vector<32x32xbf16>, vector<16x32xf32> -> vector<16x32xf32>
    %43 = vector.broadcast %21 : vector<1x32xf32> to vector<16x32xf32>
    %44 = arith.addf %42, %43 : vector<16x32xf32>
    %cst_42 = arith.constant dense<0.000000e+00> : vector<16x32xf32>
    %45 = tpu.matmul %38, %11, %cst_42 {dimension_numbers = #tpu.dot_dimension_numbers<[1], [0], [0], [1], [0, 0, 1, 1], [], []>} : vector<16x32xbf16>, vector<32x32xbf16>, vector<16x32xf32> -> vector<16x32xf32>
    %46 = vector.broadcast %23 : vector<1x32xf32> to vector<16x32xf32>
    %47 = arith.addf %45, %46 : vector<16x32xf32>
    %cst_43 = arith.constant 0.353553385 : f32
    %48 = vector.broadcast %cst_43 : f32 to vector<16x32xf32>
    %49 = arith.mulf %41, %48 : vector<16x32xf32>
    %50 = vector.shape_cast %49 : vector<16x32xf32> to vector<2x8x4x8xf32>
    %51 = tpu.transpose %50, [0, 2, 1, 3] : vector<2x8x4x8xf32> -> vector<2x4x8x8xf32>
    %52 = vector.shape_cast %51 : vector<2x4x8x8xf32> to vector<8x8x8xf32>
    %53 = arith.truncf %52 : vector<8x8x8xf32> to vector<8x8x8xbf16>
    %54 = vector.shape_cast %44 : vector<16x32xf32> to vector<2x8x4x8xf32>
    %55 = tpu.transpose %54, [0, 2, 1, 3] : vector<2x8x4x8xf32> -> vector<2x4x8x8xf32>
    %56 = vector.shape_cast %55 : vector<2x4x8x8xf32> to vector<8x8x8xf32>
    %57 = arith.truncf %56 : vector<8x8x8xf32> to vector<8x8x8xbf16>
    %58 = vector.shape_cast %47 : vector<16x32xf32> to vector<2x8x4x8xf32>
    %59 = tpu.transpose %58, [0, 2, 1, 3] : vector<2x8x4x8xf32> -> vector<2x4x8x8xf32>
    %60 = vector.shape_cast %59 : vector<2x4x8x8xf32> to vector<8x8x8xf32>
    %61 = arith.truncf %60 : vector<8x8x8xf32> to vector<8x8x8xbf16>
    "tpu.trace_start"() <{level = 10 : i32, message = "bqd,bkd->bqk"}> : () -> ()
    %cst_44 = arith.constant dense<0.000000e+00> : vector<8x8x8xf32>
    %62 = tpu.matmul %53, %57, %cst_44 {dimension_numbers = #tpu.dot_dimension_numbers<[2], [2], [1], [1], [0, 0, 0, 1, 1, 1], [0], [0]>} : vector<8x8x8xbf16>, vector<8x8x8xbf16>, vector<8x8x8xf32> -> vector<8x8x8xf32>
    "tpu.trace_stop"() : () -> ()
    %cst_45 = arith.constant dense<0xFF800000> : vector<8x8xf32>
    %63 = vector.multi_reduction <maximumf>, %62, %cst_45 [2] : vector<8x8x8xf32> to vector<8x8xf32>
    %64 = vector.shape_cast %63 : vector<8x8xf32> to vector<8x8x1xf32>
    %65 = vector.broadcast %64 : vector<8x8x1xf32> to vector<8x8x8xf32>
    %66 = arith.subf %62, %65 : vector<8x8x8xf32>
    %67 = math.exp %66 : vector<8x8x8xf32>
    %cst_46 = arith.constant dense<0.000000e+00> : vector<8x8xf32>
    %68 = vector.multi_reduction <add>, %67, %cst_46 [2] : vector<8x8x8xf32> to vector<8x8xf32>
    %69 = vector.shape_cast %68 : vector<8x8xf32> to vector<8x8x1xf32>
    %70 = tpu.reciprocal %69 : vector<8x8x1xf32> -> vector<8x8x1xf32>
    %71 = vector.broadcast %70 : vector<8x8x1xf32> to vector<8x8x8xf32>
    %72 = arith.mulf %67, %71 : vector<8x8x8xf32>
    %73 = arith.truncf %72 : vector<8x8x8xf32> to vector<8x8x8xbf16>
    "tpu.trace_start"() <{level = 10 : i32, message = "bqk,bkd->bqd"}> : () -> ()
    %cst_47 = arith.constant dense<0.000000e+00> : vector<8x8x8xf32>
    %74 = tpu.matmul %73, %61, %cst_47 {dimension_numbers = #tpu.dot_dimension_numbers<[2], [1], [1], [2], [0, 0, 0, 1, 1, 2], [0], [0]>} : vector<8x8x8xbf16>, vector<8x8x8xbf16>, vector<8x8x8xf32> -> vector<8x8x8xf32>
    "tpu.trace_stop"() : () -> ()
    %75 = vector.shape_cast %74 : vector<8x8x8xf32> to vector<2x4x8x8xf32>
    %76 = tpu.transpose %75, [0, 2, 1, 3] : vector<2x4x8x8xf32> -> vector<2x8x4x8xf32>
    %77 = vector.shape_cast %76 : vector<2x8x4x8xf32> to vector<16x32xf32>
    %78 = arith.truncf %77 : vector<16x32xf32> to vector<16x32xbf16>
    %cst_48 = arith.constant dense<0.000000e+00> : vector<16x32xf32>
    %79 = tpu.matmul %78, %13, %cst_48 {dimension_numbers = #tpu.dot_dimension_numbers<[1], [0], [0], [1], [0, 0, 1, 1], [], []>} : vector<16x32xbf16>, vector<32x32xbf16>, vector<16x32xf32> -> vector<16x32xf32>
    %80 = vector.broadcast %25 : vector<1x32xf32> to vector<16x32xf32>
    %81 = arith.addf %79, %80 : vector<16x32xf32>
    %82 = arith.addf %5, %81 : vector<16x32xf32>
    %cst_49 = arith.constant dense<0.000000e+00> : vector<16xf32>
    %83 = vector.multi_reduction <add>, %82, %cst_49 [1] : vector<16x32xf32> to vector<16xf32>
    %84 = vector.shape_cast %83 : vector<16xf32> to vector<16x1xf32>
    %cst_50 = arith.constant 3.200000e+01 : f32
    %85 = vector.broadcast %cst_50 : f32 to vector<16x1xf32>
    %86 = arith.divf %84, %85 : vector<16x1xf32>
    %87 = vector.broadcast %86 : vector<16x1xf32> to vector<16x32xf32>
    %88 = arith.subf %82, %87 : vector<16x32xf32>
    %89 = arith.mulf %88, %88 : vector<16x32xf32>
    %cst_51 = arith.constant dense<0.000000e+00> : vector<16xf32>
    %90 = vector.multi_reduction <add>, %89, %cst_51 [1] : vector<16x32xf32> to vector<16xf32>
    %91 = vector.shape_cast %90 : vector<16xf32> to vector<16x1xf32>
    %cst_52 = arith.constant 3.200000e+01 : f32
    %92 = vector.broadcast %cst_52 : f32 to vector<16x1xf32>
    %93 = arith.divf %91, %92 : vector<16x1xf32>
    %cst_53 = arith.constant 9.99999974E-6 : f32
    %94 = vector.broadcast %cst_53 : f32 to vector<16x1xf32>
    %95 = arith.addf %93, %94 : vector<16x1xf32>
    %96 = math.rsqrt %95 : vector<16x1xf32>
    %97 = vector.broadcast %86 : vector<16x1xf32> to vector<16x32xf32>
    %98 = arith.subf %82, %97 : vector<16x32xf32>
    %99 = vector.broadcast %96 : vector<16x1xf32> to vector<16x32xf32>
    %100 = arith.mulf %98, %99 : vector<16x32xf32>
    %101 = vector.broadcast %29 : vector<1x32xf32> to vector<16x32xf32>
    %102 = arith.mulf %100, %101 : vector<16x32xf32>
    %103 = vector.broadcast %31 : vector<1x32xf32> to vector<16x32xf32>
    %104 = arith.addf %102, %103 : vector<16x32xf32>
    %105 = arith.truncf %104 : vector<16x32xf32> to vector<16x32xbf16>
    %cst_54 = arith.constant dense<0.000000e+00> : vector<16x64xf32>
    %106 = tpu.matmul %105, %17, %cst_54 {dimension_numbers = #tpu.dot_dimension_numbers<[1], [0], [0], [1], [0, 0, 1, 1], [], []>} : vector<16x32xbf16>, vector<32x64xbf16>, vector<16x64xf32> -> vector<16x64xf32>
    %107 = vector.broadcast %37 : vector<1x64xf32> to vector<16x64xf32>
    %108 = arith.addf %106, %107 : vector<16x64xf32>
    %cst_55 = arith.constant 0.000000e+00 : f32
    %109 = vector.broadcast %cst_55 : f32 to vector<16x64xf32>
    %110 = arith.maximumf %108, %109 : vector<16x64xf32>
    %111 = arith.truncf %110 : vector<16x64xf32> to vector<16x64xbf16>
    %cst_56 = arith.constant dense<0.000000e+00> : vector<16x32xf32>
    %112 = tpu.matmul %111, %15, %cst_56 {dimension_numbers = #tpu.dot_dimension_numbers<[1], [0], [0], [1], [0, 0, 1, 1], [], []>} : vector<16x64xbf16>, vector<64x32xbf16>, vector<16x32xf32> -> vector<16x32xf32>
    %113 = vector.broadcast %27 : vector<1x32xf32> to vector<16x32xf32>
    %114 = arith.addf %112, %113 : vector<16x32xf32>
    %115 = arith.addf %104, %114 : vector<16x32xf32>
    %cst_57 = arith.constant dense<0.000000e+00> : vector<16xf32>
    %116 = vector.multi_reduction <add>, %115, %cst_57 [1] : vector<16x32xf32> to vector<16xf32>
    %117 = vector.shape_cast %116 : vector<16xf32> to vector<16x1xf32>
    %cst_58 = arith.constant 3.200000e+01 : f32
    %118 = vector.broadcast %cst_58 : f32 to vector<16x1xf32>
    %119 = arith.divf %117, %118 : vector<16x1xf32>
    %120 = vector.broadcast %119 : vector<16x1xf32> to vector<16x32xf32>
    %121 = arith.subf %115, %120 : vector<16x32xf32>
    %122 = arith.mulf %121, %121 : vector<16x32xf32>
    %cst_59 = arith.constant dense<0.000000e+00> : vector<16xf32>
    %123 = vector.multi_reduction <add>, %122, %cst_59 [1] : vector<16x32xf32> to vector<16xf32>
    %124 = vector.shape_cast %123 : vector<16xf32> to vector<16x1xf32>
    %cst_60 = arith.constant 3.200000e+01 : f32
    %125 = vector.broadcast %cst_60 : f32 to vector<16x1xf32>
    %126 = arith.divf %124, %125 : vector<16x1xf32>
    %cst_61 = arith.constant 9.99999974E-6 : f32
    %127 = vector.broadcast %cst_61 : f32 to vector<16x1xf32>
    %128 = arith.addf %126, %127 : vector<16x1xf32>
    %129 = math.rsqrt %128 : vector<16x1xf32>
    %130 = vector.broadcast %119 : vector<16x1xf32> to vector<16x32xf32>
    %131 = arith.subf %115, %130 : vector<16x32xf32>
    %132 = vector.broadcast %129 : vector<16x1xf32> to vector<16x32xf32>
    %133 = arith.mulf %131, %132 : vector<16x32xf32>
    %134 = vector.broadcast %33 : vector<1x32xf32> to vector<16x32xf32>
    %135 = arith.mulf %133, %134 : vector<16x32xf32>
    %136 = vector.broadcast %35 : vector<1x32xf32> to vector<16x32xf32>
    %137 = arith.addf %135, %136 : vector<16x32xf32>
    %c1_62 = arith.constant 1 : index
    %c0_63 = arith.constant 0 : index
    %c0_64 = arith.constant 0 : index
    %138 = vector.load %arg3[%c1_62, %c0_63, %c0_64] : memref<2x192x32xbf16, #tpu.memory_space<vmem>>, vector<1x32x32xbf16>
    %139 = vector.shape_cast %138 : vector<1x32x32xbf16> to vector<32x32xbf16>
    %c1_65 = arith.constant 1 : index
    %c32_66 = arith.constant 32 : index
    %c0_67 = arith.constant 0 : index
    %140 = vector.load %arg3[%c1_65, %c32_66, %c0_67] : memref<2x192x32xbf16, #tpu.memory_space<vmem>>, vector<1x32x32xbf16>
    %141 = vector.shape_cast %140 : vector<1x32x32xbf16> to vector<32x32xbf16>
    %c1_68 = arith.constant 1 : index
    %c64_69 = arith.constant 64 : index
    %c0_70 = arith.constant 0 : index
    %142 = vector.load %arg3[%c1_68, %c64_69, %c0_70] : memref<2x192x32xbf16, #tpu.memory_space<vmem>>, vector<1x32x32xbf16>
    %143 = vector.shape_cast %142 : vector<1x32x32xbf16> to vector<32x32xbf16>
    %c1_71 = arith.constant 1 : index
    %c96_72 = arith.constant 96 : index
    %c0_73 = arith.constant 0 : index
    %144 = vector.load %arg3[%c1_71, %c96_72, %c0_73] : memref<2x192x32xbf16, #tpu.memory_space<vmem>>, vector<1x32x32xbf16>
    %145 = vector.shape_cast %144 : vector<1x32x32xbf16> to vector<32x32xbf16>
    %c1_74 = arith.constant 1 : index
    %c128_75 = arith.constant 128 : index
    %c0_76 = arith.constant 0 : index
    %146 = vector.load %arg3[%c1_74, %c128_75, %c0_76] : memref<2x192x32xbf16, #tpu.memory_space<vmem>>, vector<1x64x32xbf16>
    %147 = vector.shape_cast %146 : vector<1x64x32xbf16> to vector<64x32xbf16>
    %c1_77 = arith.constant 1 : index
    %c0_78 = arith.constant 0 : index
    %c0_79 = arith.constant 0 : index
    %148 = vector.load %arg4[%c1_77, %c0_78, %c0_79] : memref<2x32x64xbf16, #tpu.memory_space<vmem>>, vector<1x32x64xbf16>
    %149 = vector.shape_cast %148 : vector<1x32x64xbf16> to vector<32x64xbf16>
    %c1_80 = arith.constant 1 : index
    %c0_81 = arith.constant 0 : index
    %c0_82 = arith.constant 0 : index
    %150 = vector.load %arg5[%c1_80, %c0_81, %c0_82] : memref<2x10x64xf32, #tpu.memory_space<vmem>>, vector<1x1x32xf32>
    %151 = vector.shape_cast %150 : vector<1x1x32xf32> to vector<1x32xf32>
    %c1_83 = arith.constant 1 : index
    %c1_84 = arith.constant 1 : index
    %c0_85 = arith.constant 0 : index
    %152 = vector.load %arg5[%c1_83, %c1_84, %c0_85] : memref<2x10x64xf32, #tpu.memory_space<vmem>>, vector<1x1x32xf32>
    %153 = vector.shape_cast %152 : vector<1x1x32xf32> to vector<1x32xf32>
    %c1_86 = arith.constant 1 : index
    %c2_87 = arith.constant 2 : index
    %c0_88 = arith.constant 0 : index
    %154 = vector.load %arg5[%c1_86, %c2_87, %c0_88] : memref<2x10x64xf32, #tpu.memory_space<vmem>>, vector<1x1x32xf32>
    %155 = vector.shape_cast %154 : vector<1x1x32xf32> to vector<1x32xf32>
    %c1_89 = arith.constant 1 : index
    %c3_90 = arith.constant 3 : index
    %c0_91 = arith.constant 0 : index
    %156 = vector.load %arg5[%c1_89, %c3_90, %c0_91] : memref<2x10x64xf32, #tpu.memory_space<vmem>>, vector<1x1x32xf32>
    %157 = vector.shape_cast %156 : vector<1x1x32xf32> to vector<1x32xf32>
    %c1_92 = arith.constant 1 : index
    %c4_93 = arith.constant 4 : index
    %c0_94 = arith.constant 0 : index
    %158 = vector.load %arg5[%c1_92, %c4_93, %c0_94] : memref<2x10x64xf32, #tpu.memory_space<vmem>>, vector<1x1x32xf32>
    %159 = vector.shape_cast %158 : vector<1x1x32xf32> to vector<1x32xf32>
    %c1_95 = arith.constant 1 : index
    %c5_96 = arith.constant 5 : index
    %c0_97 = arith.constant 0 : index
    %160 = vector.load %arg5[%c1_95, %c5_96, %c0_97] : memref<2x10x64xf32, #tpu.memory_space<vmem>>, vector<1x1x32xf32>
    %161 = vector.shape_cast %160 : vector<1x1x32xf32> to vector<1x32xf32>
    %c1_98 = arith.constant 1 : index
    %c6_99 = arith.constant 6 : index
    %c0_100 = arith.constant 0 : index
    %162 = vector.load %arg5[%c1_98, %c6_99, %c0_100] : memref<2x10x64xf32, #tpu.memory_space<vmem>>, vector<1x1x32xf32>
    %163 = vector.shape_cast %162 : vector<1x1x32xf32> to vector<1x32xf32>
    %c1_101 = arith.constant 1 : index
    %c7_102 = arith.constant 7 : index
    %c0_103 = arith.constant 0 : index
    %164 = vector.load %arg5[%c1_101, %c7_102, %c0_103] : memref<2x10x64xf32, #tpu.memory_space<vmem>>, vector<1x1x32xf32>
    %165 = vector.shape_cast %164 : vector<1x1x32xf32> to vector<1x32xf32>
    %c1_104 = arith.constant 1 : index
    %c8_105 = arith.constant 8 : index
    %c0_106 = arith.constant 0 : index
    %166 = vector.load %arg5[%c1_104, %c8_105, %c0_106] : memref<2x10x64xf32, #tpu.memory_space<vmem>>, vector<1x1x32xf32>
    %167 = vector.shape_cast %166 : vector<1x1x32xf32> to vector<1x32xf32>
    %c1_107 = arith.constant 1 : index
    %c9_108 = arith.constant 9 : index
    %c0_109 = arith.constant 0 : index
    %168 = vector.load %arg5[%c1_107, %c9_108, %c0_109] : memref<2x10x64xf32, #tpu.memory_space<vmem>>, vector<1x1x64xf32>
    %169 = vector.shape_cast %168 : vector<1x1x64xf32> to vector<1x64xf32>
    %170 = arith.truncf %137 : vector<16x32xf32> to vector<16x32xbf16>
    %cst_110 = arith.constant dense<0.000000e+00> : vector<16x32xf32>
    %171 = tpu.matmul %170, %139, %cst_110 {dimension_numbers = #tpu.dot_dimension_numbers<[1], [0], [0], [1], [0, 0, 1, 1], [], []>} : vector<16x32xbf16>, vector<32x32xbf16>, vector<16x32xf32> -> vector<16x32xf32>
    %172 = vector.broadcast %151 : vector<1x32xf32> to vector<16x32xf32>
    %173 = arith.addf %171, %172 : vector<16x32xf32>
    %cst_111 = arith.constant dense<0.000000e+00> : vector<16x32xf32>
    %174 = tpu.matmul %170, %141, %cst_111 {dimension_numbers = #tpu.dot_dimension_numbers<[1], [0], [0], [1], [0, 0, 1, 1], [], []>} : vector<16x32xbf16>, vector<32x32xbf16>, vector<16x32xf32> -> vector<16x32xf32>
    %175 = vector.broadcast %153 : vector<1x32xf32> to vector<16x32xf32>
    %176 = arith.addf %174, %175 : vector<16x32xf32>
    %cst_112 = arith.constant dense<0.000000e+00> : vector<16x32xf32>
    %177 = tpu.matmul %170, %143, %cst_112 {dimension_numbers = #tpu.dot_dimension_numbers<[1], [0], [0], [1], [0, 0, 1, 1], [], []>} : vector<16x32xbf16>, vector<32x32xbf16>, vector<16x32xf32> -> vector<16x32xf32>
    %178 = vector.broadcast %155 : vector<1x32xf32> to vector<16x32xf32>
    %179 = arith.addf %177, %178 : vector<16x32xf32>
    %cst_113 = arith.constant 0.353553385 : f32
    %180 = vector.broadcast %cst_113 : f32 to vector<16x32xf32>
    %181 = arith.mulf %173, %180 : vector<16x32xf32>
    %182 = vector.shape_cast %181 : vector<16x32xf32> to vector<2x8x4x8xf32>
    %183 = tpu.transpose %182, [0, 2, 1, 3] : vector<2x8x4x8xf32> -> vector<2x4x8x8xf32>
    %184 = vector.shape_cast %183 : vector<2x4x8x8xf32> to vector<8x8x8xf32>
    %185 = arith.truncf %184 : vector<8x8x8xf32> to vector<8x8x8xbf16>
    %186 = vector.shape_cast %176 : vector<16x32xf32> to vector<2x8x4x8xf32>
    %187 = tpu.transpose %186, [0, 2, 1, 3] : vector<2x8x4x8xf32> -> vector<2x4x8x8xf32>
    %188 = vector.shape_cast %187 : vector<2x4x8x8xf32> to vector<8x8x8xf32>
    %189 = arith.truncf %188 : vector<8x8x8xf32> to vector<8x8x8xbf16>
    %190 = vector.shape_cast %179 : vector<16x32xf32> to vector<2x8x4x8xf32>
    %191 = tpu.transpose %190, [0, 2, 1, 3] : vector<2x8x4x8xf32> -> vector<2x4x8x8xf32>
    %192 = vector.shape_cast %191 : vector<2x4x8x8xf32> to vector<8x8x8xf32>
    %193 = arith.truncf %192 : vector<8x8x8xf32> to vector<8x8x8xbf16>
    "tpu.trace_start"() <{level = 10 : i32, message = "bqd,bkd->bqk"}> : () -> ()
    %cst_114 = arith.constant dense<0.000000e+00> : vector<8x8x8xf32>
    %194 = tpu.matmul %185, %189, %cst_114 {dimension_numbers = #tpu.dot_dimension_numbers<[2], [2], [1], [1], [0, 0, 0, 1, 1, 1], [0], [0]>} : vector<8x8x8xbf16>, vector<8x8x8xbf16>, vector<8x8x8xf32> -> vector<8x8x8xf32>
    "tpu.trace_stop"() : () -> ()
    %cst_115 = arith.constant dense<0xFF800000> : vector<8x8xf32>
    %195 = vector.multi_reduction <maximumf>, %194, %cst_115 [2] : vector<8x8x8xf32> to vector<8x8xf32>
    %196 = vector.shape_cast %195 : vector<8x8xf32> to vector<8x8x1xf32>
    %197 = vector.broadcast %196 : vector<8x8x1xf32> to vector<8x8x8xf32>
    %198 = arith.subf %194, %197 : vector<8x8x8xf32>
    %199 = math.exp %198 : vector<8x8x8xf32>
    %cst_116 = arith.constant dense<0.000000e+00> : vector<8x8xf32>
    %200 = vector.multi_reduction <add>, %199, %cst_116 [2] : vector<8x8x8xf32> to vector<8x8xf32>
    %201 = vector.shape_cast %200 : vector<8x8xf32> to vector<8x8x1xf32>
    %202 = tpu.reciprocal %201 : vector<8x8x1xf32> -> vector<8x8x1xf32>
    %203 = vector.broadcast %202 : vector<8x8x1xf32> to vector<8x8x8xf32>
    %204 = arith.mulf %199, %203 : vector<8x8x8xf32>
    %205 = arith.truncf %204 : vector<8x8x8xf32> to vector<8x8x8xbf16>
    "tpu.trace_start"() <{level = 10 : i32, message = "bqk,bkd->bqd"}> : () -> ()
    %cst_117 = arith.constant dense<0.000000e+00> : vector<8x8x8xf32>
    %206 = tpu.matmul %205, %193, %cst_117 {dimension_numbers = #tpu.dot_dimension_numbers<[2], [1], [1], [2], [0, 0, 0, 1, 1, 2], [0], [0]>} : vector<8x8x8xbf16>, vector<8x8x8xbf16>, vector<8x8x8xf32> -> vector<8x8x8xf32>
    "tpu.trace_stop"() : () -> ()
    %207 = vector.shape_cast %206 : vector<8x8x8xf32> to vector<2x4x8x8xf32>
    %208 = tpu.transpose %207, [0, 2, 1, 3] : vector<2x4x8x8xf32> -> vector<2x8x4x8xf32>
    %209 = vector.shape_cast %208 : vector<2x8x4x8xf32> to vector<16x32xf32>
    %210 = arith.truncf %209 : vector<16x32xf32> to vector<16x32xbf16>
    %cst_118 = arith.constant dense<0.000000e+00> : vector<16x32xf32>
    %211 = tpu.matmul %210, %145, %cst_118 {dimension_numbers = #tpu.dot_dimension_numbers<[1], [0], [0], [1], [0, 0, 1, 1], [], []>} : vector<16x32xbf16>, vector<32x32xbf16>, vector<16x32xf32> -> vector<16x32xf32>
    %212 = vector.broadcast %157 : vector<1x32xf32> to vector<16x32xf32>
    %213 = arith.addf %211, %212 : vector<16x32xf32>
    %214 = arith.addf %137, %213 : vector<16x32xf32>
    %cst_119 = arith.constant dense<0.000000e+00> : vector<16xf32>
    %215 = vector.multi_reduction <add>, %214, %cst_119 [1] : vector<16x32xf32> to vector<16xf32>
    %216 = vector.shape_cast %215 : vector<16xf32> to vector<16x1xf32>
    %cst_120 = arith.constant 3.200000e+01 : f32
    %217 = vector.broadcast %cst_120 : f32 to vector<16x1xf32>
    %218 = arith.divf %216, %217 : vector<16x1xf32>
    %219 = vector.broadcast %218 : vector<16x1xf32> to vector<16x32xf32>
    %220 = arith.subf %214, %219 : vector<16x32xf32>
    %221 = arith.mulf %220, %220 : vector<16x32xf32>
    %cst_121 = arith.constant dense<0.000000e+00> : vector<16xf32>
    %222 = vector.multi_reduction <add>, %221, %cst_121 [1] : vector<16x32xf32> to vector<16xf32>
    %223 = vector.shape_cast %222 : vector<16xf32> to vector<16x1xf32>
    %cst_122 = arith.constant 3.200000e+01 : f32
    %224 = vector.broadcast %cst_122 : f32 to vector<16x1xf32>
    %225 = arith.divf %223, %224 : vector<16x1xf32>
    %cst_123 = arith.constant 9.99999974E-6 : f32
    %226 = vector.broadcast %cst_123 : f32 to vector<16x1xf32>
    %227 = arith.addf %225, %226 : vector<16x1xf32>
    %228 = math.rsqrt %227 : vector<16x1xf32>
    %229 = vector.broadcast %218 : vector<16x1xf32> to vector<16x32xf32>
    %230 = arith.subf %214, %229 : vector<16x32xf32>
    %231 = vector.broadcast %228 : vector<16x1xf32> to vector<16x32xf32>
    %232 = arith.mulf %230, %231 : vector<16x32xf32>
    %233 = vector.broadcast %161 : vector<1x32xf32> to vector<16x32xf32>
    %234 = arith.mulf %232, %233 : vector<16x32xf32>
    %235 = vector.broadcast %163 : vector<1x32xf32> to vector<16x32xf32>
    %236 = arith.addf %234, %235 : vector<16x32xf32>
    %237 = arith.truncf %236 : vector<16x32xf32> to vector<16x32xbf16>
    %cst_124 = arith.constant dense<0.000000e+00> : vector<16x64xf32>
    %238 = tpu.matmul %237, %149, %cst_124 {dimension_numbers = #tpu.dot_dimension_numbers<[1], [0], [0], [1], [0, 0, 1, 1], [], []>} : vector<16x32xbf16>, vector<32x64xbf16>, vector<16x64xf32> -> vector<16x64xf32>
    %239 = vector.broadcast %169 : vector<1x64xf32> to vector<16x64xf32>
    %240 = arith.addf %238, %239 : vector<16x64xf32>
    %cst_125 = arith.constant 0.000000e+00 : f32
    %241 = vector.broadcast %cst_125 : f32 to vector<16x64xf32>
    %242 = arith.maximumf %240, %241 : vector<16x64xf32>
    %243 = arith.truncf %242 : vector<16x64xf32> to vector<16x64xbf16>
    %cst_126 = arith.constant dense<0.000000e+00> : vector<16x32xf32>
    %244 = tpu.matmul %243, %147, %cst_126 {dimension_numbers = #tpu.dot_dimension_numbers<[1], [0], [0], [1], [0, 0, 1, 1], [], []>} : vector<16x64xbf16>, vector<64x32xbf16>, vector<16x32xf32> -> vector<16x32xf32>
    %245 = vector.broadcast %159 : vector<1x32xf32> to vector<16x32xf32>
    %246 = arith.addf %244, %245 : vector<16x32xf32>
    %247 = arith.addf %236, %246 : vector<16x32xf32>
    %cst_127 = arith.constant dense<0.000000e+00> : vector<16xf32>
    %248 = vector.multi_reduction <add>, %247, %cst_127 [1] : vector<16x32xf32> to vector<16xf32>
    %249 = vector.shape_cast %248 : vector<16xf32> to vector<16x1xf32>
    %cst_128 = arith.constant 3.200000e+01 : f32
    %250 = vector.broadcast %cst_128 : f32 to vector<16x1xf32>
    %251 = arith.divf %249, %250 : vector<16x1xf32>
    %252 = vector.broadcast %251 : vector<16x1xf32> to vector<16x32xf32>
    %253 = arith.subf %247, %252 : vector<16x32xf32>
    %254 = arith.mulf %253, %253 : vector<16x32xf32>
    %cst_129 = arith.constant dense<0.000000e+00> : vector<16xf32>
    %255 = vector.multi_reduction <add>, %254, %cst_129 [1] : vector<16x32xf32> to vector<16xf32>
    %256 = vector.shape_cast %255 : vector<16xf32> to vector<16x1xf32>
    %cst_130 = arith.constant 3.200000e+01 : f32
    %257 = vector.broadcast %cst_130 : f32 to vector<16x1xf32>
    %258 = arith.divf %256, %257 : vector<16x1xf32>
    %cst_131 = arith.constant 9.99999974E-6 : f32
    %259 = vector.broadcast %cst_131 : f32 to vector<16x1xf32>
    %260 = arith.addf %258, %259 : vector<16x1xf32>
    %261 = math.rsqrt %260 : vector<16x1xf32>
    %262 = vector.broadcast %251 : vector<16x1xf32> to vector<16x32xf32>
    %263 = arith.subf %247, %262 : vector<16x32xf32>
    %264 = vector.broadcast %261 : vector<16x1xf32> to vector<16x32xf32>
    %265 = arith.mulf %263, %264 : vector<16x32xf32>
    %266 = vector.broadcast %165 : vector<1x32xf32> to vector<16x32xf32>
    %267 = arith.mulf %265, %266 : vector<16x32xf32>
    %268 = vector.broadcast %167 : vector<1x32xf32> to vector<16x32xf32>
    %269 = arith.addf %267, %268 : vector<16x32xf32>
    %270 = vector.shape_cast %269 : vector<16x32xf32> to vector<2x8x32xf32>
    %271 = vector.extract_strided_slice %270 {offsets = [0, 7, 0], sizes = [2, 1, 32], strides = [1, 1, 1]} : vector<2x8x32xf32> to vector<2x1x32xf32>
    %272 = vector.shape_cast %271 : vector<2x1x32xf32> to vector<2x32xf32>
    %273 = arith.truncf %272 : vector<2x32xf32> to vector<2x32xbf16>
    %c0_132 = arith.constant 0 : index
    %c0_133 = arith.constant 0 : index
    %274 = vector.load %arg6[%c0_132, %c0_133] : memref<32x128xbf16, #tpu.memory_space<vmem>>, vector<32x128xbf16>
    %cst_134 = arith.constant dense<0.000000e+00> : vector<2x128xf32>
    %275 = tpu.matmul %273, %274, %cst_134 {dimension_numbers = #tpu.dot_dimension_numbers<[1], [0], [0], [1], [0, 0, 1, 1], [], []>} : vector<2x32xbf16>, vector<32x128xbf16>, vector<2x128xf32> -> vector<2x128xf32>
    %c0_135 = arith.constant 0 : index
    %c0_136 = arith.constant 0 : index
    %276 = vector.load %arg7[%c0_135, %c0_136] : memref<1x128xf32, #tpu.memory_space<vmem>>, vector<1x128xf32>
    %277 = vector.broadcast %276 : vector<1x128xf32> to vector<2x128xf32>
    %278 = arith.addf %275, %277 : vector<2x128xf32>
    %c0_137 = arith.constant 0 : index
    %c0_138 = arith.constant 0 : index
    %279 = vector.load %arg8[%c0_137, %c0_138] : memref<2x128xf32, #tpu.memory_space<vmem>>, vector<2x128xf32>
    tpu.vector_store %arg8[%c0_137, %c0_138], %278 {strides = array<i32>} : memref<2x128xf32, #tpu.memory_space<vmem>>, vector<2x128xf32>,
    return
  }
}

</mosaic_0001>

<bundles_post_ra>
// kernel: forward.1
= control target key start
LH: loop header
LB: loop body
LE: loop exit
PB: predicated region body
PF: predicated region fallthrough
CT: control target
= control target key end

     0   :  { %vm41_vm0 = vcmask 1041408   ;;  %v6001_v2 = vmov 0.0   ;;  %vm6002_vm1 = vmmov 0   ;;  %vm37_vm2 = vcmask 31744   ;;  %s7083_s0 = inlined_call_operand.vmem [shape: f32[16,4], index: 0, kind: input, shape index: {}]   ;;  %s7084_s1 = inlined_call_operand.vmem [shape: f32[16,32], index: 1, kind: input, shape index: {}]   ;;  %s7085_s2 = inlined_call_operand.vmem [shape: bf16[4,32], index: 2, kind: input, shape index: {}]   ;;  %s7086_s3 = inlined_call_operand.vmem [shape: bf16[2,192,32], index: 3, kind: input, shape index: {}]   ;;  %s7087_s4 = inlined_call_operand.vmem [shape: bf16[2,32,64], index: 4, kind: input, shape index: {}]   ;;  %s7088_s5 = inlined_call_operand.vmem [shape: f32[2,10,64], index: 5, kind: input, shape index: {}]   ;;  %s7089_s6 = inlined_call_operand.vmem [shape: bf16[32,128], index: 6, kind: input, shape index: {}]   ;;  %s7090_s7 = inlined_call_operand.vmem [shape: f32[1,128], index: 7, kind: input, shape index: {}]   ;;  %s7091_s8 = inlined_call_operand.hbm [shape: f32[2,128], index: 8, kind: output, shape index: {}]  }
   0x1   :  { %v34_v0 = vld [vmem:[%s7085_s2] sm:$0x3]  ;;  %5516 = vmatprep.subr.bf16.mxu0 %v6001_v2  ;;  %5518 = vmatprep.mubr.msk.bf16.mxu0 %vm6002_vm1, %v6001_v2  ;;  %v32_v4 = vld [vmem:[%s7083_s0 + $0x8] sm:$0xff] }
   0x2   :  { %v31_v1 = vld [vmem:[%s7083_s0] sm:$0xff]  ;;  %v43_v3 = vsel %vm41_vm0, %v34_v0, 0  ;;  %5522 = vmatprep.subr.bf16.mxu1 %v6001_v2  ;;  %5526 = vmatprep.mubr.msk.bf16.mxu1 %vm6002_vm1, %v6001_v2 }
   0x3   :  { %5517 = vmatpush3.bf16.msra.mxu0 %v43_v3  ;;  %v33_v5 = vpack.c.bf16 %v32_v4, %v31_v1 }
   0x4   :  { %5530 = vmatprep.subr.bf16.mxu0 %v6001_v2 }
   0x6   :  { %5519 = vmatmul.mubr.msk.bf16.vlgmr.msra.gmra.mrb[0].mxu0 %vm37_vm2, %v33_v5 }
   0x7   :  { %5534 = vmatprep.mubr.msk.bf16.mxu0 %vm6002_vm1, %v6001_v2 }
   0x8   :  { %13 = vsyncpa [#allocation3], 0  ;;  %v5867_v6 = vld [vmem:[%s7086_s3] sm:$0xff]   ;;  %v5868_v7 = vld [vmem:[%s7086_s3 + $0x10] sm:$0xff]   ;;  %vm141_vm3 = vcmask 261120   ;;  %s6003_s28 = smov 104   ;;  %v327_v46 = vlaneseq }
   0x9   :  { %5523 = vmatpush3.bf16.msra.mxu1 %v5867_v6  ;;  %5531 = vmatpush3.bf16.msra.mxu0 %v5868_v7  ;;  %v5869_v8 = vld [vmem:[%s7086_s3 + $0x8] sm:$0xff]   ;;  %v5870_v9 = vld [vmem:[%s7086_s3 + $0x18] sm:$0xff]   ;;  %v35_v10 = vld [vmem:[%s7084_s1] sm:$0xff]  ;;  %s6004_s29 = smov 120   ;;  %s6005_s30 = smov 112   ;;  %vm1202_vm4 = vcmask 64512  }
   0xa   :  { %5524 = vmatprep.subr.bf16.mxu1 %v6001_v2  ;;  %5532 = vmatprep.subr.bf16.mxu0 %v6001_v2  ;;  %v36_v12 = vld [vmem:[%s7084_s1 + $0x8] sm:$0xff]  ;;  %v5871_v18 = vld [vmem:[%s7086_s3 + $0x20] sm:$0xff]   ;;  %v6006_v44 = vmov 1983009808   ;;  %v6007_v47 = vmov 1934713408  }
   0xb   :  { %v5872_v20 = vld [vmem:[%s7086_s3 + $0x28] sm:$0xff]   ;;  %v5241_v21 = vld [vmem:[%s7088_s5] ss:$0 sm:$0xff]  ;;  %v5245_v22 = vld [vmem:[%s7088_s5 + $0x1] ss:$0 sm:$0xff]  ;;  %v325_v45 = vunpack.c.l.s4 %v6006_v44  ;;  %v357_v48 = vunpack.c.l.s4 %v6007_v47  ;;  %v328_v50 = vshrl.u32 %v327_v46, 7 }
   0xc   :  { %v5249_v36 = vld [vmem:[%s7088_s5 + $0x2] ss:$0 sm:$0xff]  ;;  %vm1670_vm5 = vcmask 1043456   ;;  %s6008_s13 = smov 16   ;;  %s6009_s14 = smov 8   ;;  %vm2334_vm6 = vcmask 130048  }
   0xd   :  { %5525 = vmatpush3.bf16.msra.mxu1 %v5869_v8  ;;  %5533 = vmatpush3.bf16.msra.mxu0 %v5870_v9  ;;  %v326_v49 = vunpack.c.0.s8 %v325_v45  ;;  %v358_v53 = vunpack.c.0.s8 %v357_v48  ;;  %s6010_s15 = smov 24   ;;  %vm2337_vm7 = vcmask 195584   ;;  %vm2534_vm8 = vcmask 523264  }
   0xe   :  { %5538 = vmatprep.subr.bf16.mxu1 %v6001_v2  ;;  %5546 = vmatprep.subr.bf16.mxu0 %v6001_v2  ;;  %vm5167_vm9 = vcmask 1041409  }
   0xf   :  { %v6162_v54 = vsub.s32 %v326_v49, %v328_v50  ;;  %v6164_v61 = vsub.s32 %v358_v53, %v328_v50 }
  0xd9   :  { %v79_v11 = vpop.f32.mrb[0].mxu0 }
  0xda   :  { %v5520_v13 = vpop.f32.mrb[1].mxu0  ;;  %v6097_v15 = vadd.f32 %v79_v11, %v35_v10 }
  0xdb   :  { %v82_v14 = vpop.f32.mrb[2].mxu0 }
  0xdc   :  { %v6099_v16 = vadd.f32 %v82_v14, %v36_v12  ;;  %v5521_v17 = vpop.f32.mrb[3].mxu0 }
  0xde   :  { %v124_v19 = vpack.c.bf16 %v6099_v16, %v6097_v15 }
  0xe0   :  { %5527 = vmatmul.mubr.msk.bf16.vlgmr.msra.gmra.mrb[0].mxu1 %vm141_vm3, %v124_v19  ;;  %5535 = vmatmul.mubr.msk.bf16.vlgmr.msra.gmra.mrb[4].mxu0 %vm141_vm3, %v124_v19 }
  0xe1   :  { %5539 = vmatpush3.bf16.msra.mxu1 %v5871_v18  ;;  %5542 = vmatprep.mubr.msk.bf16.mxu1 %vm6002_vm1, %v6001_v2 }
  0xe2   :  { %5540 = vmatprep.subr.bf16.mxu1 %v6001_v2  ;;  %5548 = vmatprep.mubr.msk.bf16.mxu0 %vm6002_vm1, %v6001_v2 }
  0xe5   :  { %5541 = vmatpush3.bf16.msra.mxu1 %v5872_v20 }
  0xe6   :  { %5552 = vmatprep.subr.bf16.mxu1 %v6001_v2 }
  0xe8   :  { %5543 = vmatmul.mubr.msk.bf16.vlgmr.msra.gmra.mrb[4].mxu1 %vm141_vm3, %v124_v19 }
  0xe9   :  { %5554 = vmatprep.mubr.msk.bf16.mxu1 %vm6002_vm1, %v6001_v2 }
 0x1b3   :  { %v179_v23 = vpop.f32.mrb[0].mxu1  ;;  %v236_v24 = vpop.f32.mrb[4].mxu0 }
 0x1b4   :  { %v180_v25 = vadd.f32 %v5241_v21, %v179_v23  ;;  %v237_v26 = vadd.f32 %v5245_v22, %v236_v24  ;;  %v5528_v27 = vpop.f32.mrb[1].mxu1  ;;  %v5536_v28 = vpop.f32.mrb[5].mxu0 }
 0x1b5   :  { %v182_v29 = vpop.f32.mrb[2].mxu1  ;;  %v239_v30 = vpop.f32.mrb[6].mxu0 }
 0x1b6   :  { %v5529_v31 = vpop.f32.mrb[3].mxu1  ;;  %616 = vrot.lane.b32.xlu1 %v237_v26, %s6003_s28  ;;  %604 = vrot.lane.b32.xlu0 %v237_v26, %s6004_s29  ;;  %v5537_v32 = vpop.f32.mrb[7].mxu0  ;;  %v6128_v33 = vmul.f32 0.35355338, %v180_v25  ;;  %v183_v40 = vadd.f32 %v5241_v21, %v182_v29  ;;  %v6142_v41 = vadd.f32 %v5245_v22, %v239_v30 }
 0x1b8   :  { %v6148_v42 = vmul.f32 0.35355338, %v183_v40 }
 0x1ba   :  { %304 = vrot.lane.b32.xlu1 %v6128_v33, %s6004_s29  ;;  %610 = vrot.lane.b32.xlu0 %v237_v26, %s6005_s30 }
 0x1bb   :  { %v293_v34 = vpop.f32.mrb[4].mxu1 }
 0x1bc   :  { %v5544_v35 = vpop.f32.mrb[5].mxu1  ;;  %v6158_v43 = vadd.f32 %v5249_v36, %v293_v34 }
 0x1bd   :  { %v296_v37 = vpop.f32.mrb[6].mxu1 }
 0x1be   :  { %v6136_v38 = vadd.f32 %v5249_v36, %v296_v37  ;;  %v5545_v39 = vpop.f32.mrb[7].mxu1  ;;  %316 = vrot.lane.b32.xlu1 %v6128_v33, %s6003_s28  ;;  %310 = vrot.lane.b32.xlu0 %v6128_v33, %s6005_s30 }
 0x1c2   :  { %612 = vrot.lane.b32.xlu1 %v6142_v41, %s6005_s30  ;;  %606 = vrot.lane.b32.xlu0 %v6142_v41, %s6004_s29 }
 0x1c6   :  { %306 = vrot.lane.b32.xlu1 %v6148_v42, %s6004_s29  ;;  %618 = vrot.lane.b32.xlu0 %v6142_v41, %s6003_s28 }
 0x1ca   :  { %318 = vrot.lane.b32.xlu1 %v6148_v42, %s6003_s28  ;;  %312 = vrot.lane.b32.xlu0 %v6148_v42, %s6005_s30 }
 0x1ce   :  { %904 = vrot.lane.b32.xlu1 %v6158_v43, %s6004_s29 }
 0x228   :  { %v617_v51 = vpop.permute.xlu1 %616  ;;  %v605_v52 = vpop.permute.xlu0 %604 }
 0x229   :  { %v638_v55 = vcombine.low %v605_v52, %v617_v51  ;;  %v639_v56 = vcombine.high %v605_v52, %v617_v51 }
 0x22b   :  { %v646_v62 = vrot.slane %v638_v55, %v6162_v54  ;;  %v653_v63 = vrot.slane %v639_v56, %v6162_v54 }
 0x22c   :  { %v305_v57 = vpop.permute.xlu1 %304  ;;  %v611_v58 = vpop.permute.xlu0 %610 }
 0x22d   :  { %v622_v59 = vcombine.low %v237_v26, %v611_v58  ;;  %v623_v60 = vcombine.high %v237_v26, %v611_v58 }
 0x22f   :  { %v630_v0 = vrot.slane %v622_v59, %v6162_v54  ;;  %v637_v1 = vrot.slane %v623_v60, %v6162_v54 }
 0x230   :  { %v317_v3 = vpop.permute.xlu1 %316  ;;  %v311_v4 = vpop.permute.xlu0 %310 }
 0x231   :  { %v654_v5 = vcombine.low %v630_v0, %v646_v62  ;;  %v655_v6 = vcombine.high %v630_v0, %v646_v62  ;;  %v670_v7 = vcombine.low %v637_v1, %v653_v63  ;;  %v671_v8 = vcombine.high %v637_v1, %v653_v63 }
 0x232   :  { %v338_v9 = vcombine.low %v305_v57, %v317_v3  ;;  %v339_v10 = vcombine.high %v305_v57, %v317_v3  ;;  %v322_v11 = vcombine.low %v6128_v33, %v311_v4  ;;  %v323_v12 = vcombine.high %v6128_v33, %v311_v4 }
 0x233   :  { %v662_v13 = vrot.slane %v654_v5, %v6164_v61  ;;  %v669_v14 = vrot.slane %v655_v6, %v6164_v61  ;;  %v678_v17 = vrot.slane %v670_v7, %v6164_v61  ;;  %v685_v18 = vrot.slane %v671_v8, %v6164_v61 }
 0x234   :  { %v346_v19 = vrot.slane %v338_v9, %v6162_v54  ;;  %v353_v20 = vrot.slane %v339_v10, %v6162_v54  ;;  %v330_v21 = vrot.slane %v322_v11, %v6162_v54  ;;  %v337_v22 = vrot.slane %v323_v12, %v6162_v54  ;;  %v613_v23 = vpop.permute.xlu1 %612  ;;  %v607_v24 = vpop.permute.xlu0 %606 }
 0x235   :  { %v758_v29 = vcombine.low %v662_v13, %v669_v14  ;;  %v5257_v30 = vcombine.high %v662_v13, %v669_v14  ;;  %v774_v31 = vcombine.low %v678_v17, %v685_v18  ;;  %v5258_v32 = vcombine.high %v678_v17, %v685_v18 }
 0x236   :  { %v354_v25 = vcombine.low %v330_v21, %v346_v19  ;;  %v355_v26 = vcombine.high %v330_v21, %v346_v19  ;;  %v370_v27 = vcombine.low %v337_v22, %v353_v20  ;;  %v371_v28 = vcombine.high %v337_v22, %v353_v20 }
 0x237   :  { %v690_v40 = vcombine.low %v6142_v41, %v613_v23  ;;  %v691_v44 = vcombine.high %v6142_v41, %v613_v23  ;;  %v765_v62 = vrot.slane %v758_v29, %v6162_v54  ;;  %v773_v63 = vrot.slane %v5257_v30, %v6162_v54 }
 0x238   :  { %v362_v33 = vrot.slane %v354_v25, %v6164_v61  ;;  %v369_v34 = vrot.slane %v355_v26, %v6164_v61  ;;  %v378_v35 = vrot.slane %v370_v27, %v6164_v61  ;;  %v385_v36 = vrot.slane %v371_v28, %v6164_v61  ;;  %v307_v37 = vpop.permute.xlu1 %306  ;;  %v619_v39 = vpop.permute.xlu0 %618 }
 0x239   :  { %v706_v45 = vcombine.low %v607_v24, %v619_v39  ;;  %v707_v46 = vcombine.high %v607_v24, %v619_v39  ;;  %v698_v51 = vrot.slane %v690_v40, %v6162_v54  ;;  %v705_v52 = vrot.slane %v691_v44, %v6162_v54 }
 0x23a   :  { %v458_v47 = vcombine.low %v362_v33, %v369_v34  ;;  %v5253_v48 = vcombine.high %v362_v33, %v369_v34  ;;  %v474_v49 = vcombine.low %v378_v35, %v385_v36  ;;  %v5254_v50 = vcombine.high %v378_v35, %v385_v36 }
 0x23b   :  { %v714_v53 = vrot.slane %v706_v45, %v6162_v54  ;;  %v721_v55 = vrot.slane %v707_v46, %v6162_v54  ;;  %v781_v0 = vrot.slane %v774_v31, %v6162_v54  ;;  %v789_v1 = vrot.slane %v5258_v32, %v6162_v54 }
 0x23c   :  { %v319_v60 = vpop.permute.xlu1 %318  ;;  %v313_v41 = vpop.permute.xlu0 %312  ;;  %v6195_v3 = vrot.slane %v458_v47, %v6162_v54  ;;  %v6198_v4 = vrot.slane %v5253_v48, %v6162_v54  ;;  %v6201_v5 = vrot.slane %v474_v49, %v6162_v54  ;;  %v6204_v6 = vrot.slane %v5254_v50, %v6162_v54 }
 0x23d   :  { %v722_v56 = vcombine.low %v698_v51, %v714_v53  ;;  %v723_v57 = vcombine.high %v698_v51, %v714_v53  ;;  %v738_v58 = vcombine.low %v705_v52, %v721_v55  ;;  %v739_v59 = vcombine.high %v705_v52, %v721_v55 }
 0x23e   :  { %v406_v7 = vcombine.low %v307_v37, %v319_v60  ;;  %v407_v8 = vcombine.high %v307_v37, %v319_v60  ;;  %v390_v9 = vcombine.low %v6148_v42, %v313_v41  ;;  %v391_v10 = vcombine.high %v6148_v42, %v313_v41 }
 0x23f   :  { %v730_v11 = vrot.slane %v722_v56, %v6164_v61  ;;  %v737_v12 = vrot.slane %v723_v57, %v6164_v61  ;;  %v746_v13 = vrot.slane %v738_v58, %v6164_v61  ;;  %v753_v14 = vrot.slane %v739_v59, %v6164_v61 }
 0x240   :  { %v414_v17 = vrot.slane %v406_v7, %v6162_v54  ;;  %v421_v18 = vrot.slane %v407_v8, %v6162_v54  ;;  %v398_v19 = vrot.slane %v390_v9, %v6162_v54  ;;  %v405_v20 = vrot.slane %v391_v10, %v6162_v54 }
 0x241   :  { %v490_v42 = vcombine.low %v6195_v3, %v6198_v4  ;;  %v506_v21 = vcombine.low %v6201_v5, %v6204_v6  ;;  %v826_v24 = vcombine.low %v730_v11, %v737_v12  ;;  %v5259_v25 = vcombine.high %v730_v11, %v737_v12 }
 0x242   :  { %v422_v22 = vcombine.low %v398_v19, %v414_v17  ;;  %v423_v23 = vcombine.high %v398_v19, %v414_v17  ;;  %v790_v26 = vcombine.low %v765_v62, %v773_v63  ;;  %v806_v27 = vcombine.low %v781_v0, %v789_v1 }
 0x243   :  { %v842_v28 = vcombine.low %v746_v13, %v753_v14  ;;  %v5260_v29 = vcombine.high %v746_v13, %v753_v14  ;;  %v438_v30 = vcombine.low %v405_v20, %v421_v18  ;;  %v439_v31 = vcombine.high %v405_v20, %v421_v18 }
 0x244   :  { %v491_v32 = vcombine.high %v6195_v3, %v6198_v4  ;;  %v507_v33 = vcombine.high %v6201_v5, %v6204_v6  ;;  %v798_v34 = vrot.slane %v790_v26, %v6164_v61  ;;  %v814_v35 = vrot.slane %v806_v27, %v6164_v61 }
 0x245   :  { %v430_v36 = vrot.slane %v422_v22, %v6164_v61  ;;  %v437_v37 = vrot.slane %v423_v23, %v6164_v61  ;;  %v498_v39 = vrot.slane %v490_v42, %v6164_v61  ;;  %v514_v40 = vrot.slane %v506_v21, %v6164_v61 }
 0x246   :  { %v6231_v44 = vrot.slane %v826_v24, %v6162_v54  ;;  %v841_v45 = vrot.slane %v5259_v25, %v6162_v54  ;;  %v822_v46 = vcombine.low %v798_v34, %v814_v35  ;;  %v823_v47 = vcombine.high %v798_v34, %v814_v35 }
 0x247   :  { %v849_v48 = vrot.slane %v842_v28, %v6162_v54  ;;  %v857_v49 = vrot.slane %v5260_v29, %v6162_v54  ;;  %v446_v50 = vrot.slane %v438_v30, %v6164_v61  ;;  %v453_v51 = vrot.slane %v439_v31, %v6164_v61 }
 0x248   :  { %v894_v52 = vpack.c.bf16 %v822_v46, %v822_v46  ;;  %v895_v53 = vpack.c.bf16 %v823_v47, %v823_v47  ;;  %v791_v55 = vcombine.high %v765_v62, %v773_v63  ;;  %v807_v56 = vcombine.high %v781_v0, %v789_v1 }
 0x249   :  { %v526_v57 = vcombine.low %v430_v36, %v437_v37  ;;  %v5255_v58 = vcombine.high %v430_v36, %v437_v37  ;;  %v522_v59 = vcombine.low %v498_v39, %v514_v40  ;;  %v523_v60 = vcombine.high %v498_v39, %v514_v40 }
 0x24a   :  { %v1207_v41 = vsel %vm1202_vm4, %v894_v52, 0  ;;  %v1253_v3 = vsel %vm1202_vm4, %v895_v53, 0  ;;  %v805_v4 = vrot.slane %v791_v55, %v6164_v61  ;;  %v821_v5 = vrot.slane %v807_v56, %v6164_v61 }
 0x24b   :  { %v542_v6 = vcombine.low %v446_v50, %v453_v51  ;;  %v5256_v7 = vcombine.high %v446_v50, %v453_v51  ;;  %5547 = vmatpush3.bf16.xpose.msra.mxu0 %v1207_v41  ;;  %5553 = vmatpush3.bf16.xpose.msra.mxu1 %v1253_v3  ;;  %v858_v8 = vcombine.low %v6231_v44, %v841_v45 }
 0x24c   :  { %5558 = vmatprep.subr.bf16.mxu0 %v6001_v2  ;;  %5564 = vmatprep.subr.bf16.mxu1 %v6001_v2  ;;  %v824_v62 = vcombine.low %v805_v4, %v821_v5  ;;  %v825_v63 = vcombine.high %v805_v4, %v821_v5  ;;  %v874_v0 = vcombine.low %v849_v48, %v857_v49 }
 0x24d   :  { %v866_v10 = vrot.slane %v858_v8, %v6164_v61  ;;  %v533_v12 = vrot.slane %v526_v57, %v6162_v54  ;;  %v541_v13 = vrot.slane %v5255_v58, %v6162_v54  ;;  %v594_v14 = vpack.c.bf16 %v522_v59, %v522_v59 }
 0x24e   :  { %v896_v1 = vpack.c.bf16 %v824_v62, %v824_v62  ;;  %v897_v9 = vpack.c.bf16 %v825_v63, %v825_v63  ;;  %v882_v11 = vrot.slane %v874_v0, %v6164_v61  ;;  %v595_v17 = vpack.c.bf16 %v523_v60, %v523_v60 }
 0x24f   :  { %v549_v18 = vrot.slane %v542_v6, %v6162_v54  ;;  %v557_v19 = vrot.slane %v5256_v7, %v6162_v54  ;;  %v505_v20 = vrot.slane %v491_v32, %v6164_v61  ;;  %v521_v42 = vrot.slane %v507_v33, %v6164_v61 }
 0x250   :  { %v859_v21 = vcombine.high %v6231_v44, %v841_v45  ;;  %v875_v22 = vcombine.high %v849_v48, %v857_v49  ;;  %v1299_v23 = vsel %vm1202_vm4, %v896_v1, 0  ;;  %v1345_v24 = vsel %vm1202_vm4, %v897_v9, 0 }
 0x251   :  { %v890_v25 = vcombine.low %v866_v10, %v882_v11  ;;  %v891_v26 = vcombine.high %v866_v10, %v882_v11  ;;  %v558_v27 = vcombine.low %v533_v12, %v541_v13  ;;  %v574_v28 = vcombine.low %v549_v18, %v557_v19 }
 0x252   :  { %5549 = vmatmul.mubr.msk.bf16.vlgmr.msra.gmra.mrb[8].mxu0 %vm1202_vm4, %v594_v14  ;;  %5555 = vmatmul.mubr.msk.bf16.vlgmr.msra.gmra.mrb[8].mxu1 %vm1202_vm4, %v595_v17  ;;  %v524_v29 = vcombine.low %v505_v20, %v521_v42  ;;  %v525_v30 = vcombine.high %v505_v20, %v521_v42  ;;  %v873_v33 = vrot.slane %v859_v21, %v6164_v61 }
 0x253   :  { %5559 = vmatpush3.bf16.xpose.msra.mxu0 %v1299_v23  ;;  %5565 = vmatpush3.bf16.xpose.msra.mxu1 %v1345_v24  ;;  %v898_v31 = vpack.c.bf16 %v890_v25, %v890_v25  ;;  %v899_v32 = vpack.c.bf16 %v891_v26, %v891_v26  ;;  %v889_v34 = vrot.slane %v875_v22, %v6164_v61 }
 0x254   :  { %5560 = vmatprep.mubr.msk.bf16.mxu0 %vm6002_vm1, %v6001_v2  ;;  %5566 = vmatprep.mubr.msk.bf16.mxu1 %vm6002_vm1, %v6001_v2  ;;  %v596_v35 = vpack.c.bf16 %v524_v29, %v524_v29  ;;  %v597_v36 = vpack.c.bf16 %v525_v30, %v525_v30  ;;  %v566_v37 = vrot.slane %v558_v27, %v6164_v61 }
 0x255   :  { %5570 = vmatprep.subr.bf16.mxu0 %v6001_v2  ;;  %5576 = vmatprep.subr.bf16.mxu1 %v6001_v2  ;;  %v582_v39 = vrot.slane %v574_v28, %v6164_v61  ;;  %v1391_v40 = vsel %vm1202_vm4, %v898_v31, 0  ;;  %v1437_v44 = vsel %vm1202_vm4, %v899_v32, 0  ;;  %v892_v45 = vcombine.low %v873_v33, %v889_v34 }
 0x256   :  { %v893_v46 = vcombine.high %v873_v33, %v889_v34  ;;  %v559_v47 = vcombine.high %v533_v12, %v541_v13  ;;  %v575_v48 = vcombine.high %v549_v18, %v557_v19 }
 0x257   :  { %v590_v49 = vcombine.low %v566_v37, %v582_v39  ;;  %v591_v50 = vcombine.high %v566_v37, %v582_v39  ;;  %v900_v51 = vpack.c.bf16 %v892_v45, %v892_v45 }
 0x258   :  { %v901_v52 = vpack.c.bf16 %v893_v46, %v893_v46  ;;  %v573_v56 = vrot.slane %v559_v47, %v6164_v61  ;;  %v589_v57 = vrot.slane %v575_v48, %v6164_v61  ;;  %v905_v46 = vpop.permute.xlu1 %904 }
 0x259   :  { %v598_v53 = vpack.c.bf16 %v590_v49, %v590_v49  ;;  %v599_v55 = vpack.c.bf16 %v591_v50, %v591_v50  ;;  %v1483_v58 = vsel %vm1202_vm4, %v900_v51, 0 }
 0x25a   :  { %5561 = vmatmul.mubr.msk.bf16.vlgmr.msra.gmra.mrb[12].mxu0 %vm1202_vm4, %v596_v35  ;;  %5567 = vmatmul.mubr.msk.bf16.vlgmr.msra.gmra.mrb[12].mxu1 %vm1202_vm4, %v597_v36  ;;  %v1529_v59 = vsel %vm1202_vm4, %v901_v52, 0  ;;  %v592_v60 = vcombine.low %v573_v56, %v589_v57  ;;  %v593_v41 = vcombine.high %v573_v56, %v589_v57 }
 0x25b   :  { %5571 = vmatpush3.bf16.xpose.msra.mxu0 %v1391_v40  ;;  %5577 = vmatpush3.bf16.xpose.msra.mxu1 %v1437_v44 }
 0x25c   :  { %5572 = vmatprep.mubr.msk.bf16.mxu0 %vm6002_vm1, %v6001_v2  ;;  %5578 = vmatprep.mubr.msk.bf16.mxu1 %vm6002_vm1, %v6001_v2  ;;  %v600_v3 = vpack.c.bf16 %v592_v60, %v592_v60  ;;  %v601_v4 = vpack.c.bf16 %v593_v41, %v593_v41 }
 0x25d   :  { %5582 = vmatprep.subr.bf16.mxu0 %v6001_v2  ;;  %5588 = vmatprep.subr.bf16.mxu1 %v6001_v2 }
 0x262   :  { %5573 = vmatmul.mubr.msk.bf16.vlgmr.msra.gmra.mrb[16].mxu0 %vm1202_vm4, %v598_v53  ;;  %5579 = vmatmul.mubr.msk.bf16.vlgmr.msra.gmra.mrb[16].mxu1 %vm1202_vm4, %v599_v55 }
 0x263   :  { %5583 = vmatpush3.bf16.xpose.msra.mxu0 %v1483_v58  ;;  %5589 = vmatpush3.bf16.xpose.msra.mxu1 %v1529_v59 }
 0x264   :  { %5584 = vmatprep.mubr.msk.bf16.mxu0 %vm6002_vm1, %v6001_v2  ;;  %5590 = vmatprep.mubr.msk.bf16.mxu1 %vm6002_vm1, %v6001_v2 }
 0x265   :  { %5594 = vmatprep.subr.bf16.mxu0 %v6001_v2  ;;  %5600 = vmatprep.subr.bf16.mxu1 %v6001_v2 }
 0x26a   :  { %5585 = vmatmul.mubr.msk.bf16.vlgmr.msra.gmra.mrb[20].mxu0 %vm1202_vm4, %v600_v3  ;;  %5591 = vmatmul.mubr.msk.bf16.vlgmr.msra.gmra.mrb[20].mxu1 %vm1202_vm4, %v601_v4 }
 0x26b   :  { %5596 = vmatprep.mubr.msk.bf16.mxu0 %vm6002_vm1, %v6001_v2  ;;  %5602 = vmatprep.mubr.msk.bf16.mxu1 %vm6002_vm1, %v6001_v2 }
 0x325   :  { %v1243_v5 = vpop.f32.mrb[8].mxu0  ;;  %v1289_v6 = vpop.f32.mrb[8].mxu1 }
 0x326   :  { %v5550_v7 = vpop.f32.mrb[9].mxu0  ;;  %v5556_v8 = vpop.f32.mrb[9].mxu1  ;;  %v1574_v62 = vsel %vm1202_vm4, %v1289_v6, -inf  ;;  %v1571_v63 = vsel %vm1202_vm4, %v1243_v5, -inf }
 0x327   :  { %v1292_v0 = vpop.f32.mrb[10].mxu1  ;;  %1575 = vmax.xlane.f32.xlu1 %v1574_v62  ;;  %1572 = vmax.xlane.f32.xlu0 %v1571_v63  ;;  %v1246_v1 = vpop.f32.mrb[10].mxu0 }
 0x328   :  { %v5551_v9 = vpop.f32.mrb[11].mxu0  ;;  %v5557_v10 = vpop.f32.mrb[11].mxu1 }
 0x32d   :  { %v1335_v11 = vpop.f32.mrb[12].mxu0  ;;  %v1381_v12 = vpop.f32.mrb[12].mxu1 }
 0x32e   :  { %v5562_v13 = vpop.f32.mrb[13].mxu0  ;;  %v5568_v14 = vpop.f32.mrb[13].mxu1  ;;  %v1577_v17 = vsel %vm1202_vm4, %v1335_v11, -inf  ;;  %v1580_v21 = vsel %vm1202_vm4, %v1381_v12, -inf }
 0x32f   :  { %v1384_v18 = vpop.f32.mrb[14].mxu1  ;;  %1578 = vmax.xlane.f32.xlu0 %v1577_v17  ;;  %v1338_v19 = vpop.f32.mrb[14].mxu0 }
 0x330   :  { %v5563_v20 = vpop.f32.mrb[15].mxu0  ;;  %v5569_v42 = vpop.f32.mrb[15].mxu1 }
 0x333   :  { %1581 = vmax.xlane.f32.xlu0 %v1580_v21 }
 0x335   :  { %v1427_v22 = vpop.f32.mrb[16].mxu0  ;;  %v6300_v23 = vpop.f32.mrb[16].mxu1 }
 0x336   :  { %v5574_v24 = vpop.f32.mrb[17].mxu0  ;;  %v5580_v25 = vpop.f32.mrb[17].mxu1  ;;  %v1586_v26 = vsel %vm1202_vm4, %v6300_v23, -inf  ;;  %v1583_v27 = vsel %vm1202_vm4, %v1427_v22, -inf }
 0x337   :  { %v1476_v28 = vpop.f32.mrb[18].mxu1  ;;  %1587 = vmax.xlane.f32.xlu0 %v1586_v26  ;;  %1584 = vmax.xlane.f32.xlu1 %v1583_v27  ;;  %v1430_v29 = vpop.f32.mrb[18].mxu0 }
 0x338   :  { %v5575_v30 = vpop.f32.mrb[19].mxu0  ;;  %v5581_v31 = vpop.f32.mrb[19].mxu1 }
 0x33d   :  { %v6305_v32 = vpop.f32.mrb[20].mxu0  ;;  %v6307_v33 = vpop.f32.mrb[20].mxu1 }
 0x33e   :  { %v5586_v34 = vpop.f32.mrb[21].mxu0  ;;  %v5592_v35 = vpop.f32.mrb[21].mxu1  ;;  %v1592_v36 = vsel %vm1202_vm4, %v6307_v33, -inf  ;;  %v1589_v37 = vsel %vm1202_vm4, %v6305_v32, -inf }
 0x33f   :  { %v1568_v39 = vpop.f32.mrb[22].mxu1  ;;  %1593 = vmax.xlane.f32.xlu0 %v1592_v36  ;;  %1590 = vmax.xlane.f32.xlu1 %v1589_v37  ;;  %v1522_v40 = vpop.f32.mrb[22].mxu0 }
 0x340   :  { %v5587_v44 = vpop.f32.mrb[23].mxu0  ;;  %v5593_v45 = vpop.f32.mrb[23].mxu1 }
 0x350   :  { %916 = vrot.lane.b32.xlu1 %v6158_v43, %s6003_s28 }
 0x355   :  { %910 = vrot.lane.b32.xlu0 %v6158_v43, %s6005_s30 }
 0x3b4   :  { %v1576_v47 = vpop.xlane.xlu1 %1575  ;;  %v1573_v48 = vpop.xlane.xlu0 %1572 }
 0x3b5   :  { %v1596_v49 = vsub.f32 %v1289_v6, %v1576_v47  ;;  %v1595_v50 = vsub.f32 %v1243_v5, %v1573_v48 }
 0x3b7   :  { %v1605_v51 = vmul.f32 1.442695, %v1596_v49  ;;  %v1603_v52 = vmul.f32 1.442695, %v1595_v50 }
 0x3b9   :  { %5897 = vpow2.f32 %v1605_v51 }
 0x3ba   :  { %5899 = vpow2.f32 %v1603_v52 }
 0x3bc   :  { %v1579_v53 = vpop.xlane.xlu0 %1578 }
 0x3bd   :  { %v1597_v55 = vsub.f32 %v1335_v11, %v1579_v53 }
 0x3bf   :  { %v1607_v56 = vmul.f32 1.442695, %v1597_v55 }
 0x3c0   :  { %v1582_v57 = vpop.xlane.xlu0 %1581 }
 0x3c1   :  { %5901 = vpow2.f32 %v1607_v56  ;;  %v1598_v58 = vsub.f32 %v1381_v12, %v1582_v57 }
 0x3c3   :  { %v6317_v59 = vpop.eup %5897  ;;  %v1609_v60 = vmul.f32 1.442695, %v1598_v58 }
 0x3c4   :  { %v6319_v41 = vpop.eup %5899  ;;  %v1585_v3 = vpop.xlane.xlu1 %1584  ;;  %v1622_v4 = vsel %vm1202_vm4, %v6317_v59, 0.0 }
 0x3c5   :  { %5903 = vpow2.f32 %v1609_v60  ;;  %v1599_v5 = vsub.f32 %v1427_v22, %v1585_v3  ;;  %1623 = vadd.xlane.f32.xlu0 %v1622_v4  ;;  %v1619_v6 = vsel %vm1202_vm4, %v6319_v41, 0.0  ;;  %v6325_v8 = vpop.xlane.xlu0 %1587 }
 0x3c6   :  { %1620 = vadd.xlane.f32.xlu1 %v1619_v6 }
 0x3c7   :  { %v1611_v7 = vmul.f32 1.442695, %v1599_v5 }
 0x3c9   :  { %5905 = vpow2.f32 %v1611_v7  ;;  %v1600_v7 = vsub.f32 %v6300_v23, %v6325_v8 }
 0x3cb   :  { %v6327_v62 = vpop.eup %5901 }
 0x3cc   :  { %v6329_v63 = vpop.xlane.xlu0 %1593  ;;  %v6331_v0 = vpop.xlane.xlu1 %1590  ;;  %v1625_v1 = vsel %vm1202_vm4, %v6327_v62, 0.0 }
 0x3cd   :  { %v1602_v9 = vsub.f32 %v6307_v33, %v6329_v63  ;;  %1626 = vadd.xlane.f32.xlu1 %v1625_v1  ;;  %v1613_v1 = vmul.f32 1.442695, %v1600_v7 }
 0x3cf   :  { %v6337_v10 = vpop.eup %5903  ;;  %5907 = vpow2.f32 %v1613_v1 }
 0x3d0   :  { %v911_v11 = vpop.permute.xlu0 %910  ;;  %v917_v12 = vpop.permute.xlu1 %916  ;;  %v1628_v13 = vsel %vm1202_vm4, %v6337_v10, 0.0 }
 0x3d1   :  { %v922_v14 = vcombine.low %v6158_v43, %v911_v11  ;;  %v923_v17 = vcombine.high %v6158_v43, %v911_v11  ;;  %v938_v18 = vcombine.low %v905_v46, %v917_v12  ;;  %1629 = vadd.xlane.f32.xlu0 %v1628_v13  ;;  %v939_v19 = vcombine.high %v905_v46, %v917_v12 }
 0x3d2   :  { %v1601_v11 = vsub.f32 %v6305_v32, %v6331_v0  ;;  %v1617_v32 = vmul.f32 1.442695, %v1602_v9 }
 0x3d3   :  { %v930_v20 = vrot.slane %v922_v14, %v6162_v54  ;;  %v937_v42 = vrot.slane %v923_v17, %v6162_v54  ;;  %v946_v21 = vrot.slane %v938_v18, %v6162_v54  ;;  %v6346_v22 = vpop.eup %5905  ;;  %v953_v24 = vrot.slane %v939_v19, %v6162_v54 }
 0x3d4   :  { %v1631_v27 = vsel %vm1202_vm4, %v6346_v22, 0.0  ;;  %v1615_v12 = vmul.f32 1.442695, %v1601_v11 }
 0x3d5   :  { %v954_v25 = vcombine.low %v930_v20, %v946_v21  ;;  %v955_v26 = vcombine.high %v930_v20, %v946_v21  ;;  %v970_v28 = vcombine.low %v937_v42, %v953_v24  ;;  %v971_v43 = vcombine.high %v937_v42, %v953_v24  ;;  %1632 = vadd.xlane.f32.xlu0 %v1631_v27 }
 0x3d6   :  { %5909 = vpow2.f32 %v1615_v12 }
 0x3d7   :  { %v962_v29 = vrot.slane %v954_v25, %v6164_v61  ;;  %v969_v30 = vrot.slane %v955_v26, %v6164_v61  ;;  %v978_v31 = vrot.slane %v970_v28, %v6164_v61  ;;  %v985_v34 = vrot.slane %v971_v43, %v6164_v61 }
 0x3d8   :  { %5911 = vpow2.f32 %v1617_v32 }
 0x3d9   :  { %v1058_v35 = vcombine.low %v962_v29, %v969_v30  ;;  %v5261_v36 = vcombine.high %v962_v29, %v969_v30  ;;  %v1074_v37 = vcombine.low %v978_v31, %v985_v34  ;;  %v5262_v39 = vcombine.high %v978_v31, %v985_v34  ;;  %v6375_v13 = vpop.eup %5907 }
 0x3da   :  { %v1634_v14 = vsel %vm1202_vm4, %v6375_v13, 0.0 }
 0x3db   :  { %v1065_v40 = vrot.slane %v1058_v35, %v6162_v54  ;;  %v1073_v44 = vrot.slane %v5261_v36, %v6162_v54  ;;  %v1081_v45 = vrot.slane %v1074_v37, %v6162_v54  ;;  %v1089_v46 = vrot.slane %v5262_v39, %v6162_v54 }
 0x3dd   :  { %v1090_v47 = vcombine.low %v1065_v40, %v1073_v44  ;;  %v1091_v48 = vcombine.high %v1065_v40, %v1073_v44  ;;  %v1106_v49 = vcombine.low %v1081_v45, %v1089_v46  ;;  %v1107_v50 = vcombine.high %v1081_v45, %v1089_v46 }
 0x3de   :  { %912 = vrot.lane.b32.xlu1 %v6136_v38, %s6005_s30 }
 0x3df   :  { %v1098_v51 = vrot.slane %v1090_v47, %v6164_v61  ;;  %v1105_v52 = vrot.slane %v1091_v48, %v6164_v61  ;;  %v1114_v53 = vrot.slane %v1106_v49, %v6164_v61  ;;  %v1121_v55 = vrot.slane %v1107_v50, %v6164_v61 }
 0x3e0   :  { %v6379_v17 = vpop.eup %5909 }
 0x3e1   :  { %v1122_v56 = vcombine.low %v1098_v51, %v1114_v53  ;;  %v1123_v57 = vcombine.high %v1098_v51, %v1114_v53  ;;  %v1124_v58 = vcombine.low %v1105_v52, %v1121_v55  ;;  %v1125_v60 = vcombine.high %v1105_v52, %v1121_v55 }
 0x3e2   :  { %v1637_v23 = vsel %vm1202_vm4, %v6379_v17, 0.0  ;;  %v6388_v8 = vpop.eup %5911 }
 0x3e3   :  { %v1194_v3 = vpack.c.bf16 %v1122_v56, %v1122_v56  ;;  %v1195_v4 = vpack.c.bf16 %v1123_v57, %v1123_v57  ;;  %v1640_v0 = vsel %vm1202_vm4, %v6388_v8, 0.0  ;;  %v1197_v33 = vpack.c.bf16 %v1125_v60, %v1125_v60 }
 0x3e4   :  { %v1196_v9 = vpack.c.bf16 %v1124_v58, %v1124_v58 }
 0x3e5   :  { %v1672_v5 = vsel %vm1670_vm5, %v1194_v3, 0  ;;  %v1718_v6 = vsel %vm1670_vm5, %v1195_v4, 0  ;;  %v1810_v28 = vsel %vm1670_vm5, %v1197_v33, 0 }
 0x3e6   :  { %5595 = vmatpush3.bf16.msra.mxu0 %v1672_v5  ;;  %5601 = vmatpush3.bf16.msra.mxu1 %v1718_v6  ;;  %v1764_v43 = vsel %vm1670_vm5, %v1196_v9, 0 }
 0x3e7   :  { %5606 = vmatprep.subr.bf16.mxu0 %v6001_v2  ;;  %5612 = vmatprep.subr.bf16.mxu1 %v6001_v2 }
 0x3eb   :  { %906 = vrot.lane.b32.xlu0 %v6136_v38, %s6004_s29 }
 0x402   :  { %1635 = vadd.xlane.f32.xlu1 %v1634_v14 }
 0x40a   :  { %1638 = vadd.xlane.f32.xlu0 %v1637_v23 }
 0x413   :  { %918 = vrot.lane.b32.xlu1 %v6136_v38, %s6003_s28 }
 0x437   :  { %1641 = vadd.xlane.f32.xlu1 %v1640_v0 }
 0x452   :  { %v1624_v18 = vpop.xlane.xlu0 %1623 }
 0x453   :  { %5913 = vrcp.f32 %v1624_v18  ;;  %v1621_v19 = vpop.xlane.xlu1 %1620 }
 0x454   :  { %5915 = vrcp.f32 %v1621_v19 }
 0x45a   :  { %v1627_v20 = vpop.xlane.xlu1 %1626 }
 0x45b   :  { %5917 = vrcp.f32 %v1627_v20 }
 0x45d   :  { %v5914_v42 = vpop.eup %5913 }
 0x45e   :  { %v5916_v21 = vpop.eup %5915  ;;  %v1652_v24 = vmul.f32 %v5914_v42, %v6317_v59  ;;  %v1630_v25 = vpop.xlane.xlu0 %1629 }
 0x45f   :  { %v1651_v63 = vmul.f32 %v5916_v21, %v6319_v41  ;;  %5919 = vrcp.f32 %v1630_v25  ;;  %v913_v35 = vpop.permute.xlu1 %912 }
 0x460   :  { %v1660_v26 = vpack.c.bf16 %v1652_v24, %v1652_v24  ;;  %v990_v37 = vcombine.low %v6136_v38, %v913_v35  ;;  %v991_v39 = vcombine.high %v6136_v38, %v913_v35 }
 0x461   :  { %v1659_v27 = vpack.c.bf16 %v1651_v63, %v1651_v63 }
 0x462   :  { %5603 = vmatmul.mubr.msk.bf16.vlgmr.msra.gmra.mrb[24].mxu1 %vm1202_vm4, %v1660_v26  ;;  %v1633_v36 = vpop.xlane.xlu0 %1632  ;;  %v998_v46 = vrot.slane %v990_v37, %v6162_v54  ;;  %v1005_v47 = vrot.slane %v991_v39, %v6162_v54 }
 0x463   :  { %5597 = vmatmul.mubr.msk.bf16.vlgmr.msra.gmra.mrb[24].mxu0 %vm1202_vm4, %v1659_v27  ;;  %5613 = vmatpush3.bf16.msra.mxu1 %v1810_v28  ;;  %5921 = vrcp.f32 %v1633_v36 }
 0x464   :  { %5607 = vmatpush3.bf16.msra.mxu0 %v1764_v43  ;;  %5608 = vmatprep.mubr.msk.bf16.mxu0 %vm6002_vm1, %v6001_v2 }
 0x465   :  { %v5918_v59 = vpop.eup %5917  ;;  %5614 = vmatprep.mubr.msk.bf16.mxu1 %vm6002_vm1, %v6001_v2  ;;  %5618 = vmatprep.subr.bf16.mxu0 %v6001_v2 }
 0x466   :  { %v1653_v41 = vmul.f32 %v5918_v59, %v6327_v62  ;;  %5624 = vmatprep.subr.bf16.mxu1 %v6001_v2  ;;  %v907_v40 = vpop.permute.xlu0 %906 }
 0x468   :  { %v1661_v29 = vpack.c.bf16 %v1653_v41, %v1653_v41 }
 0x469   :  { %v5920_v30 = vpop.eup %5919 }
 0x46a   :  { %v1654_v31 = vmul.f32 %v5920_v30, %v6337_v10 }
 0x46b   :  { %5609 = vmatmul.mubr.msk.bf16.vlgmr.msra.gmra.mrb[28].mxu0 %vm1202_vm4, %v1661_v29 }
 0x46c   :  { %v1662_v34 = vpack.c.bf16 %v1654_v31, %v1654_v31  ;;  %5620 = vmatprep.mubr.msk.bf16.mxu0 %vm6002_vm1, %v6001_v2 }
 0x46d   :  { %v5922_v0 = vpop.eup %5921 }
 0x46e   :  { %5615 = vmatmul.mubr.msk.bf16.vlgmr.msra.gmra.mrb[28].mxu1 %vm1202_vm4, %v1662_v34  ;;  %v1655_v9 = vmul.f32 %v5922_v0, %v6346_v22 }
 0x46f   :  { %5626 = vmatprep.mubr.msk.bf16.mxu1 %vm6002_vm1, %v6001_v2 }
 0x470   :  { %v1663_v30 = vpack.c.bf16 %v1655_v9, %v1655_v9 }
 0x48f   :  { %v1636_v62 = vpop.xlane.xlu1 %1635 }
 0x490   :  { %5923 = vrcp.f32 %v1636_v62 }
 0x493   :  { %v919_v10 = vpop.permute.xlu1 %918 }
 0x494   :  { %v1006_v44 = vcombine.low %v907_v40, %v919_v10  ;;  %v1007_v45 = vcombine.high %v907_v40, %v919_v10 }
 0x496   :  { %v1014_v48 = vrot.slane %v1006_v44, %v6162_v54  ;;  %v1021_v49 = vrot.slane %v1007_v45, %v6162_v54 }
 0x497   :  { %v1639_v11 = vpop.xlane.xlu0 %1638 }
 0x498   :  { %v1022_v50 = vcombine.low %v998_v46, %v1014_v48  ;;  %v1023_v51 = vcombine.high %v998_v46, %v1014_v48  ;;  %v1038_v52 = vcombine.low %v1005_v47, %v1021_v49  ;;  %v1039_v53 = vcombine.high %v1005_v47, %v1021_v49 }
 0x499   :  { %5925 = vrcp.f32 %v1639_v11 }
 0x49a   :  { %v1030_v38 = vrot.slane %v1022_v50, %v6164_v61  ;;  %v1037_v55 = vrot.slane %v1023_v51, %v6164_v61  ;;  %v1046_v56 = vrot.slane %v1038_v52, %v6164_v61  ;;  %v1053_v57 = vrot.slane %v1039_v53, %v6164_v61  ;;  %v5924_v21 = vpop.eup %5923 }
 0x49b   :  { %v1656_v26 = vmul.f32 %v5924_v21, %v6375_v13 }
 0x49c   :  { %v1126_v58 = vcombine.low %v1030_v38, %v1037_v55  ;;  %v5263_v60 = vcombine.high %v1030_v38, %v1037_v55  ;;  %v1142_v3 = vcombine.low %v1046_v56, %v1053_v57  ;;  %v5264_v4 = vcombine.high %v1046_v56, %v1053_v57 }
 0x49d   :  { %v1664_v31 = vpack.c.bf16 %v1656_v26, %v1656_v26 }
 0x49e   :  { %v1133_v5 = vrot.slane %v1126_v58, %v6162_v54  ;;  %v1141_v6 = vrot.slane %v5263_v60, %v6162_v54  ;;  %v1149_v7 = vrot.slane %v1142_v3, %v6162_v54  ;;  %v1157_v1 = vrot.slane %v5264_v4, %v6162_v54 }
 0x4a0   :  { %v1158_v12 = vcombine.low %v1133_v5, %v1141_v6  ;;  %v1174_v14 = vcombine.low %v1149_v7, %v1157_v1  ;;  %v1159_v23 = vcombine.high %v1133_v5, %v1141_v6  ;;  %v1175_v32 = vcombine.high %v1149_v7, %v1157_v1 }
 0x4a2   :  { %v1166_v18 = vrot.slane %v1158_v12, %v6164_v61  ;;  %v1182_v19 = vrot.slane %v1174_v14, %v6164_v61  ;;  %v1173_v20 = vrot.slane %v1159_v23, %v6164_v61  ;;  %v1189_v42 = vrot.slane %v1175_v32, %v6164_v61 }
 0x4a3   :  { %v5926_v34 = vpop.eup %5925 }
 0x4a4   :  { %v1190_v24 = vcombine.low %v1166_v18, %v1182_v19  ;;  %v1191_v25 = vcombine.high %v1166_v18, %v1182_v19  ;;  %v1192_v33 = vcombine.low %v1173_v20, %v1189_v42  ;;  %v1193_v63 = vcombine.high %v1173_v20, %v1189_v42 }
 0x4a5   :  { %v1657_v35 = vmul.f32 %v5926_v34, %v6379_v17 }
 0x4a6   :  { %v1198_v27 = vpack.c.bf16 %v1190_v24, %v1190_v24  ;;  %v1199_v28 = vpack.c.bf16 %v1191_v25, %v1191_v25  ;;  %v1200_v41 = vpack.c.bf16 %v1192_v33, %v1192_v33  ;;  %v1201_v29 = vpack.c.bf16 %v1193_v63, %v1193_v63 }
 0x4a7   :  { %v1665_v36 = vpack.c.bf16 %v1657_v35, %v1657_v35 }
 0x4a8   :  { %v1856_v43 = vsel %vm1670_vm5, %v1198_v27, 0  ;;  %v1902_v59 = vsel %vm1670_vm5, %v1199_v28, 0  ;;  %v1948_v22 = vsel %vm1670_vm5, %v1200_v41, 0  ;;  %v1994_v13 = vsel %vm1670_vm5, %v1201_v29, 0 }
 0x4a9   :  { %5619 = vmatpush3.bf16.msra.mxu0 %v1856_v43  ;;  %5625 = vmatpush3.bf16.msra.mxu1 %v1902_v59 }
 0x4aa   :  { %5630 = vmatprep.subr.bf16.mxu0 %v6001_v2  ;;  %5636 = vmatprep.subr.bf16.mxu1 %v6001_v2 }
 0x4ac   :  { %5621 = vmatmul.mubr.msk.bf16.vlgmr.msra.gmra.mrb[32].mxu0 %vm1202_vm4, %v1663_v30  ;;  %5627 = vmatmul.mubr.msk.bf16.vlgmr.msra.gmra.mrb[32].mxu1 %vm1202_vm4, %v1664_v31 }
 0x4ad   :  { %5631 = vmatpush3.bf16.msra.mxu0 %v1948_v22  ;;  %5637 = vmatpush3.bf16.msra.mxu1 %v1994_v13 }
 0x4ae   :  { %5632 = vmatprep.mubr.msk.bf16.mxu0 %vm6002_vm1, %v6001_v2  ;;  %5638 = vmatprep.mubr.msk.bf16.mxu1 %vm6002_vm1, %v6001_v2 }
 0x4af   :  { %5642 = vmatprep.subr.bf16.mxu0 %v6001_v2  ;;  %5650 = vmatprep.subr.bf16.mxu1 %v6001_v2 }
 0x4b4   :  { %5633 = vmatmul.mubr.msk.bf16.vlgmr.msra.gmra.mrb[36].mxu0 %vm1202_vm4, %v1665_v36 }
 0x4b5   :  { %5646 = vmatprep.mubr.msk.bf16.mxu0 %vm6002_vm1, %v6001_v2 }
 0x4c4   :  { %v1642_v62 = vpop.xlane.xlu1 %1641 }
 0x4c5   :  { %5927 = vrcp.f32 %v1642_v62 }
 0x4cf   :  { %v5928_v37 = vpop.eup %5927 }
 0x4d0   :  { %v1658_v17 = vmul.f32 %v5928_v37, %v6388_v8 }
 0x4d2   :  { %v1666_v39 = vpack.c.bf16 %v1658_v17, %v1658_v17 }
 0x4d4   :  { %5639 = vmatmul.mubr.msk.bf16.vlgmr.msra.gmra.mrb[36].mxu1 %vm1202_vm4, %v1666_v39 }
 0x4d5   :  { %5654 = vmatprep.mubr.msk.bf16.mxu1 %vm6002_vm1, %v6001_v2 }
 0x535   :  { %v1754_v40 = vpop.f32.mrb[24].mxu1 }
 0x536   :  { %v1708_v10 = vpop.f32.mrb[24].mxu0  ;;  %v5604_v44 = vpop.f32.mrb[25].mxu1 }
 0x537   :  { %v5598_v45 = vpop.f32.mrb[25].mxu0  ;;  %v1757_v46 = vpop.f32.mrb[26].mxu1 }
 0x538   :  { %v1711_v47 = vpop.f32.mrb[26].mxu0  ;;  %v5605_v48 = vpop.f32.mrb[27].mxu1 }
 0x539   :  { %v5599_v49 = vpop.f32.mrb[27].mxu0 }
 0x53e   :  { %v1800_v50 = vpop.f32.mrb[28].mxu0 }
 0x53f   :  { %v2036_v51 = vcombine.low %v1708_v10, %v1800_v50  ;;  %v2037_v52 = vcombine.high %v1708_v10, %v1800_v50  ;;  %v5610_v53 = vpop.f32.mrb[29].mxu0 }
 0x540   :  { %v1803_v38 = vpop.f32.mrb[30].mxu0 }
 0x541   :  { %v5611_v8 = vpop.f32.mrb[31].mxu0  ;;  %v1846_v55 = vpop.f32.mrb[28].mxu1  ;;  %v2044_v3 = vrot.slane %v2036_v51, %v6162_v54  ;;  %v2051_v4 = vrot.slane %v2037_v52, %v6162_v54 }
 0x542   :  { %v2052_v56 = vcombine.low %v1754_v40, %v1846_v55  ;;  %v2053_v57 = vcombine.high %v1754_v40, %v1846_v55  ;;  %v5616_v58 = vpop.f32.mrb[29].mxu1 }
 0x543   :  { %v1849_v60 = vpop.f32.mrb[30].mxu1 }
 0x544   :  { %v2060_v5 = vrot.slane %v2052_v56, %v6162_v54  ;;  %v2067_v6 = vrot.slane %v2053_v57, %v6162_v54  ;;  %v5617_v7 = vpop.f32.mrb[31].mxu1 }
 0x546   :  { %v2068_v1 = vcombine.low %v2044_v3, %v2060_v5  ;;  %v2069_v11 = vcombine.high %v2044_v3, %v2060_v5  ;;  %v2084_v12 = vcombine.low %v2051_v4, %v2067_v6  ;;  %v2085_v14 = vcombine.high %v2051_v4, %v2067_v6 }
 0x548   :  { %v2076_v23 = vrot.slane %v2068_v1, %v6164_v61  ;;  %v2083_v32 = vrot.slane %v2069_v11, %v6164_v61  ;;  %v2092_v0 = vrot.slane %v2084_v12, %v6164_v61  ;;  %v2099_v18 = vrot.slane %v2085_v14, %v6164_v61 }
 0x54a   :  { %v2172_v19 = vcombine.low %v2076_v23, %v2083_v32  ;;  %v5281_v20 = vcombine.high %v2076_v23, %v2083_v32  ;;  %v2188_v42 = vcombine.low %v2092_v0, %v2099_v18  ;;  %v5282_v21 = vcombine.high %v2092_v0, %v2099_v18  ;;  %v5873_v32 = vld [vmem:[%s7086_s3 + $0x30] sm:$0xff]  }
 0x54b   :  { %5643 = vmatpush3.bf16.msra.mxu0 %v5873_v32  ;;  %v5878_v32 = vld [vmem:[%s7086_s3 + $0x48] sm:$0xff]  }
 0x54c   :  { %v2179_v24 = vrot.slane %v2172_v19, %v6162_v54  ;;  %v2187_v25 = vrot.slane %v5281_v20, %v6162_v54  ;;  %v2195_v33 = vrot.slane %v2188_v42, %v6162_v54  ;;  %v2203_v63 = vrot.slane %v5282_v21, %v6162_v54  ;;  %5644 = vmatprep.subr.bf16.mxu0 %v6001_v2 }
 0x54e   :  { %v2205_v9 = vcombine.high %v2179_v24, %v2187_v25  ;;  %v2221_v26 = vcombine.high %v2195_v33, %v2203_v63  ;;  %v2204_v27 = vcombine.low %v2179_v24, %v2187_v25  ;;  %v2220_v28 = vcombine.low %v2195_v33, %v2203_v63 }
 0x550   :  { %v6467_v43 = vrot.slane %v2205_v9, %v6164_v61  ;;  %v6470_v59 = vrot.slane %v2221_v26, %v6164_v61  ;;  %v6473_v41 = vrot.slane %v2204_v27, %v6164_v61  ;;  %v6476_v29 = vrot.slane %v2220_v28, %v6164_v61  ;;  %v5874_v27 = vld [vmem:[%s7086_s3 + $0x38] sm:$0xff]  }
 0x551   :  { %5645 = vmatpush3.bf16.msra.mxu0 %v5874_v27  ;;  %v5290_v27 = vld [vmem:[%s7088_s5 + $0x6] ss:$0 sm:$0xff] }
 0x552   :  { %v2238_v30 = vcombine.low %v6467_v43, %v6470_v59  ;;  %v2236_v31 = vcombine.low %v6473_v41, %v6476_v29  ;;  %v2237_v34 = vcombine.high %v6473_v41, %v6476_v29  ;;  %v2239_v22 = vcombine.high %v6467_v43, %v6470_v59  ;;  %5658 = vmatprep.subr.bf16.mxu0 %v6001_v2  ;;  %v5285_v41 = vld [vmem:[%s7088_s5 + $0x3] ss:$0 sm:$0xff] }
 0x57f   :  { %v1892_v13 = vpop.f32.mrb[32].mxu0  ;;  %v1938_v35 = vpop.f32.mrb[32].mxu1 }
 0x580   :  { %v5622_v36 = vpop.f32.mrb[33].mxu0  ;;  %v5628_v62 = vpop.f32.mrb[33].mxu1 }
 0x581   :  { %v1895_v37 = vpop.f32.mrb[34].mxu0  ;;  %v1941_v17 = vpop.f32.mrb[34].mxu1 }
 0x582   :  { %v5623_v39 = vpop.f32.mrb[35].mxu0  ;;  %v5629_v40 = vpop.f32.mrb[35].mxu1 }
 0x587   :  { %v1984_v10 = vpop.f32.mrb[36].mxu0 }
 0x588   :  { %v2104_v44 = vcombine.low %v1892_v13, %v1984_v10  ;;  %v2105_v45 = vcombine.high %v1892_v13, %v1984_v10  ;;  %v5634_v46 = vpop.f32.mrb[37].mxu0 }
 0x589   :  { %v1987_v47 = vpop.f32.mrb[38].mxu0 }
 0x58a   :  { %v5635_v48 = vpop.f32.mrb[39].mxu0  ;;  %v2112_v38 = vrot.slane %v2104_v44, %v6162_v54  ;;  %v2119_v8 = vrot.slane %v2105_v45, %v6162_v54 }
 0x5a7   :  { %v2030_v49 = vpop.f32.mrb[36].mxu1 }
 0x5a8   :  { %v2120_v50 = vcombine.low %v1938_v35, %v2030_v49  ;;  %v2121_v51 = vcombine.high %v1938_v35, %v2030_v49  ;;  %v5640_v52 = vpop.f32.mrb[37].mxu1 }
 0x5a9   :  { %v2033_v53 = vpop.f32.mrb[38].mxu1 }
 0x5aa   :  { %v2128_v55 = vrot.slane %v2120_v50, %v6162_v54  ;;  %v2135_v56 = vrot.slane %v2121_v51, %v6162_v54  ;;  %v5641_v57 = vpop.f32.mrb[39].mxu1 }
 0x5ac   :  { %v2136_v58 = vcombine.low %v2112_v38, %v2128_v55  ;;  %v2137_v60 = vcombine.high %v2112_v38, %v2128_v55  ;;  %v2152_v3 = vcombine.low %v2119_v8, %v2135_v56  ;;  %v2153_v4 = vcombine.high %v2119_v8, %v2135_v56 }
 0x5ae   :  { %v2144_v5 = vrot.slane %v2136_v58, %v6164_v61  ;;  %v2151_v6 = vrot.slane %v2137_v60, %v6164_v61  ;;  %v2160_v7 = vrot.slane %v2152_v3, %v6164_v61  ;;  %v2167_v1 = vrot.slane %v2153_v4, %v6164_v61 }
 0x5b0   :  { %v2240_v11 = vcombine.low %v2144_v5, %v2151_v6  ;;  %v5283_v12 = vcombine.high %v2144_v5, %v2151_v6  ;;  %v2256_v14 = vcombine.low %v2160_v7, %v2167_v1  ;;  %v5284_v23 = vcombine.high %v2160_v7, %v2167_v1 }
 0x5b2   :  { %v2247_v0 = vrot.slane %v2240_v11, %v6162_v54  ;;  %v2255_v18 = vrot.slane %v5283_v12, %v6162_v54  ;;  %v2263_v19 = vrot.slane %v2256_v14, %v6162_v54  ;;  %v2271_v20 = vrot.slane %v5284_v23, %v6162_v54  ;;  %v5876_v14 = vld [vmem:[%s7087_s4 + $0x8] sm:$0xff]   ;;  %v5877_v23 = vld [vmem:[%s7086_s3 + $0x40] sm:$0xff]  }
 0x5b4   :  { %v2273_v42 = vcombine.high %v2247_v0, %v2255_v18  ;;  %v2289_v21 = vcombine.high %v2263_v19, %v2271_v20  ;;  %v2272_v24 = vcombine.low %v2247_v0, %v2255_v18  ;;  %v2288_v25 = vcombine.low %v2263_v19, %v2271_v20 }
 0x5b6   :  { %v2287_v33 = vrot.slane %v2273_v42, %v6164_v61  ;;  %v2303_v63 = vrot.slane %v2289_v21, %v6164_v61  ;;  %v2280_v9 = vrot.slane %v2272_v24, %v6164_v61  ;;  %v2296_v26 = vrot.slane %v2288_v25, %v6164_v61  ;;  %v5289_v25 = vld [vmem:[%s7088_s5 + $0x5] ss:$0 sm:$0xff] }
 0x5b8   :  { %v2306_v28 = vcombine.low %v2287_v33, %v2303_v63  ;;  %v2305_v43 = vcombine.high %v2280_v9, %v2296_v26  ;;  %v2304_v59 = vcombine.low %v2280_v9, %v2296_v26  ;;  %v2307_v13 = vcombine.high %v2287_v33, %v2303_v63 }
 0x5ba   :  { %v5842_v35 = vpack.i.bf16 %v2306_v28, %v2238_v30  ;;  %v5837_v36 = vpack.i.bf16 %v2305_v43, %v2237_v34  ;;  %v5847_v62 = vpack.i.bf16 %v2307_v13, %v2239_v22 }
 0x5bc   :  { %5843 = vrot.lane.b32.xlu1 %v5842_v35, %s6008_s13  ;;  %5838 = vrot.lane.b32.xlu0 %v5837_v36, %s6009_s14  ;;  %v5879_v35 = vld [vmem:[%s7086_s3 + $0x50] sm:$0xff]   ;;  %v5880_v36 = vld [vmem:[%s7086_s3 + $0x58] sm:$0xff]  }
 0x5c0   :  { %5848 = vrot.lane.b32.xlu0 %v5847_v62, %s6010_s15  ;;  %v5291_v62 = vld [vmem:[%s7088_s5 + $0x9] ss:$0 sm:$0xff] }
 0x62e   :  { %v5844_v37 = vpop.permute.xlu1 %5843  ;;  %v5839_v17 = vpop.permute.xlu0 %5838 }
 0x62f   :  { %v5841_v39 = vunpack.i.h.bf16 %v5839_v17  ;;  %v5840_v40 = vunpack.i.l.bf16 %v5839_v17  ;;  %v5846_v10 = vunpack.i.h.bf16 %v5844_v37  ;;  %v5845_v44 = vunpack.i.l.bf16 %v5844_v37 }
 0x631   :  { %v2332_v30 = vsel %vm1202_vm4, %v2236_v31, %v5840_v40  ;;  %v2333_v34 = vsel %vm1202_vm4, %v2304_v59, %v5841_v39 }
 0x632   :  { %v5849_v22 = vpop.permute.xlu0 %5848  ;;  %v2335_v47 = vsel %vm2334_vm6, %v2332_v30, %v5845_v44  ;;  %v2336_v48 = vsel %vm2334_vm6, %v2333_v34, %v5846_v10 }
 0x633   :  { %v5851_v45 = vunpack.i.h.bf16 %v5849_v22  ;;  %v5850_v46 = vunpack.i.l.bf16 %v5849_v22 }
 0x635   :  { %v2338_v49 = vsel %vm2337_vm7, %v2335_v47, %v5850_v46  ;;  %v2339_v50 = vsel %vm2337_vm7, %v2336_v48, %v5851_v45  ;;  %v5295_v45 = vld [vmem:[%s7088_s5 + $0x4] ss:$0 sm:$0xff] }
 0x636   :  { %v2340_v51 = vpack.c.bf16 %v2339_v50, %v2338_v49 }
 0x638   :  { %5647 = vmatmul.mubr.msk.bf16.vlgmr.msra.gmra.mrb[40].mxu0 %vm141_vm3, %v2340_v51 }
 0x639   :  { %5666 = vmatprep.mubr.msk.bf16.mxu0 %vm6002_vm1, %v6001_v2  ;;  %5659 = vmatpush3.bf16.msra.mxu0 %v5877_v23 }
 0x63a   :  { %5660 = vmatprep.subr.bf16.mxu0 %v6001_v2 }
 0x63d   :  { %5661 = vmatpush3.bf16.msra.mxu0 %v5878_v32 }
 0x63e   :  { %5662 = vmatprep.subr.bf16.mxu0 %v6001_v2 }
 0x641   :  { %5663 = vmatpush3.bf16.msra.mxu0 %v5879_v35 }
 0x642   :  { %5664 = vmatprep.subr.bf16.mxu0 %v6001_v2 }
 0x645   :  { %5665 = vmatpush3.bf16.msra.mxu0 %v5880_v36 }
 0x646   :  { %5686 = vmatprep.subr.bf16.mxu0 %v6001_v2 }
 0x70b   :  { %v2394_v29 = vpop.f32.mrb[40].mxu0 }
 0x70c   :  { %v2395_v31 = vadd.f32 %v5285_v41, %v2394_v29  ;;  %v5648_v52 = vpop.f32.mrb[41].mxu0 }
 0x70d   :  { %v2397_v53 = vpop.f32.mrb[42].mxu0 }
 0x70e   :  { %v2398_v38 = vadd.f32 %v5285_v41, %v2397_v53  ;;  %v5649_v8 = vpop.f32.mrb[43].mxu0  ;;  %v2401_v55 = vadd.f32 %v2395_v31, %v6097_v15 }
 0x710   :  { %v2403_v56 = vsel %vm141_vm3, %v2401_v55, 0.0  ;;  %v2402_v57 = vadd.f32 %v2398_v38, %v6099_v16  ;;  %v5875_v16 = vld [vmem:[%s7087_s4] sm:$0xff]  }
 0x711   :  { %2404 = vadd.xlane.f32.xlu1 %v2403_v56  ;;  %5651 = vmatpush3.bf16.msra.mxu1 %v5875_v16 }
 0x712   :  { %v2406_v58 = vsel %vm141_vm3, %v2402_v57, 0.0  ;;  %5652 = vmatprep.subr.bf16.mxu1 %v6001_v2 }
 0x713   :  { %2407 = vadd.xlane.f32.xlu0 %v2406_v58 }
 0x715   :  { %5653 = vmatpush3.bf16.msra.mxu1 %v5876_v14 }
 0x716   :  { %5670 = vmatprep.subr.bf16.mxu1 %v6001_v2 }
 0x79e   :  { %v2405_v60 = vpop.xlane.xlu1 %2404 }
 0x79f   :  { %v2410_v3 = vmul.f32 0.03125, %v2405_v60 }
 0x7a0   :  { %v2408_v4 = vpop.xlane.xlu0 %2407 }
 0x7a1   :  { %v2412_v5 = vsub.f32 %v2401_v55, %v2410_v3  ;;  %v2411_v6 = vmul.f32 0.03125, %v2408_v4 }
 0x7a3   :  { %v2413_v7 = vsub.f32 %v2402_v57, %v2411_v6  ;;  %v2414_v1 = vmul.f32 %v2412_v5, %v2412_v5  ;;  %v5882_v6 = vld [vmem:[%s7086_s3 + $0x80] sm:$0xff]  }
 0x7a5   :  { %v2416_v11 = vsel %vm141_vm3, %v2414_v1, 0.0  ;;  %v2415_v12 = vmul.f32 %v2413_v7, %v2413_v7  ;;  %v5884_v1 = vld [vmem:[%s7086_s3 + $0x88] sm:$0xff]  }
 0x7a6   :  { %2417 = vadd.xlane.f32.xlu0 %v2416_v11 }
 0x7a7   :  { %v2419_v15 = vsel %vm141_vm3, %v2415_v12, 0.0 }
 0x7a8   :  { %2420 = vadd.xlane.f32.xlu1 %v2419_v15 }
 0x833   :  { %v2418_v0 = vpop.xlane.xlu0 %2417 }
 0x834   :  { %v2422_v18 = vmul.f32 0.03125, %v2418_v0  ;;  %v5301_v0 = vld [vmem:[%s7088_s5 + $0x7] ss:$0 sm:$0xff] }
 0x835   :  { %v2421_v19 = vpop.xlane.xlu1 %2420 }
 0x836   :  { %v2424_v20 = vadd.f32 1e-05, %v2422_v18  ;;  %v2423_v42 = vmul.f32 0.03125, %v2421_v19 }
 0x838   :  { %5929 = vrsqrt.f32 %v2424_v20  ;;  %v2425_v21 = vadd.f32 1e-05, %v2423_v42 }
 0x83a   :  { %5931 = vrsqrt.f32 %v2425_v21  ;;  %v5302_v21 = vld [vmem:[%s7088_s5 + $0x8] ss:$0 sm:$0xff] }
 0x842   :  { %v5930_v24 = vpop.eup %5929 }
 0x843   :  { %v2428_v33 = vmul.f32 %v5930_v24, %v2412_v5  ;;  %v5881_v5 = vld [vmem:[%s7086_s3 + $0x60] sm:$0xff]  }
 0x844   :  { %v5932_v63 = vpop.eup %5931 }
 0x845   :  { %v2434_v9 = vmul.f32 %v5289_v25, %v2428_v33  ;;  %v2429_v26 = vmul.f32 %v5932_v63, %v2413_v7  ;;  %v5883_v7 = vld [vmem:[%s7086_s3 + $0x68] sm:$0xff]   ;;  %v5885_v63 = vld [vmem:[%s7086_s3 + $0x70] sm:$0xff]  }
 0x847   :  { %v2435_v28 = vmul.f32 %v5289_v25, %v2429_v26  ;;  %v2440_v43 = vadd.f32 %v5290_v27, %v2434_v9  ;;  %v5886_v26 = vld [vmem:[%s7086_s3 + $0x78] sm:$0xff]  }
 0x849   :  { %v2441_v59 = vadd.f32 %v5290_v27, %v2435_v28 }
 0x84b   :  { %v2442_v13 = vpack.c.bf16 %v2441_v59, %v2440_v43 }
 0x84d   :  { %5655 = vmatmul.mubr.msk.bf16.vlgmr.msra.gmra.mrb[40].mxu1 %vm141_vm3, %v2442_v13 }
 0x84e   :  { %5674 = vmatprep.mubr.msk.bf16.mxu1 %vm6002_vm1, %v6001_v2  ;;  %5671 = vmatpush3.bf16.msra.mxu1 %v5881_v5 }
 0x84f   :  { %5672 = vmatprep.subr.bf16.mxu1 %v6001_v2 }
 0x852   :  { %5673 = vmatpush3.bf16.msra.mxu1 %v5883_v7 }
 0x853   :  { %5678 = vmatprep.subr.bf16.mxu1 %v6001_v2 }
 0x920   :  { %v2496_v37 = vpop.f32.mrb[40].mxu1 }
 0x921   :  { %v2497_v17 = vadd.f32 %v5291_v62, %v2496_v37  ;;  %v5656_v39 = vpop.f32.mrb[41].mxu1  ;;  %v5341_v37 = vld [vmem:[%s7088_s5 + $0x10] ss:$0 sm:$0xff] }
 0x922   :  { %v2499_v40 = vpop.f32.mrb[42].mxu1 }
 0x923   :  { %v2500_v10 = vadd.f32 %v5291_v62, %v2499_v40  ;;  %v5657_v44 = vpop.f32.mrb[43].mxu1  ;;  %v2503_v30 = vmax.f32 %v2497_v17, 0.0  ;;  %v5345_v17 = vld [vmem:[%s7088_s5 + $0x11] ss:$0 sm:$0xff] }
 0x925   :  { %v2504_v34 = vmax.f32 %v2500_v10, 0.0 }
 0x927   :  { %v2505_v22 = vpack.c.bf16 %v2504_v34, %v2503_v30 }
 0x929   :  { %5667 = vmatmul.mubr.msk.bf16.vlgmr.msra.gmra.mrb[44].mxu0 %vm2534_vm8, %v2505_v22 }
 0x92a   :  { %5690 = vmatprep.mubr.msk.bf16.mxu0 %vm6002_vm1, %v6001_v2  ;;  %5687 = vmatpush3.bf16.msra.mxu0 %v5882_v6 }
 0x92b   :  { %5688 = vmatprep.subr.bf16.mxu0 %v6001_v2 }
 0x92e   :  { %5689 = vmatpush3.bf16.msra.mxu0 %v5884_v1 }
 0x92f   :  { %5700 = vmatprep.subr.bf16.mxu0 %v6001_v2 }
 0x9fc   :  { %v2572_v46 = vpop.f32.mrb[44].mxu0 }
 0x9fd   :  { %v2573_v47 = vadd.f32 %v5295_v45, %v2572_v46  ;;  %v5668_v48 = vpop.f32.mrb[45].mxu0 }
 0x9fe   :  { %v2575_v49 = vpop.f32.mrb[46].mxu0 }
 0x9ff   :  { %v2576_v50 = vadd.f32 %v5295_v45, %v2575_v49  ;;  %v5669_v51 = vpop.f32.mrb[47].mxu0  ;;  %v2579_v41 = vadd.f32 %v2573_v47, %v2440_v43 }
 0xa01   :  { %v2581_v29 = vsel %vm141_vm3, %v2579_v41, 0.0  ;;  %v2580_v31 = vadd.f32 %v2576_v50, %v2441_v59 }
 0xa02   :  { %2582 = vadd.xlane.f32.xlu0 %v2581_v29 }
 0xa03   :  { %v2584_v52 = vsel %vm141_vm3, %v2580_v31, 0.0 }
 0xa04   :  { %2585 = vadd.xlane.f32.xlu1 %v2584_v52 }
 0xa8f   :  { %v2583_v53 = vpop.xlane.xlu0 %2582 }
 0xa90   :  { %v2587_v38 = vmul.f32 0.03125, %v2583_v53 }
 0xa91   :  { %v2586_v8 = vpop.xlane.xlu1 %2585 }
 0xa92   :  { %v2589_v55 = vsub.f32 %v2579_v41, %v2587_v38  ;;  %v2588_v56 = vmul.f32 0.03125, %v2586_v8 }
 0xa94   :  { %v2590_v57 = vsub.f32 %v2580_v31, %v2588_v56  ;;  %v2591_v58 = vmul.f32 %v2589_v55, %v2589_v55 }
 0xa96   :  { %v2593_v60 = vsel %vm141_vm3, %v2591_v58, 0.0  ;;  %v2592_v3 = vmul.f32 %v2590_v57, %v2590_v57 }
 0xa97   :  { %2594 = vadd.xlane.f32.xlu0 %v2593_v60 }
 0xa98   :  { %v2596_v4 = vsel %vm141_vm3, %v2592_v3, 0.0 }
 0xa99   :  { %2597 = vadd.xlane.f32.xlu1 %v2596_v4 }
 0xb24   :  { %v2595_v11 = vpop.xlane.xlu0 %2594 }
 0xb25   :  { %v2599_v12 = vmul.f32 0.03125, %v2595_v11 }
 0xb26   :  { %v2598_v15 = vpop.xlane.xlu1 %2597 }
 0xb27   :  { %v2601_v16 = vadd.f32 1e-05, %v2599_v12  ;;  %v2600_v14 = vmul.f32 0.03125, %v2598_v15 }
 0xb29   :  { %5933 = vrsqrt.f32 %v2601_v16  ;;  %v2602_v23 = vadd.f32 1e-05, %v2600_v14 }
 0xb2b   :  { %5935 = vrsqrt.f32 %v2602_v23 }
 0xb33   :  { %v5934_v32 = vpop.eup %5933 }
 0xb34   :  { %v2605_v18 = vmul.f32 %v5934_v32, %v2589_v55 }
 0xb35   :  { %v5936_v19 = vpop.eup %5935 }
 0xb36   :  { %v2611_v20 = vmul.f32 %v5301_v0, %v2605_v18  ;;  %v2606_v42 = vmul.f32 %v5936_v19, %v2590_v57 }
 0xb38   :  { %v2612_v24 = vmul.f32 %v5301_v0, %v2606_v42  ;;  %v6602_v25 = vadd.f32 %v5302_v21, %v2611_v20 }
 0xb3a   :  { %v6604_v33 = vadd.f32 %v5302_v21, %v2612_v24 }
 0xb3c   :  { %v2660_v9 = vpack.c.bf16 %v6604_v33, %v6602_v25 }
 0xb3e   :  { %5675 = vmatmul.mubr.msk.bf16.vlgmr.msra.gmra.mrb[44].mxu1 %vm141_vm3, %v2660_v9  ;;  %5691 = vmatmul.mubr.msk.bf16.vlgmr.msra.gmra.mrb[48].mxu0 %vm141_vm3, %v2660_v9 }
 0xb3f   :  { %5679 = vmatpush3.bf16.msra.mxu1 %v5885_v63  ;;  %5682 = vmatprep.mubr.msk.bf16.mxu1 %vm6002_vm1, %v6001_v2 }
 0xb40   :  { %5680 = vmatprep.subr.bf16.mxu1 %v6001_v2  ;;  %5702 = vmatprep.mubr.msk.bf16.mxu0 %vm6002_vm1, %v6001_v2 }
 0xb43   :  { %5681 = vmatpush3.bf16.msra.mxu1 %v5886_v26 }
 0xb44   :  { %5694 = vmatprep.subr.bf16.mxu1 %v6001_v2 }
 0xb46   :  { %5683 = vmatmul.mubr.msk.bf16.vlgmr.msra.gmra.mrb[48].mxu1 %vm141_vm3, %v2660_v9 }
 0xb47   :  { %5696 = vmatprep.mubr.msk.bf16.mxu1 %vm6002_vm1, %v6001_v2 }
 0xc11   :  { %v2714_v27 = vpop.f32.mrb[44].mxu1  ;;  %v6625_v28 = vpop.f32.mrb[48].mxu0 }
 0xc12   :  { %v5676_v43 = vpop.f32.mrb[45].mxu1  ;;  %v5692_v59 = vpop.f32.mrb[49].mxu0  ;;  %v2715_v40 = vadd.f32 %v5341_v37, %v2714_v27 }
 0xc13   :  { %v2717_v13 = vpop.f32.mrb[46].mxu1  ;;  %v6627_v35 = vpop.f32.mrb[50].mxu0 }
 0xc14   :  { %v5677_v36 = vpop.f32.mrb[47].mxu1  ;;  %v5693_v62 = vpop.f32.mrb[51].mxu0  ;;  %v2835_v22 = vmul.f32 0.35355338, %v2715_v40  ;;  %v2718_v45 = vadd.f32 %v5341_v37, %v2717_v13 }
 0xc16   :  { %v6647_v47 = vmul.f32 0.35355338, %v2718_v45 }
 0xc19   :  { %v2771_v39 = vpop.f32.mrb[48].mxu1 }
 0xc1a   :  { %v2772_v10 = vadd.f32 %v5345_v17, %v2771_v39  ;;  %v5684_v44 = vpop.f32.mrb[49].mxu1 }
 0xc1b   :  { %v2774_v30 = vpop.f32.mrb[50].mxu1 }
 0xc1c   :  { %3145 = vrot.lane.b32.xlu1 %v2772_v10, %s6005_s30  ;;  %3139 = vrot.lane.b32.xlu0 %v2772_v10, %s6004_s29  ;;  %v5685_v34 = vpop.f32.mrb[51].mxu1  ;;  %v6641_v46 = vadd.f32 %v5345_v17, %v2774_v30 }
 0xc20   :  { %3151 = vrot.lane.b32.xlu1 %v2772_v10, %s6003_s28  ;;  %2839 = vrot.lane.b32.xlu0 %v2835_v22, %s6004_s29 }
 0xc24   :  { %2845 = vrot.lane.b32.xlu1 %v2835_v22, %s6005_s30  ;;  %2851 = vrot.lane.b32.xlu0 %v2835_v22, %s6003_s28 }
 0xc28   :  { %3147 = vrot.lane.b32.xlu0 %v6641_v46, %s6005_s30  ;;  %3141 = vrot.lane.b32.xlu1 %v6641_v46, %s6004_s29 }
 0xc2c   :  { %2841 = vrot.lane.b32.xlu0 %v6647_v47, %s6004_s29  ;;  %3153 = vrot.lane.b32.xlu1 %v6641_v46, %s6003_s28 }
 0xc30   :  { %2853 = vrot.lane.b32.xlu0 %v6647_v47, %s6003_s28  ;;  %2847 = vrot.lane.b32.xlu1 %v6647_v47, %s6005_s30 }
 0xc8e   :  { %v3146_v48 = vpop.permute.xlu1 %3145  ;;  %v3140_v49 = vpop.permute.xlu0 %3139 }
 0xc8f   :  { %v3157_v50 = vcombine.low %v2772_v10, %v3146_v48  ;;  %v3158_v51 = vcombine.high %v2772_v10, %v3146_v48 }
 0xc91   :  { %v3165_v53 = vrot.slane %v3157_v50, %v6162_v54  ;;  %v3172_v38 = vrot.slane %v3158_v51, %v6162_v54 }
 0xc92   :  { %v3152_v41 = vpop.permute.xlu1 %3151  ;;  %v2840_v29 = vpop.permute.xlu0 %2839 }
 0xc93   :  { %v3173_v31 = vcombine.low %v3140_v49, %v3152_v41  ;;  %v3174_v52 = vcombine.high %v3140_v49, %v3152_v41 }
 0xc95   :  { %v3181_v8 = vrot.slane %v3173_v31, %v6162_v54  ;;  %v3188_v55 = vrot.slane %v3174_v52, %v6162_v54 }
 0xc96   :  { %v2846_v56 = vpop.permute.xlu1 %2845  ;;  %v2852_v57 = vpop.permute.xlu0 %2851 }
 0xc97   :  { %v3189_v58 = vcombine.low %v3165_v53, %v3181_v8  ;;  %v3190_v60 = vcombine.high %v3165_v53, %v3181_v8  ;;  %v3205_v3 = vcombine.low %v3172_v38, %v3188_v55  ;;  %v3206_v4 = vcombine.high %v3172_v38, %v3188_v55 }
 0xc98   :  { %v2857_v5 = vcombine.low %v2835_v22, %v2846_v56  ;;  %v2858_v6 = vcombine.high %v2835_v22, %v2846_v56  ;;  %v2873_v7 = vcombine.low %v2840_v29, %v2852_v57  ;;  %v2874_v1 = vcombine.high %v2840_v29, %v2852_v57 }
 0xc99   :  { %v3197_v11 = vrot.slane %v3189_v58, %v6164_v61  ;;  %v3204_v12 = vrot.slane %v3190_v60, %v6164_v61  ;;  %v3213_v15 = vrot.slane %v3205_v3, %v6164_v61  ;;  %v3220_v16 = vrot.slane %v3206_v4, %v6164_v61 }
 0xc9a   :  { %v2865_v14 = vrot.slane %v2857_v5, %v6162_v54  ;;  %v2872_v23 = vrot.slane %v2858_v6, %v6162_v54  ;;  %v2881_v32 = vrot.slane %v2873_v7, %v6162_v54  ;;  %v2888_v0 = vrot.slane %v2874_v1, %v6162_v54  ;;  %v3148_v18 = vpop.permute.xlu0 %3147  ;;  %v3142_v19 = vpop.permute.xlu1 %3141 }
 0xc9b   :  { %v3293_v63 = vcombine.low %v3197_v11, %v3204_v12  ;;  %v5357_v9 = vcombine.high %v3197_v11, %v3204_v12  ;;  %v3309_v26 = vcombine.low %v3213_v15, %v3220_v16  ;;  %v5358_v27 = vcombine.high %v3213_v15, %v3220_v16 }
 0xc9c   :  { %v2889_v20 = vcombine.low %v2865_v14, %v2881_v32  ;;  %v2890_v42 = vcombine.high %v2865_v14, %v2881_v32  ;;  %v2905_v21 = vcombine.low %v2872_v23, %v2888_v0  ;;  %v2906_v24 = vcombine.high %v2872_v23, %v2888_v0 }
 0xc9d   :  { %v3225_v17 = vcombine.low %v6641_v46, %v3148_v18  ;;  %v3226_v39 = vcombine.high %v6641_v46, %v3148_v18  ;;  %v3300_v53 = vrot.slane %v3293_v63, %v6162_v54  ;;  %v3308_v38 = vrot.slane %v5357_v9, %v6162_v54 }
 0xc9e   :  { %v2897_v43 = vrot.slane %v2889_v20, %v6164_v61  ;;  %v2904_v59 = vrot.slane %v2890_v42, %v6164_v61  ;;  %v2913_v13 = vrot.slane %v2905_v21, %v6164_v61  ;;  %v2920_v36 = vrot.slane %v2906_v24, %v6164_v61  ;;  %v2842_v62 = vpop.permute.xlu0 %2841  ;;  %v3154_v37 = vpop.permute.xlu1 %3153 }
 0xc9f   :  { %v3241_v40 = vcombine.low %v3142_v19, %v3154_v37  ;;  %v3242_v10 = vcombine.high %v3142_v19, %v3154_v37  ;;  %v3233_v45 = vrot.slane %v3225_v17, %v6162_v54  ;;  %v3240_v48 = vrot.slane %v3226_v39, %v6162_v54 }
 0xca0   :  { %v2993_v44 = vcombine.low %v2897_v43, %v2904_v59  ;;  %v5353_v30 = vcombine.high %v2897_v43, %v2904_v59  ;;  %v3009_v34 = vcombine.low %v2913_v13, %v2920_v36  ;;  %v5354_v22 = vcombine.high %v2913_v13, %v2920_v36 }
 0xca1   :  { %v3249_v49 = vrot.slane %v3241_v40, %v6162_v54  ;;  %v3256_v50 = vrot.slane %v3242_v10, %v6162_v54  ;;  %v3316_v8 = vrot.slane %v3309_v26, %v6162_v54  ;;  %v3324_v55 = vrot.slane %v5358_v27, %v6162_v54 }
 0xca2   :  { %v2854_v52 = vpop.permute.xlu0 %2853  ;;  %v2848_v46 = vpop.permute.xlu1 %2847  ;;  %v6684_v56 = vrot.slane %v2993_v44, %v6162_v54  ;;  %v6687_v57 = vrot.slane %v5353_v30, %v6162_v54  ;;  %v6690_v58 = vrot.slane %v3009_v34, %v6162_v54  ;;  %v6693_v60 = vrot.slane %v5354_v22, %v6162_v54 }
 0xca3   :  { %v3257_v51 = vcombine.low %v3233_v45, %v3249_v49  ;;  %v3258_v41 = vcombine.high %v3233_v45, %v3249_v49  ;;  %v3273_v29 = vcombine.low %v3240_v48, %v3256_v50  ;;  %v3274_v31 = vcombine.high %v3240_v48, %v3256_v50 }
 0xca4   :  { %v2941_v3 = vcombine.low %v2842_v62, %v2854_v52  ;;  %v2942_v4 = vcombine.high %v2842_v62, %v2854_v52  ;;  %v2925_v5 = vcombine.low %v6647_v47, %v2848_v46  ;;  %v2926_v6 = vcombine.high %v6647_v47, %v2848_v46 }
 0xca5   :  { %v3265_v7 = vrot.slane %v3257_v51, %v6164_v61  ;;  %v3272_v1 = vrot.slane %v3258_v41, %v6164_v61  ;;  %v3281_v11 = vrot.slane %v3273_v29, %v6164_v61  ;;  %v3288_v12 = vrot.slane %v3274_v31, %v6164_v61 }
 0xca6   :  { %v2949_v15 = vrot.slane %v2941_v3, %v6162_v54  ;;  %v2956_v16 = vrot.slane %v2942_v4, %v6162_v54  ;;  %v2933_v14 = vrot.slane %v2925_v5, %v6162_v54  ;;  %v2940_v23 = vrot.slane %v2926_v6, %v6162_v54 }
 0xca7   :  { %v3025_v32 = vcombine.low %v6684_v56, %v6687_v57  ;;  %v3041_v47 = vcombine.low %v6690_v58, %v6693_v60  ;;  %v3361_v19 = vcombine.low %v3265_v7, %v3272_v1  ;;  %v5359_v20 = vcombine.high %v3265_v7, %v3272_v1 }
 0xca8   :  { %v2957_v0 = vcombine.low %v2933_v14, %v2949_v15  ;;  %v2958_v18 = vcombine.high %v2933_v14, %v2949_v15  ;;  %v3325_v42 = vcombine.low %v3300_v53, %v3308_v38  ;;  %v3341_v21 = vcombine.low %v3316_v8, %v3324_v55 }
 0xca9   :  { %v3377_v24 = vcombine.low %v3281_v11, %v3288_v12  ;;  %v5360_v63 = vcombine.high %v3281_v11, %v3288_v12  ;;  %v2973_v9 = vcombine.low %v2940_v23, %v2956_v16  ;;  %v2974_v26 = vcombine.high %v2940_v23, %v2956_v16 }
 0xcaa   :  { %v3026_v27 = vcombine.high %v6684_v56, %v6687_v57  ;;  %v3042_v43 = vcombine.high %v6690_v58, %v6693_v60  ;;  %v3333_v59 = vrot.slane %v3325_v42, %v6164_v61  ;;  %v3349_v13 = vrot.slane %v3341_v21, %v6164_v61 }
 0xcab   :  { %v2965_v36 = vrot.slane %v2957_v0, %v6164_v61  ;;  %v2972_v62 = vrot.slane %v2958_v18, %v6164_v61  ;;  %v3033_v37 = vrot.slane %v3025_v32, %v6164_v61  ;;  %v3049_v17 = vrot.slane %v3041_v47, %v6164_v61 }
 0xcac   :  { %v6720_v39 = vrot.slane %v3361_v19, %v6162_v54  ;;  %v3376_v40 = vrot.slane %v5359_v20, %v6162_v54  ;;  %v3357_v10 = vcombine.low %v3333_v59, %v3349_v13  ;;  %v3358_v44 = vcombine.high %v3333_v59, %v3349_v13 }
 0xcad   :  { %v3384_v30 = vrot.slane %v3377_v24, %v6162_v54  ;;  %v3392_v34 = vrot.slane %v5360_v63, %v6162_v54  ;;  %v2981_v22 = vrot.slane %v2973_v9, %v6164_v61  ;;  %v2988_v45 = vrot.slane %v2974_v26, %v6164_v61 }
 0xcae   :  { %v3429_v48 = vpack.c.bf16 %v3357_v10, %v3357_v10  ;;  %v3430_v49 = vpack.c.bf16 %v3358_v44, %v3358_v44  ;;  %v3326_v50 = vcombine.high %v3300_v53, %v3308_v38  ;;  %v3342_v51 = vcombine.high %v3316_v8, %v3324_v55 }
 0xcaf   :  { %v3061_v41 = vcombine.low %v2965_v36, %v2972_v62  ;;  %v5355_v29 = vcombine.high %v2965_v36, %v2972_v62  ;;  %v3057_v31 = vcombine.low %v3033_v37, %v3049_v17  ;;  %v3058_v52 = vcombine.high %v3033_v37, %v3049_v17 }
 0xcb0   :  { %v3741_v46 = vsel %vm1202_vm4, %v3429_v48, 0  ;;  %v3787_v56 = vsel %vm1202_vm4, %v3430_v49, 0  ;;  %v3340_v57 = vrot.slane %v3326_v50, %v6164_v61  ;;  %v3356_v58 = vrot.slane %v3342_v51, %v6164_v61 }
 0xcb1   :  { %v3077_v60 = vcombine.low %v2981_v22, %v2988_v45  ;;  %v5356_v3 = vcombine.high %v2981_v22, %v2988_v45  ;;  %5695 = vmatpush3.bf16.xpose.msra.mxu1 %v3741_v46  ;;  %5701 = vmatpush3.bf16.xpose.msra.mxu0 %v3787_v56  ;;  %v3393_v4 = vcombine.low %v6720_v39, %v3376_v40 }
 0xcb2   :  { %5706 = vmatprep.subr.bf16.mxu1 %v6001_v2  ;;  %5712 = vmatprep.subr.bf16.mxu0 %v6001_v2  ;;  %v3359_v53 = vcombine.low %v3340_v57, %v3356_v58  ;;  %v3360_v38 = vcombine.high %v3340_v57, %v3356_v58  ;;  %v3409_v8 = vcombine.low %v3384_v30, %v3392_v34 }
 0xcb3   :  { %v3401_v6 = vrot.slane %v3393_v4, %v6164_v61  ;;  %v3068_v1 = vrot.slane %v3061_v41, %v6162_v54  ;;  %v3076_v11 = vrot.slane %v5355_v29, %v6162_v54  ;;  %v3129_v12 = vpack.c.bf16 %v3057_v31, %v3057_v31 }
 0xcb4   :  { %v3431_v55 = vpack.c.bf16 %v3359_v53, %v3359_v53  ;;  %v3432_v5 = vpack.c.bf16 %v3360_v38, %v3360_v38  ;;  %v3417_v7 = vrot.slane %v3409_v8, %v6164_v61  ;;  %v3130_v15 = vpack.c.bf16 %v3058_v52, %v3058_v52 }
 0xcb5   :  { %v3084_v16 = vrot.slane %v3077_v60, %v6162_v54  ;;  %v3092_v14 = vrot.slane %v5356_v3, %v6162_v54  ;;  %v3040_v23 = vrot.slane %v3026_v27, %v6164_v61  ;;  %v3056_v32 = vrot.slane %v3042_v43, %v6164_v61 }
 0xcb6   :  { %v3394_v47 = vcombine.high %v6720_v39, %v3376_v40  ;;  %v3410_v0 = vcombine.high %v3384_v30, %v3392_v34  ;;  %v3833_v18 = vsel %vm1202_vm4, %v3431_v55, 0  ;;  %v3879_v19 = vsel %vm1202_vm4, %v3432_v5, 0 }
 0xcb7   :  { %v3425_v20 = vcombine.low %v3401_v6, %v3417_v7  ;;  %v3426_v42 = vcombine.high %v3401_v6, %v3417_v7  ;;  %v3093_v21 = vcombine.low %v3068_v1, %v3076_v11  ;;  %v3109_v24 = vcombine.low %v3084_v16, %v3092_v14 }
 0xcb8   :  { %5697 = vmatmul.mubr.msk.bf16.vlgmr.msra.gmra.mrb[52].mxu1 %vm1202_vm4, %v3129_v12  ;;  %5703 = vmatmul.mubr.msk.bf16.vlgmr.msra.gmra.mrb[52].mxu0 %vm1202_vm4, %v3130_v15  ;;  %v3059_v63 = vcombine.low %v3040_v23, %v3056_v32  ;;  %v3060_v9 = vcombine.high %v3040_v23, %v3056_v32  ;;  %v3408_v43 = vrot.slane %v3394_v47, %v6164_v61 }
 0xcb9   :  { %5707 = vmatpush3.bf16.xpose.msra.mxu1 %v3833_v18  ;;  %5713 = vmatpush3.bf16.xpose.msra.mxu0 %v3879_v19  ;;  %v3433_v26 = vpack.c.bf16 %v3425_v20, %v3425_v20  ;;  %v3434_v27 = vpack.c.bf16 %v3426_v42, %v3426_v42  ;;  %v3424_v59 = vrot.slane %v3410_v0, %v6164_v61 }
 0xcba   :  { %5708 = vmatprep.mubr.msk.bf16.mxu1 %vm6002_vm1, %v6001_v2  ;;  %5714 = vmatprep.mubr.msk.bf16.mxu0 %vm6002_vm1, %v6001_v2  ;;  %v3131_v13 = vpack.c.bf16 %v3059_v63, %v3059_v63  ;;  %v3132_v36 = vpack.c.bf16 %v3060_v9, %v3060_v9  ;;  %v3101_v62 = vrot.slane %v3093_v21, %v6164_v61 }
 0xcbb   :  { %5718 = vmatprep.subr.bf16.mxu1 %v6001_v2  ;;  %5724 = vmatprep.subr.bf16.mxu0 %v6001_v2  ;;  %v3117_v37 = vrot.slane %v3109_v24, %v6164_v61  ;;  %v3925_v17 = vsel %vm1202_vm4, %v3433_v26, 0  ;;  %v3971_v39 = vsel %vm1202_vm4, %v3434_v27, 0  ;;  %v3427_v40 = vcombine.low %v3408_v43, %v3424_v59 }
 0xcbc   :  { %v3428_v10 = vcombine.high %v3408_v43, %v3424_v59  ;;  %v3094_v44 = vcombine.high %v3068_v1, %v3076_v11  ;;  %v3110_v30 = vcombine.high %v3084_v16, %v3092_v14 }
 0xcbd   :  { %v3125_v34 = vcombine.low %v3101_v62, %v3117_v37  ;;  %v3126_v22 = vcombine.high %v3101_v62, %v3117_v37  ;;  %v3435_v45 = vpack.c.bf16 %v3427_v40, %v3427_v40  ;;  %v5349_v40 = vld [vmem:[%s7088_s5 + $0x12] ss:$0 sm:$0xff] }
 0xcbe   :  { %v3436_v48 = vpack.c.bf16 %v3428_v10, %v3428_v10  ;;  %v3108_v51 = vrot.slane %v3094_v44, %v6164_v61  ;;  %v3124_v41 = vrot.slane %v3110_v30, %v6164_v61  ;;  %v2829_v10 = vadd.f32 %v5349_v40, %v6625_v28 }
 0xcbf   :  { %v3133_v49 = vpack.c.bf16 %v3125_v34, %v3125_v34  ;;  %v3134_v50 = vpack.c.bf16 %v3126_v22, %v3126_v22  ;;  %v4017_v29 = vsel %vm1202_vm4, %v3435_v45, 0  ;;  %v6807_v30 = vadd.f32 %v5349_v40, %v6627_v35 }
 0xcc0   :  { %5709 = vmatmul.mubr.msk.bf16.vlgmr.msra.gmra.mrb[56].mxu1 %vm1202_vm4, %v3131_v13  ;;  %5715 = vmatmul.mubr.msk.bf16.vlgmr.msra.gmra.mrb[56].mxu0 %vm1202_vm4, %v3132_v36  ;;  %v4063_v31 = vsel %vm1202_vm4, %v3436_v48, 0  ;;  %v3127_v52 = vcombine.low %v3108_v51, %v3124_v41  ;;  %v3128_v46 = vcombine.high %v3108_v51, %v3124_v41 }
 0xcc1   :  { %5719 = vmatpush3.bf16.xpose.msra.mxu1 %v3925_v17  ;;  %5725 = vmatpush3.bf16.xpose.msra.mxu0 %v3971_v39 }
 0xcc2   :  { %5720 = vmatprep.mubr.msk.bf16.mxu1 %vm6002_vm1, %v6001_v2  ;;  %5726 = vmatprep.mubr.msk.bf16.mxu0 %vm6002_vm1, %v6001_v2  ;;  %v3135_v56 = vpack.c.bf16 %v3127_v52, %v3127_v52  ;;  %v3136_v57 = vpack.c.bf16 %v3128_v46, %v3128_v46 }
 0xcc3   :  { %5730 = vmatprep.subr.bf16.mxu1 %v6001_v2  ;;  %5736 = vmatprep.subr.bf16.mxu0 %v6001_v2 }
 0xcc8   :  { %5721 = vmatmul.mubr.msk.bf16.vlgmr.msra.gmra.mrb[60].mxu1 %vm1202_vm4, %v3133_v49  ;;  %5727 = vmatmul.mubr.msk.bf16.vlgmr.msra.gmra.mrb[60].mxu0 %vm1202_vm4, %v3134_v50 }
 0xcc9   :  { %5731 = vmatpush3.bf16.xpose.msra.mxu1 %v4017_v29  ;;  %5737 = vmatpush3.bf16.xpose.msra.mxu0 %v4063_v31 }
 0xcca   :  { %5732 = vmatprep.mubr.msk.bf16.mxu1 %vm6002_vm1, %v6001_v2  ;;  %5738 = vmatprep.mubr.msk.bf16.mxu0 %vm6002_vm1, %v6001_v2 }
 0xccb   :  { %5742 = vmatprep.subr.bf16.mxu1 %v6001_v2  ;;  %5748 = vmatprep.subr.bf16.mxu0 %v6001_v2 }
 0xcd0   :  { %5733 = vmatmul.mubr.msk.bf16.vlgmr.msra.gmra.mrb[64].mxu1 %vm1202_vm4, %v3135_v56  ;;  %5739 = vmatmul.mubr.msk.bf16.vlgmr.msra.gmra.mrb[64].mxu0 %vm1202_vm4, %v3136_v57 }
 0xcd1   :  { %5744 = vmatprep.mubr.msk.bf16.mxu1 %vm6002_vm1, %v6001_v2  ;;  %5750 = vmatprep.mubr.msk.bf16.mxu0 %vm6002_vm1, %v6001_v2 }
 0xd8b   :  { %v3777_v58 = vpop.f32.mrb[52].mxu1  ;;  %v3823_v60 = vpop.f32.mrb[52].mxu0 }
 0xd8c   :  { %v5698_v3 = vpop.f32.mrb[53].mxu1  ;;  %v5704_v4 = vpop.f32.mrb[53].mxu0  ;;  %v4105_v53 = vsel %vm1202_vm4, %v3777_v58, -inf  ;;  %v4108_v38 = vsel %vm1202_vm4, %v3823_v60, -inf }
 0xd8d   :  { %4106 = vmax.xlane.f32.xlu1 %v4105_v53  ;;  %v3780_v8 = vpop.f32.mrb[54].mxu1  ;;  %4109 = vmax.xlane.f32.xlu0 %v4108_v38  ;;  %v3826_v55 = vpop.f32.mrb[54].mxu0 }
 0xd8e   :  { %v5699_v5 = vpop.f32.mrb[55].mxu1  ;;  %v5705_v6 = vpop.f32.mrb[55].mxu0 }
 0xd93   :  { %v3869_v7 = vpop.f32.mrb[56].mxu1  ;;  %v3915_v1 = vpop.f32.mrb[56].mxu0 }
 0xd94   :  { %v5710_v11 = vpop.f32.mrb[57].mxu1  ;;  %v5716_v12 = vpop.f32.mrb[57].mxu0  ;;  %v4111_v15 = vsel %vm1202_vm4, %v3869_v7, -inf  ;;  %v4114_v16 = vsel %vm1202_vm4, %v3915_v1, -inf }
 0xd95   :  { %v3872_v14 = vpop.f32.mrb[58].mxu1  ;;  %4112 = vmax.xlane.f32.xlu0 %v4111_v15  ;;  %4115 = vmax.xlane.f32.xlu1 %v4114_v16  ;;  %v3918_v23 = vpop.f32.mrb[58].mxu0 }
 0xd96   :  { %v5711_v32 = vpop.f32.mrb[59].mxu1  ;;  %v5717_v47 = vpop.f32.mrb[59].mxu0 }
 0xd9b   :  { %v3961_v0 = vpop.f32.mrb[60].mxu1  ;;  %v4007_v18 = vpop.f32.mrb[60].mxu0 }
 0xd9c   :  { %v5722_v19 = vpop.f32.mrb[61].mxu1  ;;  %v5728_v20 = vpop.f32.mrb[61].mxu0  ;;  %v4117_v42 = vsel %vm1202_vm4, %v3961_v0, -inf  ;;  %v4120_v21 = vsel %vm1202_vm4, %v4007_v18, -inf }
 0xd9d   :  { %v3964_v24 = vpop.f32.mrb[62].mxu1  ;;  %4118 = vmax.xlane.f32.xlu0 %v4117_v42  ;;  %4121 = vmax.xlane.f32.xlu1 %v4120_v21  ;;  %v4010_v63 = vpop.f32.mrb[62].mxu0 }
 0xd9e   :  { %v5723_v9 = vpop.f32.mrb[63].mxu1  ;;  %v5729_v26 = vpop.f32.mrb[63].mxu0 }
 0xda3   :  { %v6791_v27 = vpop.f32.mrb[64].mxu1  ;;  %v6793_v43 = vpop.f32.mrb[64].mxu0 }
 0xda4   :  { %v5734_v59 = vpop.f32.mrb[65].mxu1  ;;  %v5740_v13 = vpop.f32.mrb[65].mxu0  ;;  %v4123_v36 = vsel %vm1202_vm4, %v6791_v27, -inf  ;;  %v4126_v44 = vsel %vm1202_vm4, %v6793_v43, -inf }
 0xda5   :  { %v4056_v62 = vpop.f32.mrb[66].mxu1  ;;  %4124 = vmax.xlane.f32.xlu0 %v4123_v36  ;;  %v4102_v37 = vpop.f32.mrb[66].mxu0 }
 0xda6   :  { %v5735_v17 = vpop.f32.mrb[67].mxu1  ;;  %v5741_v39 = vpop.f32.mrb[67].mxu0 }
 0xdae   :  { %3445 = vrot.lane.b32.xlu1 %v2829_v10, %s6005_s30 }
 0xdb2   :  { %3451 = vrot.lane.b32.xlu1 %v2829_v10, %s6003_s28 }
 0xdbb   :  { %3439 = vrot.lane.b32.xlu0 %v2829_v10, %s6004_s29 }
 0xdd6   :  { %4127 = vmax.xlane.f32.xlu1 %v4126_v44 }
 0xde7   :  { %3441 = vrot.lane.b32.xlu1 %v6807_v30, %s6004_s29 }
 0xe1a   :  { %v4107_v34 = vpop.xlane.xlu1 %4106  ;;  %v4110_v22 = vpop.xlane.xlu0 %4109 }
 0xe1b   :  { %v4129_v45 = vsub.f32 %v3777_v58, %v4107_v34  ;;  %v4130_v28 = vsub.f32 %v3823_v60, %v4110_v22 }
 0xe1d   :  { %v4137_v48 = vmul.f32 1.442695, %v4129_v45  ;;  %v4139_v49 = vmul.f32 1.442695, %v4130_v28 }
 0xe1f   :  { %5937 = vpow2.f32 %v4137_v48 }
 0xe20   :  { %5939 = vpow2.f32 %v4139_v49 }
 0xe22   :  { %v4113_v50 = vpop.xlane.xlu0 %4112  ;;  %v4116_v51 = vpop.xlane.xlu1 %4115 }
 0xe23   :  { %v4131_v41 = vsub.f32 %v3869_v7, %v4113_v50  ;;  %v4132_v29 = vsub.f32 %v3915_v1, %v4116_v51 }
 0xe25   :  { %v4141_v31 = vmul.f32 1.442695, %v4131_v41  ;;  %v4143_v52 = vmul.f32 1.442695, %v4132_v29 }
 0xe27   :  { %5941 = vpow2.f32 %v4141_v31 }
 0xe28   :  { %5943 = vpow2.f32 %v4143_v52 }
 0xe29   :  { %v6811_v35 = vpop.eup %5937 }
 0xe2a   :  { %v6813_v46 = vpop.eup %5939  ;;  %v4119_v56 = vpop.xlane.xlu0 %4118  ;;  %v4153_v58 = vsel %vm1202_vm4, %v6811_v35, 0.0 }
 0xe2b   :  { %v4122_v57 = vpop.xlane.xlu1 %4121  ;;  %v4133_v60 = vsub.f32 %v3961_v0, %v4119_v56  ;;  %4154 = vadd.xlane.f32.xlu0 %v4153_v58  ;;  %v4156_v4 = vsel %vm1202_vm4, %v6813_v46, 0.0 }
 0xe2c   :  { %v4134_v3 = vsub.f32 %v4007_v18, %v4122_v57  ;;  %4157 = vadd.xlane.f32.xlu1 %v4156_v4 }
 0xe2d   :  { %v4145_v53 = vmul.f32 1.442695, %v4133_v60 }
 0xe2e   :  { %v4147_v38 = vmul.f32 1.442695, %v4134_v3 }
 0xe2f   :  { %5945 = vpow2.f32 %v4145_v53  ;;  %v3446_v8 = vpop.permute.xlu1 %3445 }
 0xe30   :  { %5947 = vpow2.f32 %v4147_v38  ;;  %v3457_v11 = vcombine.low %v2829_v10, %v3446_v8  ;;  %v3458_v12 = vcombine.high %v2829_v10, %v3446_v8 }
 0xe31   :  { %v6819_v55 = vpop.eup %5941 }
 0xe32   :  { %v6821_v5 = vpop.eup %5943  ;;  %v4125_v6 = vpop.xlane.xlu0 %4124  ;;  %v4159_v7 = vsel %vm1202_vm4, %v6819_v55, 0.0  ;;  %v3465_v47 = vrot.slane %v3457_v11, %v6162_v54  ;;  %v3472_v0 = vrot.slane %v3458_v12, %v6162_v54 }
 0xe33   :  { %4160 = vadd.xlane.f32.xlu0 %v4159_v7  ;;  %v4162_v1 = vsel %vm1202_vm4, %v6821_v5, 0.0  ;;  %v3452_v15 = vpop.permute.xlu1 %3451  ;;  %v4135_v53 = vsub.f32 %v6791_v27, %v4125_v6 }
 0xe34   :  { %4163 = vadd.xlane.f32.xlu1 %v4162_v1 }
 0xe35   :  { %v4149_v38 = vmul.f32 1.442695, %v4135_v53 }
 0xe36   :  { %v3440_v16 = vpop.permute.xlu0 %3439 }
 0xe37   :  { %v3473_v14 = vcombine.low %v3440_v16, %v3452_v15  ;;  %v3474_v23 = vcombine.high %v3440_v16, %v3452_v15  ;;  %5949 = vpow2.f32 %v4149_v38 }
 0xe39   :  { %v6827_v32 = vpop.eup %5945  ;;  %v3481_v18 = vrot.slane %v3473_v14, %v6162_v54  ;;  %v3488_v19 = vrot.slane %v3474_v23, %v6162_v54 }
 0xe3a   :  { %v4165_v20 = vsel %vm1202_vm4, %v6827_v32, 0.0  ;;  %v6835_v42 = vpop.eup %5947 }
 0xe3b   :  { %v3489_v21 = vcombine.low %v3465_v47, %v3481_v18  ;;  %v3490_v24 = vcombine.high %v3465_v47, %v3481_v18  ;;  %v3505_v63 = vcombine.low %v3472_v0, %v3488_v19  ;;  %v3506_v9 = vcombine.high %v3472_v0, %v3488_v19  ;;  %4166 = vadd.xlane.f32.xlu0 %v4165_v20 }
 0xe3c   :  { %v4168_v62 = vsel %vm1202_vm4, %v6835_v42, 0.0 }
 0xe3d   :  { %v3497_v26 = vrot.slane %v3489_v21, %v6164_v61  ;;  %v3504_v59 = vrot.slane %v3490_v24, %v6164_v61  ;;  %v3513_v13 = vrot.slane %v3505_v63, %v6164_v61  ;;  %v3520_v36 = vrot.slane %v3506_v9, %v6164_v61 }
 0xe3f   :  { %v3593_v37 = vcombine.low %v3497_v26, %v3504_v59  ;;  %v5361_v17 = vcombine.high %v3497_v26, %v3504_v59  ;;  %v3609_v39 = vcombine.low %v3513_v13, %v3520_v36  ;;  %v5362_v40 = vcombine.high %v3513_v13, %v3520_v36  ;;  %4169 = vadd.xlane.f32.xlu0 %v4168_v62 }
 0xe41   :  { %v3600_v10 = vrot.slane %v3593_v37, %v6162_v54  ;;  %v3608_v44 = vrot.slane %v5361_v17, %v6162_v54  ;;  %v3616_v34 = vrot.slane %v3609_v39, %v6162_v54  ;;  %v3624_v22 = vrot.slane %v5362_v40, %v6162_v54  ;;  %v6861_v1 = vpop.eup %5949 }
 0xe42   :  { %v4171_v12 = vsel %vm1202_vm4, %v6861_v1, 0.0 }
 0xe43   :  { %v3625_v45 = vcombine.low %v3600_v10, %v3608_v44  ;;  %v3641_v28 = vcombine.low %v3616_v34, %v3624_v22  ;;  %v3626_v48 = vcombine.high %v3600_v10, %v3608_v44  ;;  %v3642_v49 = vcombine.high %v3616_v34, %v3624_v22 }
 0xe45   :  { %3453 = vrot.lane.b32.xlu1 %v6807_v30, %s6003_s28  ;;  %v3633_v50 = vrot.slane %v3625_v45, %v6164_v61  ;;  %v3649_v51 = vrot.slane %v3641_v28, %v6164_v61  ;;  %v3640_v41 = vrot.slane %v3626_v48, %v6164_v61  ;;  %v3656_v29 = vrot.slane %v3642_v49, %v6164_v61 }
 0xe47   :  { %v3657_v31 = vcombine.low %v3633_v50, %v3649_v51  ;;  %v3658_v52 = vcombine.high %v3633_v50, %v3649_v51  ;;  %v3659_v56 = vcombine.low %v3640_v41, %v3656_v29  ;;  %v3660_v57 = vcombine.high %v3640_v41, %v3656_v29 }
 0xe49   :  { %v3729_v58 = vpack.c.bf16 %v3657_v31, %v3657_v31  ;;  %v3730_v60 = vpack.c.bf16 %v3658_v52, %v3658_v52  ;;  %v3731_v19 = vpack.c.bf16 %v3659_v56, %v3659_v56  ;;  %v3732_v21 = vpack.c.bf16 %v3660_v57, %v3660_v57 }
 0xe4b   :  { %v4205_v3 = vsel %vm1670_vm5, %v3729_v58, 0  ;;  %v4251_v4 = vsel %vm1670_vm5, %v3730_v60, 0  ;;  %v4297_v26 = vsel %vm1670_vm5, %v3731_v19, 0  ;;  %v4343_v59 = vsel %vm1670_vm5, %v3732_v21, 0 }
 0xe4c   :  { %5743 = vmatpush3.bf16.msra.mxu1 %v4205_v3  ;;  %5749 = vmatpush3.bf16.msra.mxu0 %v4251_v4 }
 0xe4d   :  { %5754 = vmatprep.subr.bf16.mxu1 %v6001_v2  ;;  %5760 = vmatprep.subr.bf16.mxu0 %v6001_v2 }
 0xe55   :  { %3447 = vrot.lane.b32.xlu0 %v6807_v30, %s6005_s30 }
 0xe63   :  { %v4128_v8 = vpop.xlane.xlu1 %4127 }
 0xe64   :  { %v4136_v7 = vsub.f32 %v6793_v43, %v4128_v8 }
 0xe66   :  { %v4151_v11 = vmul.f32 1.442695, %v4136_v7 }
 0xe67   :  { %v3442_v6 = vpop.permute.xlu1 %3441 }
 0xe68   :  { %5951 = vpow2.f32 %v4151_v11 }
 0xe69   :  { %4172 = vadd.xlane.f32.xlu1 %v4171_v12 }
 0xe72   :  { %v6865_v15 = vpop.eup %5951 }
 0xe73   :  { %v4174_v27 = vsel %vm1202_vm4, %v6865_v15, 0.0 }
 0xe74   :  { %4175 = vadd.xlane.f32.xlu0 %v4174_v27 }
 0xeb8   :  { %v4155_v16 = vpop.xlane.xlu0 %4154 }
 0xeb9   :  { %5953 = vrcp.f32 %v4155_v16  ;;  %v4158_v14 = vpop.xlane.xlu1 %4157 }
 0xeba   :  { %5955 = vrcp.f32 %v4158_v14 }
 0xec0   :  { %v4161_v43 = vpop.xlane.xlu0 %4160 }
 0xec1   :  { %5957 = vrcp.f32 %v4161_v43  ;;  %v4164_v23 = vpop.xlane.xlu1 %4163 }
 0xec2   :  { %5959 = vrcp.f32 %v4164_v23 }
 0xec3   :  { %v5954_v47 = vpop.eup %5953 }
 0xec4   :  { %v5956_v0 = vpop.eup %5955  ;;  %v4185_v18 = vmul.f32 %v5954_v47, %v6811_v35 }
 0xec5   :  { %v4186_v20 = vmul.f32 %v5956_v0, %v6813_v46  ;;  %v3454_v36 = vpop.permute.xlu1 %3453 }
 0xec6   :  { %v4193_v24 = vpack.c.bf16 %v4185_v18, %v4185_v18  ;;  %v3541_v39 = vcombine.low %v3442_v6, %v3454_v36  ;;  %v3542_v40 = vcombine.high %v3442_v6, %v3454_v36 }
 0xec7   :  { %v4194_v63 = vpack.c.bf16 %v4186_v20, %v4186_v20 }
 0xec8   :  { %v4167_v9 = vpop.xlane.xlu0 %4166  ;;  %5745 = vmatmul.mubr.msk.bf16.vlgmr.msra.gmra.mrb[68].mxu1 %vm1202_vm4, %v4193_v24 }
 0xec9   :  { %5751 = vmatmul.mubr.msk.bf16.vlgmr.msra.gmra.mrb[68].mxu0 %vm1202_vm4, %v4194_v63  ;;  %5755 = vmatpush3.bf16.msra.mxu1 %v4297_v26  ;;  %5961 = vrcp.f32 %v4167_v9 }
 0xeca   :  { %5761 = vmatpush3.bf16.msra.mxu0 %v4343_v59  ;;  %5756 = vmatprep.mubr.msk.bf16.mxu1 %vm6002_vm1, %v6001_v2 }
 0xecb   :  { %v5958_v35 = vpop.eup %5957  ;;  %5762 = vmatprep.mubr.msk.bf16.mxu0 %vm6002_vm1, %v6001_v2  ;;  %5766 = vmatprep.subr.bf16.mxu1 %v6001_v2 }
 0xecc   :  { %v5960_v46 = vpop.eup %5959  ;;  %v4187_v13 = vmul.f32 %v5958_v35, %v6819_v55  ;;  %v4170_v62 = vpop.xlane.xlu0 %4169  ;;  %5772 = vmatprep.subr.bf16.mxu0 %v6001_v2  ;;  %v3549_v55 = vrot.slane %v3541_v39, %v6162_v54 }
 0xecd   :  { %v4188_v37 = vmul.f32 %v5960_v46, %v6821_v5  ;;  %v3556_v5 = vrot.slane %v3542_v40, %v6162_v54  ;;  %5963 = vrcp.f32 %v4170_v62 }
 0xece   :  { %v4195_v17 = vpack.c.bf16 %v4187_v13, %v4187_v13 }
 0xecf   :  { %v4196_v10 = vpack.c.bf16 %v4188_v37, %v4188_v37 }
 0xed0   :  { %v3448_v44 = vpop.permute.xlu0 %3447  ;;  %5757 = vmatmul.mubr.msk.bf16.vlgmr.msra.gmra.mrb[72].mxu1 %vm1202_vm4, %v4195_v17 }
 0xed1   :  { %v3525_v34 = vcombine.low %v6807_v30, %v3448_v44  ;;  %v3526_v22 = vcombine.high %v6807_v30, %v3448_v44  ;;  %5763 = vmatmul.mubr.msk.bf16.vlgmr.msra.gmra.mrb[72].mxu0 %vm1202_vm4, %v4196_v10  ;;  %5768 = vmatprep.mubr.msk.bf16.mxu1 %vm6002_vm1, %v6001_v2 }
 0xed2   :  { %5774 = vmatprep.mubr.msk.bf16.mxu0 %vm6002_vm1, %v6001_v2 }
 0xed3   :  { %v3533_v45 = vrot.slane %v3525_v34, %v6162_v54  ;;  %v3540_v28 = vrot.slane %v3526_v22, %v6162_v54  ;;  %v5962_v12 = vpop.eup %5961 }
 0xed4   :  { %v4189_v19 = vmul.f32 %v5962_v12, %v6827_v32 }
 0xed5   :  { %v3557_v48 = vcombine.low %v3533_v45, %v3549_v55  ;;  %v3558_v49 = vcombine.high %v3533_v45, %v3549_v55  ;;  %v3573_v30 = vcombine.low %v3540_v28, %v3556_v5  ;;  %v3574_v50 = vcombine.high %v3540_v28, %v3556_v5 }
 0xed6   :  { %v4197_v35 = vpack.c.bf16 %v4189_v19, %v4189_v19 }
 0xed7   :  { %v3565_v51 = vrot.slane %v3557_v48, %v6164_v61  ;;  %v3572_v41 = vrot.slane %v3558_v49, %v6164_v61  ;;  %v3581_v29 = vrot.slane %v3573_v30, %v6164_v61  ;;  %v3588_v31 = vrot.slane %v3574_v50, %v6164_v61  ;;  %v5964_v43 = vpop.eup %5963 }
 0xed8   :  { %v4190_v20 = vmul.f32 %v5964_v43, %v6835_v42 }
 0xed9   :  { %v3661_v52 = vcombine.low %v3565_v51, %v3572_v41  ;;  %v5363_v56 = vcombine.high %v3565_v51, %v3572_v41  ;;  %v3677_v57 = vcombine.low %v3581_v29, %v3588_v31  ;;  %v5364_v58 = vcombine.high %v3581_v29, %v3588_v31 }
 0xeda   :  { %v4198_v46 = vpack.c.bf16 %v4190_v20, %v4190_v20 }
 0xedb   :  { %v3668_v60 = vrot.slane %v3661_v52, %v6162_v54  ;;  %v3676_v3 = vrot.slane %v5363_v56, %v6162_v54  ;;  %v3684_v4 = vrot.slane %v3677_v57, %v6162_v54  ;;  %v3692_v53 = vrot.slane %v5364_v58, %v6162_v54 }
 0xedd   :  { %v3693_v38 = vcombine.low %v3668_v60, %v3676_v3  ;;  %v3709_v8 = vcombine.low %v3684_v4, %v3692_v53  ;;  %v3694_v7 = vcombine.high %v3668_v60, %v3676_v3  ;;  %v3710_v11 = vcombine.high %v3684_v4, %v3692_v53 }
 0xedf   :  { %v3701_v27 = vrot.slane %v3693_v38, %v6164_v61  ;;  %v3717_v6 = vrot.slane %v3709_v8, %v6164_v61  ;;  %v3708_v16 = vrot.slane %v3694_v7, %v6164_v61  ;;  %v3724_v14 = vrot.slane %v3710_v11, %v6164_v61 }
 0xee1   :  { %v3725_v23 = vcombine.low %v3701_v27, %v3717_v6  ;;  %v3726_v47 = vcombine.high %v3701_v27, %v3717_v6  ;;  %v3727_v0 = vcombine.low %v3708_v16, %v3724_v14  ;;  %v3728_v18 = vcombine.high %v3708_v16, %v3724_v14 }
 0xee3   :  { %v3733_v21 = vpack.c.bf16 %v3725_v23, %v3725_v23  ;;  %v3734_v24 = vpack.c.bf16 %v3726_v47, %v3726_v47  ;;  %v3735_v26 = vpack.c.bf16 %v3727_v0, %v3727_v0  ;;  %v3736_v59 = vpack.c.bf16 %v3728_v18, %v3728_v18 }
 0xee5   :  { %v4389_v63 = vsel %vm1670_vm5, %v3733_v21, 0  ;;  %v4435_v9 = vsel %vm1670_vm5, %v3734_v24, 0  ;;  %v4481_v32 = vsel %vm1670_vm5, %v3735_v26, 0  ;;  %v4527_v42 = vsel %vm1670_vm5, %v3736_v59, 0 }
 0xee6   :  { %5767 = vmatpush3.bf16.msra.mxu1 %v4389_v63  ;;  %5773 = vmatpush3.bf16.msra.mxu0 %v4435_v9 }
 0xee7   :  { %5778 = vmatprep.subr.bf16.mxu1 %v6001_v2  ;;  %5784 = vmatprep.subr.bf16.mxu0 %v6001_v2 }
 0xee9   :  { %5769 = vmatmul.mubr.msk.bf16.vlgmr.msra.gmra.mrb[76].mxu1 %vm1202_vm4, %v4197_v35  ;;  %5775 = vmatmul.mubr.msk.bf16.vlgmr.msra.gmra.mrb[76].mxu0 %vm1202_vm4, %v4198_v46 }
 0xeea   :  { %5779 = vmatpush3.bf16.msra.mxu1 %v4481_v32  ;;  %5785 = vmatpush3.bf16.msra.mxu0 %v4527_v42 }
 0xeeb   :  { %5780 = vmatprep.mubr.msk.bf16.mxu1 %vm6002_vm1, %v6001_v2  ;;  %5786 = vmatprep.mubr.msk.bf16.mxu0 %vm6002_vm1, %v6001_v2 }
 0xeec   :  { %5790 = vmatprep.subr.bf16.mxu1 %v6001_v2  ;;  %5798 = vmatprep.subr.bf16.mxu0 %v6001_v2 }
 0xef6   :  { %v4173_v13 = vpop.xlane.xlu1 %4172 }
 0xef7   :  { %5965 = vrcp.f32 %v4173_v13 }
 0xf01   :  { %v5966_v36 = vpop.eup %5965  ;;  %v4176_v62 = vpop.xlane.xlu0 %4175 }
 0xf02   :  { %v4191_v37 = vmul.f32 %v5966_v36, %v6861_v1  ;;  %5967 = vrcp.f32 %v4176_v62 }
 0xf04   :  { %v4199_v17 = vpack.c.bf16 %v4191_v37, %v4191_v37 }
 0xf06   :  { %5781 = vmatmul.mubr.msk.bf16.vlgmr.msra.gmra.mrb[80].mxu1 %vm1202_vm4, %v4199_v17 }
 0xf07   :  { %5794 = vmatprep.mubr.msk.bf16.mxu1 %vm6002_vm1, %v6001_v2 }
 0xf0c   :  { %v5968_v39 = vpop.eup %5967 }
 0xf0d   :  { %v4192_v40 = vmul.f32 %v5968_v39, %v6865_v15 }
 0xf0f   :  { %v4200_v10 = vpack.c.bf16 %v4192_v40, %v4192_v40 }
 0xf11   :  { %5787 = vmatmul.mubr.msk.bf16.vlgmr.msra.gmra.mrb[80].mxu0 %vm1202_vm4, %v4200_v10 }
 0xf12   :  { %5802 = vmatprep.mubr.msk.bf16.mxu0 %vm6002_vm1, %v6001_v2 }
 0xf9b   :  { %v4241_v44 = vpop.f32.mrb[68].mxu1 }
 0xf9c   :  { %v4287_v34 = vpop.f32.mrb[68].mxu0  ;;  %v5746_v22 = vpop.f32.mrb[69].mxu1 }
 0xf9d   :  { %v5752_v1 = vpop.f32.mrb[69].mxu0  ;;  %v4244_v55 = vpop.f32.mrb[70].mxu1 }
 0xf9e   :  { %v4290_v5 = vpop.f32.mrb[70].mxu0  ;;  %v5747_v45 = vpop.f32.mrb[71].mxu1 }
 0xf9f   :  { %v5753_v28 = vpop.f32.mrb[71].mxu0 }
 0xfa3   :  { %v4333_v48 = vpop.f32.mrb[72].mxu1 }
 0xfa4   :  { %v4569_v49 = vcombine.low %v4241_v44, %v4333_v48  ;;  %v4570_v30 = vcombine.high %v4241_v44, %v4333_v48  ;;  %v4379_v50 = vpop.f32.mrb[72].mxu0  ;;  %v5758_v51 = vpop.f32.mrb[73].mxu1 }
 0xfa5   :  { %v4585_v15 = vcombine.low %v4287_v34, %v4379_v50  ;;  %v4586_v41 = vcombine.high %v4287_v34, %v4379_v50  ;;  %v5764_v29 = vpop.f32.mrb[73].mxu0  ;;  %v4336_v31 = vpop.f32.mrb[74].mxu1 }
 0xfa6   :  { %v4577_v52 = vrot.slane %v4569_v49, %v6162_v54  ;;  %v4584_v56 = vrot.slane %v4570_v30, %v6162_v54  ;;  %v4382_v57 = vpop.f32.mrb[74].mxu0  ;;  %v5759_v58 = vpop.f32.mrb[75].mxu1 }
 0xfa7   :  { %v4593_v60 = vrot.slane %v4585_v15, %v6162_v54  ;;  %v4600_v3 = vrot.slane %v4586_v41, %v6162_v54  ;;  %v5765_v4 = vpop.f32.mrb[75].mxu0 }
 0xfa9   :  { %v4601_v53 = vcombine.low %v4577_v52, %v4593_v60  ;;  %v4602_v38 = vcombine.high %v4577_v52, %v4593_v60  ;;  %v4617_v8 = vcombine.low %v4584_v56, %v4600_v3  ;;  %v4618_v7 = vcombine.high %v4584_v56, %v4600_v3 }
 0xfab   :  { %v4609_v11 = vrot.slane %v4601_v53, %v6164_v61  ;;  %v4616_v12 = vrot.slane %v4602_v38, %v6164_v61  ;;  %v4625_v27 = vrot.slane %v4617_v8, %v6164_v61  ;;  %v4632_v6 = vrot.slane %v4618_v7, %v6164_v61 }
 0xfad   :  { %v4705_v16 = vcombine.low %v4609_v11, %v4616_v12  ;;  %v5381_v14 = vcombine.high %v4609_v11, %v4616_v12  ;;  %v4721_v43 = vcombine.low %v4625_v27, %v4632_v6  ;;  %v5382_v23 = vcombine.high %v4625_v27, %v4632_v6  ;;  %v5887_v12 = vld [vmem:[%s7086_s3 + $0x90] sm:$0xff]  }
 0xfae   :  { %5791 = vmatpush3.bf16.msra.mxu1 %v5887_v12 }
 0xfaf   :  { %v4712_v47 = vrot.slane %v4705_v16, %v6162_v54  ;;  %v4720_v0 = vrot.slane %v5381_v14, %v6162_v54  ;;  %v4728_v18 = vrot.slane %v4721_v43, %v6162_v54  ;;  %v4736_v19 = vrot.slane %v5382_v23, %v6162_v54  ;;  %5792 = vmatprep.subr.bf16.mxu1 %v6001_v2 }
 0xfb1   :  { %v4738_v20 = vcombine.high %v4712_v47, %v4720_v0  ;;  %v4754_v21 = vcombine.high %v4728_v18, %v4736_v19  ;;  %v4737_v24 = vcombine.low %v4712_v47, %v4720_v0  ;;  %v4753_v63 = vcombine.low %v4728_v18, %v4736_v19 }
 0xfb3   :  { %v6944_v9 = vrot.slane %v4738_v20, %v6164_v61  ;;  %v6947_v26 = vrot.slane %v4754_v21, %v6164_v61  ;;  %v6950_v59 = vrot.slane %v4737_v24, %v6164_v61  ;;  %v6953_v35 = vrot.slane %v4753_v63, %v6164_v61  ;;  %v5888_v24 = vld [vmem:[%s7086_s3 + $0x98] sm:$0xff]  }
 0xfb4   :  { %5793 = vmatpush3.bf16.msra.mxu1 %v5888_v24 }
 0xfb5   :  { %v4771_v46 = vcombine.low %v6944_v9, %v6947_v26  ;;  %v4769_v32 = vcombine.low %v6950_v59, %v6953_v35  ;;  %v4770_v42 = vcombine.high %v6950_v59, %v6953_v35  ;;  %v4772_v13 = vcombine.high %v6944_v9, %v6947_v26  ;;  %5806 = vmatprep.subr.bf16.mxu1 %v6001_v2  ;;  %v5385_v59 = vld [vmem:[%s7088_s5 + $0x13] ss:$0 sm:$0xff] }
 0xfbc   :  { %v4425_v36 = vpop.f32.mrb[76].mxu1  ;;  %v4471_v62 = vpop.f32.mrb[76].mxu0 }
 0xfbd   :  { %v5770_v37 = vpop.f32.mrb[77].mxu1  ;;  %v5776_v17 = vpop.f32.mrb[77].mxu0 }
 0xfbe   :  { %v4428_v39 = vpop.f32.mrb[78].mxu1  ;;  %v4474_v40 = vpop.f32.mrb[78].mxu0 }
 0xfbf   :  { %v5771_v10 = vpop.f32.mrb[79].mxu1  ;;  %v5777_v44 = vpop.f32.mrb[79].mxu0 }
 0xfd9   :  { %v4517_v34 = vpop.f32.mrb[80].mxu1 }
 0xfda   :  { %v4637_v22 = vcombine.low %v4425_v36, %v4517_v34  ;;  %v4638_v1 = vcombine.high %v4425_v36, %v4517_v34  ;;  %v5782_v55 = vpop.f32.mrb[81].mxu1 }
 0xfdb   :  { %v4520_v5 = vpop.f32.mrb[82].mxu1 }
 0xfdc   :  { %v5783_v45 = vpop.f32.mrb[83].mxu1  ;;  %v4645_v51 = vrot.slane %v4637_v22, %v6162_v54  ;;  %v4652_v15 = vrot.slane %v4638_v1, %v6162_v54 }
 0xfe4   :  { %v4563_v28 = vpop.f32.mrb[80].mxu0 }
 0xfe5   :  { %v4653_v48 = vcombine.low %v4471_v62, %v4563_v28  ;;  %v4654_v49 = vcombine.high %v4471_v62, %v4563_v28  ;;  %v5788_v30 = vpop.f32.mrb[81].mxu0 }
 0xfe6   :  { %v4566_v50 = vpop.f32.mrb[82].mxu0 }
 0xfe7   :  { %v4661_v41 = vrot.slane %v4653_v48, %v6162_v54  ;;  %v4668_v29 = vrot.slane %v4654_v49, %v6162_v54  ;;  %v5789_v31 = vpop.f32.mrb[83].mxu0 }
 0xfe9   :  { %v4669_v52 = vcombine.low %v4645_v51, %v4661_v41  ;;  %v4670_v56 = vcombine.high %v4645_v51, %v4661_v41  ;;  %v4685_v57 = vcombine.low %v4652_v15, %v4668_v29  ;;  %v4686_v58 = vcombine.high %v4652_v15, %v4668_v29 }
 0xfeb   :  { %v4677_v60 = vrot.slane %v4669_v52, %v6164_v61  ;;  %v4684_v3 = vrot.slane %v4670_v56, %v6164_v61  ;;  %v4693_v4 = vrot.slane %v4685_v57, %v6164_v61  ;;  %v4700_v53 = vrot.slane %v4686_v58, %v6164_v61 }
 0xfed   :  { %v4773_v38 = vcombine.low %v4677_v60, %v4684_v3  ;;  %v5383_v8 = vcombine.high %v4677_v60, %v4684_v3  ;;  %v4789_v7 = vcombine.low %v4693_v4, %v4700_v53  ;;  %v5384_v11 = vcombine.high %v4693_v4, %v4700_v53 }
 0xfef   :  { %v4780_v27 = vrot.slane %v4773_v38, %v6162_v54  ;;  %v4788_v6 = vrot.slane %v5383_v8, %v6162_v54  ;;  %v4796_v16 = vrot.slane %v4789_v7, %v6162_v54  ;;  %v4804_v14 = vrot.slane %v5384_v11, %v6162_v54  ;;  %v5890_v38 = vld [vmem:[%s7087_s4 + $0x18] sm:$0xff]   ;;  %v5891_v8 = vld [vmem:[%s7086_s3 + $0xa0] sm:$0xff]   ;;  %v5892_v7 = vld [vmem:[%s7086_s3 + $0xa8] sm:$0xff]  }
 0xff1   :  { %v4806_v43 = vcombine.high %v4780_v27, %v4788_v6  ;;  %v4822_v23 = vcombine.high %v4796_v16, %v4804_v14  ;;  %v4805_v47 = vcombine.low %v4780_v27, %v4788_v6  ;;  %v4821_v0 = vcombine.low %v4796_v16, %v4804_v14 }
 0xff3   :  { %v4820_v18 = vrot.slane %v4806_v43, %v6164_v61  ;;  %v4836_v19 = vrot.slane %v4822_v23, %v6164_v61  ;;  %v4813_v20 = vrot.slane %v4805_v47, %v6164_v61  ;;  %v4829_v21 = vrot.slane %v4821_v0, %v6164_v61  ;;  %v5389_v47 = vld [vmem:[%s7088_s5 + $0x15] ss:$0 sm:$0xff] }
 0xff5   :  { %v4839_v54 = vcombine.low %v4820_v18, %v4836_v19  ;;  %v4838_v63 = vcombine.high %v4813_v20, %v4829_v21  ;;  %v4837_v9 = vcombine.low %v4813_v20, %v4829_v21  ;;  %v4840_v26 = vcombine.high %v4820_v18, %v4836_v19  ;;  %v5390_v20 = vld [vmem:[%s7088_s5 + $0x16] ss:$0 sm:$0xff] }
 0xff7   :  { %v5857_v36 = vpack.i.bf16 %v4839_v54, %v4771_v46  ;;  %v5852_v62 = vpack.i.bf16 %v4838_v63, %v4770_v42  ;;  %v5862_v37 = vpack.i.bf16 %v4840_v26, %v4772_v13  ;;  %v5894_v26 = vld [vmem:[%s7086_s3 + $0xb8] sm:$0xff]  }
 0xff9   :  { %5858 = vrot.lane.b32.xlu1 %v5857_v36, %s6008_s13  ;;  %5853 = vrot.lane.b32.xlu0 %v5852_v62, %s6009_s14  ;;  %v5391_v36 = vld [vmem:[%s7088_s5 + $0x19] ss:$0 sm:$0xff] }
 0xffd   :  { %5863 = vrot.lane.b32.xlu1 %v5862_v37, %s6010_s15 }
0x106b   :  { %v5859_v61 = vpop.permute.xlu1 %5858  ;;  %v5854_v17 = vpop.permute.xlu0 %5853 }
0x106c   :  { %v5856_v39 = vunpack.i.h.bf16 %v5854_v17  ;;  %v5855_v40 = vunpack.i.l.bf16 %v5854_v17  ;;  %v5861_v10 = vunpack.i.h.bf16 %v5859_v61  ;;  %v5860_v44 = vunpack.i.l.bf16 %v5859_v61 }
0x106e   :  { %v4865_v34 = vsel %vm1202_vm4, %v4769_v32, %v5855_v40  ;;  %v4866_v46 = vsel %vm1202_vm4, %v4837_v9, %v5856_v39  ;;  %v5893_v9 = vld [vmem:[%s7086_s3 + $0xb0] sm:$0xff]  }
0x106f   :  { %v5864_v42 = vpop.permute.xlu1 %5863  ;;  %v4867_v1 = vsel %vm2334_vm6, %v4865_v34, %v5860_v44  ;;  %v4868_v55 = vsel %vm2334_vm6, %v4866_v46, %v5861_v10  ;;  %v5395_v46 = vld [vmem:[%s7088_s5 + $0x14] ss:$0 sm:$0xff] }
0x1070   :  { %v5866_v13 = vunpack.i.h.bf16 %v5864_v42  ;;  %v5865_v22 = vunpack.i.l.bf16 %v5864_v42 }
0x1072   :  { %v4869_v5 = vsel %vm2337_vm7, %v4867_v1, %v5865_v22  ;;  %v4870_v45 = vsel %vm2337_vm7, %v4868_v55, %v5866_v13 }
0x1073   :  { %v4871_v28 = vpack.c.bf16 %v4870_v45, %v4869_v5 }
0x1075   :  { %5795 = vmatmul.mubr.msk.bf16.vlgmr.msra.gmra.mrb[84].mxu1 %vm141_vm3, %v4871_v28 }
0x1076   :  { %5814 = vmatprep.mubr.msk.bf16.mxu1 %vm6002_vm1, %v6001_v2  ;;  %5807 = vmatpush3.bf16.msra.mxu1 %v5891_v8 }
0x1077   :  { %5808 = vmatprep.subr.bf16.mxu1 %v6001_v2 }
0x107a   :  { %5809 = vmatpush3.bf16.msra.mxu1 %v5892_v7 }
0x107b   :  { %5810 = vmatprep.subr.bf16.mxu1 %v6001_v2 }
0x107e   :  { %5811 = vmatpush3.bf16.msra.mxu1 %v5893_v9 }
0x107f   :  { %5812 = vmatprep.subr.bf16.mxu1 %v6001_v2 }
0x1082   :  { %5813 = vmatpush3.bf16.msra.mxu1 %v5894_v26 }
0x1148   :  { %v4925_v35 = vpop.f32.mrb[84].mxu1 }
0x1149   :  { %v4926_v32 = vadd.f32 %v5385_v59, %v4925_v35  ;;  %v5796_v48 = vpop.f32.mrb[85].mxu1 }
0x114a   :  { %v4928_v49 = vpop.f32.mrb[86].mxu1 }
0x114b   :  { %v4929_v30 = vadd.f32 %v5385_v59, %v4928_v49  ;;  %v5797_v50 = vpop.f32.mrb[87].mxu1  ;;  %v4932_v51 = vadd.f32 %v4926_v32, %v6602_v25 }
0x114d   :  { %v4934_v15 = vsel %vm141_vm3, %v4932_v51, 0.0  ;;  %v4933_v41 = vadd.f32 %v4929_v30, %v6604_v33  ;;  %v5889_v33 = vld [vmem:[%s7087_s4 + $0x10] sm:$0xff]  }
0x114e   :  { %4935 = vadd.xlane.f32.xlu0 %v4934_v15  ;;  %5799 = vmatpush3.bf16.msra.mxu0 %v5889_v33  ;;  %v5401_v33 = vld [vmem:[%s7088_s5 + $0x17] ss:$0 sm:$0xff] }
0x114f   :  { %v4937_v29 = vsel %vm141_vm3, %v4933_v41, 0.0  ;;  %5800 = vmatprep.subr.bf16.mxu0 %v6001_v2 }
0x1150   :  { %4938 = vadd.xlane.f32.xlu1 %v4937_v29 }
0x1152   :  { %5801 = vmatpush3.bf16.msra.mxu0 %v5890_v38 }
0x1153   :  { %5818 = vmatprep.subr.bf16.mxu0 %v6001_v2 }
0x11db   :  { %v4936_v31 = vpop.xlane.xlu0 %4935 }
0x11dc   :  { %v4940_v52 = vmul.f32 0.03125, %v4936_v31 }
0x11dd   :  { %v4939_v56 = vpop.xlane.xlu1 %4938 }
0x11de   :  { %v4942_v57 = vsub.f32 %v4932_v51, %v4940_v52  ;;  %v4941_v58 = vmul.f32 0.03125, %v4939_v56  ;;  %v5895_v52 = vld [vmem:[%s7089_s6] sm:$0xff]   ;;  %v5896_v56 = vld [vmem:[%s7089_s6 + $0x8] sm:$0xff]  }
0x11e0   :  { %v4943_v60 = vsub.f32 %v4933_v41, %v4941_v58  ;;  %v4944_v3 = vmul.f32 %v4942_v57, %v4942_v57 }
0x11e2   :  { %v4946_v4 = vsel %vm141_vm3, %v4944_v3, 0.0  ;;  %v4945_v53 = vmul.f32 %v4943_v60, %v4943_v60 }
0x11e3   :  { %4947 = vadd.xlane.f32.xlu0 %v4946_v4 }
0x11e4   :  { %v4949_v25 = vsel %vm141_vm3, %v4945_v53, 0.0 }
0x11e7   :  { %4950 = vadd.xlane.f32.xlu0 %v4949_v25 }
0x1270   :  { %v4948_v11 = vpop.xlane.xlu0 %4947 }
0x1271   :  { %v4952_v12 = vmul.f32 0.03125, %v4948_v11 }
0x1273   :  { %v4954_v27 = vadd.f32 1e-05, %v4952_v12 }
0x1274   :  { %v4951_v6 = vpop.xlane.xlu0 %4950 }
0x1275   :  { %5969 = vrsqrt.f32 %v4954_v27  ;;  %v4953_v16 = vmul.f32 0.03125, %v4951_v6 }
0x1277   :  { %v4955_v14 = vadd.f32 1e-05, %v4953_v16 }
0x1279   :  { %5971 = vrsqrt.f32 %v4955_v14 }
0x127f   :  { %v5970_v43 = vpop.eup %5969 }
0x1280   :  { %v4958_v23 = vmul.f32 %v5970_v43, %v4942_v57 }
0x1282   :  { %v4964_v18 = vmul.f32 %v5389_v47, %v4958_v23 }
0x1283   :  { %v5972_v0 = vpop.eup %5971 }
0x1284   :  { %v4959_v19 = vmul.f32 %v5972_v0, %v4943_v60  ;;  %v4970_v24 = vadd.f32 %v5390_v20, %v4964_v18 }
0x1286   :  { %v4965_v21 = vmul.f32 %v5389_v47, %v4959_v19 }
0x1288   :  { %v4971_v54 = vadd.f32 %v5390_v20, %v4965_v21  ;;  %v5403_v20 = vld [vmem:[%s7090_s7] ss:$0 sm:$0xff] }
0x128a   :  { %v4972_v63 = vpack.c.bf16 %v4971_v54, %v4970_v24 }
0x128c   :  { %5803 = vmatmul.mubr.msk.bf16.vlgmr.msra.gmra.mrb[84].mxu0 %vm141_vm3, %v4972_v63 }
0x128d   :  { %5822 = vmatprep.mubr.msk.bf16.mxu0 %vm6002_vm1, %v6001_v2  ;;  %5819 = vmatpush3.bf16.msra.mxu0 %v5895_v52 }
0x128e   :  { %5820 = vmatprep.subr.bf16.mxu0 %v6001_v2  ;;  %v5402_v2 = vld [vmem:[%s7088_s5 + $0x18] ss:$0 sm:$0xff]  ;;  %s6011_s5 = smov [#allocation2]  }
0x128f   :  { %s5232_s23 = sshll.u32 %s6011_s5, 4  ;;  %s5233_s23 = int_to_ptr.vmem [resolvable:$true] %s5232_s23 }
0x1290   :  { %s5977_s24 = scalar_lea.vmem %s5233_s23, 32  ;;  %p5982_p1 = scmp.lt.s32.totalorder %s5233_s23, %s5233_s23 }
0x1291   :  { %5821 = vmatpush3.bf16.msra.mxu0 %v5896_v56  ;;  %p5978_p0 = scmp.ne.s32.totalorder %s5233_s23, %s5977_s24  ;;  %p5983_p2 = scmp.lt.s32.totalorder %s5977_s24, %s5977_s24 }
0x1293   :  { %p5984_p3 = por %p5983_p2, %p5982_p1 }
0x1295   :  { %p5985_p4 = pnand %p5984_p3, %p5978_p0 }
0x135f   :  { %v5026_v62 = vpop.f32.mrb[84].mxu0 }
0x1360   :  { %v5027_v37 = vadd.f32 %v5391_v36, %v5026_v62  ;;  %v5804_v61 = vpop.f32.mrb[85].mxu0 }
0x1361   :  { %v5029_v17 = vpop.f32.mrb[86].mxu0 }
0x1362   :  { %v5030_v39 = vadd.f32 %v5391_v36, %v5029_v17  ;;  %v5805_v40 = vpop.f32.mrb[87].mxu0  ;;  %v5033_v10 = vmax.f32 %v5027_v37, 0.0 }
0x1364   :  { %v5034_v44 = vmax.f32 %v5030_v39, 0.0 }
0x1366   :  { %v5035_v34 = vpack.c.bf16 %v5034_v44, %v5033_v10 }
0x1368   :  { %5815 = vmatmul.mubr.msk.bf16.vlgmr.msra.gmra.mrb[88].mxu1 %vm2534_vm8, %v5035_v34 }
0x143b   :  { %v5101_v42 = vpop.f32.mrb[88].mxu1 }
0x143c   :  { %v5102_v13 = vadd.f32 %v5395_v46, %v5101_v42  ;;  %v5816_v22 = vpop.f32.mrb[89].mxu1 }
0x143d   :  { %v5104_v1 = vpop.f32.mrb[90].mxu1 }
0x143e   :  { %v5105_v55 = vadd.f32 %v5395_v46, %v5104_v1  ;;  %v5817_v5 = vpop.f32.mrb[91].mxu1  ;;  %v5108_v45 = vadd.f32 %v5102_v13, %v4970_v24 }
0x1440   :  { %v5110_v28 = vsel %vm141_vm3, %v5108_v45, 0.0  ;;  %v5109_v59 = vadd.f32 %v5105_v55, %v4971_v54 }
0x1441   :  { %5111 = vadd.xlane.f32.xlu1 %v5110_v28 }
0x1442   :  { %v5113_v35 = vsel %vm141_vm3, %v5109_v59, 0.0 }
0x1443   :  { %5114 = vadd.xlane.f32.xlu0 %v5113_v35 }
0x14ce   :  { %v5112_v32 = vpop.xlane.xlu1 %5111 }
0x14cf   :  { %v5116_v48 = vmul.f32 0.03125, %v5112_v32 }
0x14d0   :  { %v5115_v49 = vpop.xlane.xlu0 %5114 }
0x14d1   :  { %v5118_v30 = vsub.f32 %v5108_v45, %v5116_v48  ;;  %v5117_v50 = vmul.f32 0.03125, %v5115_v49 }
0x14d3   :  { %v5119_v51 = vsub.f32 %v5109_v59, %v5117_v50  ;;  %v5120_v15 = vmul.f32 %v5118_v30, %v5118_v30 }
0x14d5   :  { %v5122_v41 = vsel %vm141_vm3, %v5120_v15, 0.0  ;;  %v5121_v29 = vmul.f32 %v5119_v51, %v5119_v51 }
0x14d6   :  { %5123 = vadd.xlane.f32.xlu1 %v5122_v41 }
0x14d7   :  { %v5125_v31 = vsel %vm141_vm3, %v5121_v29, 0.0 }
0x14d8   :  { %5126 = vadd.xlane.f32.xlu0 %v5125_v31 }
0x1563   :  { %v5124_v57 = vpop.xlane.xlu1 %5123 }
0x1564   :  { %v5128_v58 = vmul.f32 0.03125, %v5124_v57 }
0x1565   :  { %v5127_v60 = vpop.xlane.xlu0 %5126 }
0x1566   :  { %v5130_v3 = vadd.f32 1e-05, %v5128_v58  ;;  %v5129_v4 = vmul.f32 0.03125, %v5127_v60 }
0x1568   :  { %5973 = vrsqrt.f32 %v5130_v3  ;;  %v5131_v53 = vadd.f32 1e-05, %v5129_v4 }
0x156a   :  { %5975 = vrsqrt.f32 %v5131_v53 }
0x1572   :  { %v5974_v25 = vpop.eup %5973 }
0x1573   :  { %v5134_v38 = vmul.f32 %v5974_v25, %v5118_v30 }
0x1574   :  { %v5976_v8 = vpop.eup %5975 }
0x1575   :  { %v5140_v7 = vmul.f32 %v5401_v33, %v5134_v38  ;;  %v5135_v11 = vmul.f32 %v5976_v8, %v5119_v51 }
0x1577   :  { %v5146_v12 = vadd.f32 %v5402_v2, %v5140_v7  ;;  %v5141_v27 = vmul.f32 %v5401_v33, %v5135_v11 }
0x1579   :  { %v5148_v6 = vpack.c.bf16 %v5146_v12, %v5146_v12  ;;  %v5147_v16 = vadd.f32 %v5402_v2, %v5141_v27 }
0x157b   :  { %v5163_v14 = vunpack.c.l.b16 %v5148_v6  ;;  %v5149_v43 = vpack.c.bf16 %v5147_v16, %v5147_v16 }
0x157d   :  { %v5164_v23 = vunpack.c.l.b16 %v5149_v43  ;;  %v5165_v47 = vrot.slane %v5163_v14, 7 }
0x157f   :  { %v5166_v0 = vrot.slane %v5164_v23, 6 }
0x1581   :  { %v5168_v18 = vsel %vm5167_vm9, %v5166_v0, %v5165_v47 }
0x1582   :  { %v5169_v19 = vpack.c.b16 %v5168_v18, %v5168_v18 }
0x1584   :  { %5823 = vmatmul.mubr.msk.bf16.vlgmr.msra.gmra.mrb[88].mxu0 %vm141_vm3, %v5169_v19 }
0x1657   :  { %v5219_v21 = vpop.f32.mrb[88].mxu0 }
0x1658   :  { %v5220_v24 = vadd.f32 %v5403_v20, %v5219_v21  ;;  %v5824_v54 = vpop.f32.mrb[89].mxu0 }
0x1659   :  { %v5222_v63 = vpop.f32.mrb[90].mxu0 }
0x165a   :  { %5225 = vst [vmem:[#allocation2] sm:$0x3] %v5220_v24  ;;  %v5825_v9 = vpop.f32.mrb[91].mxu0 }
0x165b   :  { %5988 = shalt.err (!%p5985_p4)
}
0x165c   :  { %s5989_s7 = scalar_lea.hbm %s7091_s8, 32 }
0x165d   :  { %p5990_p5 = scmp.ne.s32.totalorder %s7091_s8, %s5989_s7  ;;  %p5993_p6 = scmp.lt.u32.totalorder %s5989_s7, %s7091_s8 }
0x165f   :  { %p5995_p7 = pnand %p5993_p6, %p5990_p5 }
0x1661   :  { %5998 = shalt.err (!%p5995_p7)
}
0x1662   :  { %5235 = dma.vmem_to_hbm [thread:$0]  %s5233_s23, 32, %s7091_s8, [#allocation3]  }
0x1663   :  { %5999 = dma.done.wait [#allocation3], 32  }
0x1664   :  { %6000 = vsyncadd [#allocation3], 4294967264 }
0x1665   :  { %5239 = vsyncpa [#allocation3], 1 }

</bundles_post_ra>
